<compile_context>
chip_gen: v7x
topology: tpu7x:2x2x1
jax: 0.10.0
libtpu: 0.0.40
codegen_flags: <defaults>
</compile_context>

<pallas_src>
import jax
import jax.numpy as jnp
from jax.experimental import pallas as pl
from jax.experimental.pallas import tpu as pltpu

IMAGE_SIZE = 784
H_DIM = 400
H_PAD = 512          # hidden dim padded to 4 lane-tiles (pad cols/rows are zero)
Z_DIM = 20
Z_PAD = 128          # latent dim padded to a full lane width
TILE_B_MAX = 512     # max batch rows per grid step (multiple of 128)


def _vae_kernel(x_ref, eps_ref,
                w1_ref, b1_ref, w23_ref, b23_ref,
                w4_ref, b4_ref, w5_ref, b5_ref,
                xr_ref, mu_ref, lv_ref):
    # encode: h = relu(x @ W1 + b1)   (x already bf16; f32 accumulate)
    h = jnp.dot(x_ref[...], w1_ref[...],
                preferred_element_type=jnp.float32) + b1_ref[...]
    h = jnp.maximum(h, 0.0)

    # fused fc2/fc3: one matmul over K=H_PAD; mu in lanes [0,Z_PAD),
    # log_var in lanes [Z_PAD, 2*Z_PAD)
    ml = jnp.dot(h.astype(jnp.bfloat16), w23_ref[...],
                 preferred_element_type=jnp.float32) + b23_ref[...]
    mu = ml[:, :Z_PAD]
    lv = ml[:, Z_PAD:]

    # reparameterize: z = mu + eps * exp(log_var / 2)
    # (eps pad lanes and W4 pad rows are zero, so padded latent lanes are inert)
    std = jnp.exp(lv * 0.5)
    z = mu + eps_ref[...] * std          # bf16 eps promotes to f32

    # decode: x_reconst = sigmoid(relu(z @ W4 + b4) @ W5 + b5)
    h2 = jnp.dot(z.astype(jnp.bfloat16), w4_ref[...],
                 preferred_element_type=jnp.float32) + b4_ref[...]
    h2 = jnp.maximum(h2, 0.0)
    logits = jnp.dot(h2.astype(jnp.bfloat16), w5_ref[...],
                     preferred_element_type=jnp.float32) + b5_ref[...]
    # sigmoid(x) = 0.5*(tanh(x/2)+1): single EUP op per element
    xr_ref[...] = (0.5 * (jnp.tanh(logits * 0.5) + 1.0)).astype(xr_ref.dtype)

    mu_ref[...] = mu
    lv_ref[...] = lv


def _choose_tile(batch, tile_max=TILE_B_MAX):
    """Static heuristic: prefer >=2 grid steps (v7x megacore), then minimal
    batch padding, then the largest tile (amortizes ~0.35us/step overhead)."""
    best_key, best_t = None, 128
    for t in range(128, tile_max + 1, 128):
        steps = -(-batch // t)
        pad = steps * t - batch
        key = (0 if steps >= 2 else 1, pad, -t)
        if best_key is None or key < best_key:
            best_key, best_t = key, t
    return best_t


def vae_forward(x, eps, params, *, tile_max=TILE_B_MAX):
    """x: [B, IMAGE_SIZE] f32, eps: [B, Z_DIM] f32 (the randn_like sample).

    Returns (x_reconst [B, IMAGE_SIZE] bf16, mu [B, Z_DIM] f32,
             log_var [B, Z_DIM] f32).
    """
    B = x.shape[0]
    tile_b = _choose_tile(B, tile_max)
    B_pad = pl.cdiv(B, tile_b) * tile_b

    # pad batch to a tile multiple; store x/eps as bf16 (pad copy exists anyway,
    # halves the kernel's largest input DMA)
    x_bf = x.astype(jnp.bfloat16)
    if B_pad == B:
        x_p = x_bf                               # skip the extra pad pass
    else:
        x_p = jnp.zeros((B_pad, IMAGE_SIZE), jnp.bfloat16).at[:B].set(x_bf)
    eps_p = (jnp.zeros((B_pad, Z_PAD), jnp.bfloat16)
             .at[:B, :eps.shape[1]].set(eps.astype(jnp.bfloat16)))

    def batch_spec(n):
        return pl.BlockSpec((tile_b, n), lambda i: (i, 0))

    def pinned(p):   # whole array resident in VMEM, same block every grid step
        return pl.BlockSpec(p.shape, lambda i: (0, 0))

    out_shapes = (
        # TODO(synk): confirm downstream consumer (BCE loss) tolerates bf16 x_reconst.
        jax.ShapeDtypeStruct((B_pad, IMAGE_SIZE), jnp.bfloat16),
        jax.ShapeDtypeStruct((B_pad, Z_PAD), jnp.float32),
        jax.ShapeDtypeStruct((B_pad, Z_PAD), jnp.float32),
    )

    xr, mu, lv = pl.pallas_call(
        _vae_kernel,
        out_shape=out_shapes,
        grid_spec=pltpu.PrefetchScalarGridSpec(
            num_scalar_prefetch=0,
            grid=(B_pad // tile_b,),
            in_specs=[batch_spec(IMAGE_SIZE), batch_spec(Z_PAD)]
                     + [pinned(p) for p in params],
            out_specs=[batch_spec(IMAGE_SIZE), batch_spec(Z_PAD),
                       batch_spec(Z_PAD)],
        ),
        compiler_params=pltpu.CompilerParams(
            dimension_semantics=("parallel",),
            vmem_limit_bytes=32 * 1024 * 1024),   # raise v5e's 16 MiB default
    )(x_p, eps_p, *params)

    return xr[:B], mu[:B, :Z_DIM], lv[:B, :Z_DIM]


def init_params(key):
    """nn.Linear-style init; weights stored [in, out], then fused/padded/bf16."""
    def linear(key, fan_in, fan_out):
        kw, kb = jax.random.split(key)
        bound = 1.0 / (fan_in ** 0.5)
        w = jax.random.uniform(kw, (fan_in, fan_out), jnp.float32, -bound, bound)
        b = jax.random.uniform(kb, (1, fan_out), jnp.float32, -bound, bound)
        return w, b

    k1, k2, k3, k4, k5 = jax.random.split(key, 5)
    w1, b1 = linear(k1, IMAGE_SIZE, H_DIM)   # fc1
    w2, b2 = linear(k2, H_DIM, Z_DIM)        # fc2 (mu)
    w3, b3 = linear(k3, H_DIM, Z_DIM)        # fc3 (log_var)
    w4, b4 = linear(k4, Z_DIM, H_DIM)        # fc4
    w5, b5 = linear(k5, H_DIM, IMAGE_SIZE)   # fc5

    # hidden dim padded 400 -> 512 with zeros; fc2/fc3 fused into one
    # [H_PAD, 2*Z_PAD] weight (mu lanes [0,Z_PAD), log_var [Z_PAD,2*Z_PAD));
    # latent dim zero-padded 20 -> Z_PAD.  All pad rows/cols are exactly zero,
    # which keeps the padded lanes inert through the whole network.
    w1p = jnp.zeros((IMAGE_SIZE, H_PAD), jnp.float32).at[:, :H_DIM].set(w1)
    b1p = jnp.zeros((1, H_PAD), jnp.float32).at[:, :H_DIM].set(b1)

    w23 = jnp.zeros((H_PAD, 2 * Z_PAD), jnp.float32)
    w23 = w23.at[:H_DIM, :Z_DIM].set(w2).at[:H_DIM, Z_PAD:Z_PAD + Z_DIM].set(w3)
    b23 = jnp.zeros((1, 2 * Z_PAD), jnp.float32)
    b23 = b23.at[:, :Z_DIM].set(b2).at[:, Z_PAD:Z_PAD + Z_DIM].set(b3)

    w4p = jnp.zeros((Z_PAD, H_PAD), jnp.float32).at[:Z_DIM, :H_DIM].set(w4)
    b4p = jnp.zeros((1, H_PAD), jnp.float32).at[:, :H_DIM].set(b4)
    w5p = jnp.zeros((H_PAD, IMAGE_SIZE), jnp.float32).at[:H_DIM].set(w5)

    bf = jnp.bfloat16
    return (w1p.astype(bf), b1p,
            w23.astype(bf), b23,
            w4p.astype(bf), b4p,
            w5p.astype(bf), b5)


def vae_reference(x_bf16, eps_pad_bf16, params):
    """Plain-JAX f32 reference on the same (fused, padded, bf16) weights/inputs."""
    w1, b1, w23, b23, w4, b4, w5, b5 = [p.astype(jnp.float32) for p in params]
    x = x_bf16.astype(jnp.float32)
    eps = eps_pad_bf16.astype(jnp.float32)
    h = jnp.maximum(x @ w1 + b1, 0.0)
    ml = h @ w23 + b23
    mu, lv = ml[:, :Z_PAD], ml[:, Z_PAD:]
    z = mu + eps * jnp.exp(lv * 0.5)
    h2 = jnp.maximum(z @ w4 + b4, 0.0)
    xr = jax.nn.sigmoid(h2 @ w5 + b5)
    return xr, mu[:, :Z_DIM], lv[:, :Z_DIM]


if __name__ == "__main__":
    key = jax.random.PRNGKey(0)
    k_params, k_x, k_eps = jax.random.split(key, 3)

    B = 300                                  # -> tile_b=128, 3 grid steps, pad to 384
    params = init_params(k_params)
    x = jax.random.uniform(k_x, (B, IMAGE_SIZE), jnp.float32)   # "pixels" in [0,1)
    eps = jax.random.normal(k_eps, (B, Z_DIM), jnp.float32)     # randn_like(std)

    x_reconst, mu, log_var = jax.block_until_ready(vae_forward(x, eps, params))

    # correctness check (bf16 weights/activations in the kernel -> loose tol)
    x_bf = x.astype(jnp.bfloat16)
    eps_pad = (jnp.zeros((B, Z_PAD), jnp.bfloat16).at[:, :Z_DIM]
               .set(eps.astype(jnp.bfloat16)))
    xr_ref, mu_ref, lv_ref = vae_reference(x_bf, eps_pad, params)
    assert x_reconst.shape == (B, IMAGE_SIZE)
    assert mu.shape == (B, Z_DIM) and log_var.shape == (B, Z_DIM)
    assert jnp.allclose(x_reconst.astype(jnp.float32), xr_ref, atol=3e-2, rtol=3e-2)
    assert jnp.allclose(mu, mu_ref, atol=3e-2, rtol=3e-2)
    assert jnp.allclose(log_var, lv_ref, atol=3e-2, rtol=3e-2)

    print("KERNEL_OK")
</pallas_src>

<mosaic_0001>
module attributes {stable_mosaic.version = 11 : i64} {
  func.func @_vae_kernel(%arg0: i32, %arg1: memref<128x784xbf16, #tpu.memory_space<vmem>>, %arg2: memref<128x128xbf16, #tpu.memory_space<vmem>>, %arg3: memref<784x512xbf16, #tpu.memory_space<vmem>>, %arg4: memref<1x512xf32, #tpu.memory_space<vmem>>, %arg5: memref<512x256xbf16, #tpu.memory_space<vmem>>, %arg6: memref<1x256xf32, #tpu.memory_space<vmem>>, %arg7: memref<128x512xbf16, #tpu.memory_space<vmem>>, %arg8: memref<1x512xf32, #tpu.memory_space<vmem>>, %arg9: memref<512x784xbf16, #tpu.memory_space<vmem>>, %arg10: memref<1x784xf32, #tpu.memory_space<vmem>>, %arg11: memref<128x784xbf16, #tpu.memory_space<vmem>>, %arg12: memref<128x128xf32, #tpu.memory_space<vmem>>, %arg13: memref<128x128xf32, #tpu.memory_space<vmem>>) attributes {dimension_semantics = [#tpu.dimension_semantics<parallel>], iteration_bounds = array<i64: 3>, scalar_prefetch = 0 : i64, scratch_operands = 0 : i64, tpu.core_type = #tpu.core_type<tc>, window_params = [{transform_indices = @transform_0, window_bounds = array<i64: 128, 784>}, {transform_indices = @transform_1, window_bounds = array<i64: 128, 128>}, {pipeline_mode = #tpu.pipeline_mode<synchronous>, transform_indices = @transform_2, window_bounds = array<i64: 784, 512>}, {pipeline_mode = #tpu.pipeline_mode<synchronous>, transform_indices = @transform_3, window_bounds = array<i64: 1, 512>}, {pipeline_mode = #tpu.pipeline_mode<synchronous>, transform_indices = @transform_4, window_bounds = array<i64: 512, 256>}, {pipeline_mode = #tpu.pipeline_mode<synchronous>, transform_indices = @transform_5, window_bounds = array<i64: 1, 256>}, {pipeline_mode = #tpu.pipeline_mode<synchronous>, transform_indices = @transform_6, window_bounds = array<i64: 128, 512>}, {pipeline_mode = #tpu.pipeline_mode<synchronous>, transform_indices = @transform_7, window_bounds = array<i64: 1, 512>}, {pipeline_mode = #tpu.pipeline_mode<synchronous>, transform_indices = @transform_8, window_bounds = array<i64: 512, 784>}, {pipeline_mode = #tpu.pipeline_mode<synchronous>, transform_indices = @transform_9, window_bounds = array<i64: 1, 784>}, {transform_indices = @transform_10, window_bounds = array<i64: 128, 784>}, {transform_indices = @transform_11, window_bounds = array<i64: 128, 128>}, {transform_indices = @transform_12, window_bounds = array<i64: 128, 128>}]} {
    %c0 = arith.constant 0 : index
    %c0_0 = arith.constant 0 : index
    %0 = vector.load %arg1[%c0, %c0_0] : memref<128x784xbf16, #tpu.memory_space<vmem>>, vector<128x784xbf16>
    %c0_1 = arith.constant 0 : index
    %c0_2 = arith.constant 0 : index
    %1 = vector.load %arg3[%c0_1, %c0_2] : memref<784x512xbf16, #tpu.memory_space<vmem>>, vector<784x512xbf16>
    %cst = arith.constant dense<0.000000e+00> : vector<128x512xf32>
    %2 = tpu.matmul %0, %1, %cst {dimension_numbers = #tpu.dot_dimension_numbers<[1], [0], [0], [1], [0, 0, 1, 1], [], []>} : vector<128x784xbf16>, vector<784x512xbf16>, vector<128x512xf32> -> vector<128x512xf32>
    %c0_3 = arith.constant 0 : index
    %c0_4 = arith.constant 0 : index
    %3 = vector.load %arg4[%c0_3, %c0_4] : memref<1x512xf32, #tpu.memory_space<vmem>>, vector<1x512xf32>
    %4 = vector.broadcast %3 : vector<1x512xf32> to vector<128x512xf32>
    %5 = arith.addf %2, %4 : vector<128x512xf32>
    %cst_5 = arith.constant 0.000000e+00 : f32
    %6 = vector.broadcast %cst_5 : f32 to vector<128x512xf32>
    %7 = arith.maximumf %5, %6 : vector<128x512xf32>
    %8 = arith.truncf %7 : vector<128x512xf32> to vector<128x512xbf16>
    %c0_6 = arith.constant 0 : index
    %c0_7 = arith.constant 0 : index
    %9 = vector.load %arg5[%c0_6, %c0_7] : memref<512x256xbf16, #tpu.memory_space<vmem>>, vector<512x256xbf16>
    %cst_8 = arith.constant dense<0.000000e+00> : vector<128x256xf32>
    %10 = tpu.matmul %8, %9, %cst_8 {dimension_numbers = #tpu.dot_dimension_numbers<[1], [0], [0], [1], [0, 0, 1, 1], [], []>} : vector<128x512xbf16>, vector<512x256xbf16>, vector<128x256xf32> -> vector<128x256xf32>
    %c0_9 = arith.constant 0 : index
    %c0_10 = arith.constant 0 : index
    %11 = vector.load %arg6[%c0_9, %c0_10] : memref<1x256xf32, #tpu.memory_space<vmem>>, vector<1x256xf32>
    %12 = vector.broadcast %11 : vector<1x256xf32> to vector<128x256xf32>
    %13 = arith.addf %10, %12 : vector<128x256xf32>
    %14 = vector.extract_strided_slice %13 {offsets = [0, 0], sizes = [128, 128], strides = [1, 1]} : vector<128x256xf32> to vector<128x128xf32>
    %15 = vector.extract_strided_slice %13 {offsets = [0, 128], sizes = [128, 128], strides = [1, 1]} : vector<128x256xf32> to vector<128x128xf32>
    %cst_11 = arith.constant 5.000000e-01 : f32
    %16 = vector.broadcast %cst_11 : f32 to vector<128x128xf32>
    %17 = arith.mulf %15, %16 : vector<128x128xf32>
    %18 = math.exp %17 : vector<128x128xf32>
    %c0_12 = arith.constant 0 : index
    %c0_13 = arith.constant 0 : index
    %19 = vector.load %arg2[%c0_12, %c0_13] : memref<128x128xbf16, #tpu.memory_space<vmem>>, vector<128x128xbf16>
    %20 = arith.extf %19 : vector<128x128xbf16> to vector<128x128xf32>
    %21 = arith.mulf %20, %18 : vector<128x128xf32>
    %22 = arith.addf %14, %21 : vector<128x128xf32>
    %23 = arith.truncf %22 : vector<128x128xf32> to vector<128x128xbf16>
    %c0_14 = arith.constant 0 : index
    %c0_15 = arith.constant 0 : index
    %24 = vector.load %arg7[%c0_14, %c0_15] : memref<128x512xbf16, #tpu.memory_space<vmem>>, vector<128x512xbf16>
    %cst_16 = arith.constant dense<0.000000e+00> : vector<128x512xf32>
    %25 = tpu.matmul %23, %24, %cst_16 {dimension_numbers = #tpu.dot_dimension_numbers<[1], [0], [0], [1], [0, 0, 1, 1], [], []>} : vector<128x128xbf16>, vector<128x512xbf16>, vector<128x512xf32> -> vector<128x512xf32>
    %c0_17 = arith.constant 0 : index
    %c0_18 = arith.constant 0 : index
    %26 = vector.load %arg8[%c0_17, %c0_18] : memref<1x512xf32, #tpu.memory_space<vmem>>, vector<1x512xf32>
    %27 = vector.broadcast %26 : vector<1x512xf32> to vector<128x512xf32>
    %28 = arith.addf %25, %27 : vector<128x512xf32>
    %cst_19 = arith.constant 0.000000e+00 : f32
    %29 = vector.broadcast %cst_19 : f32 to vector<128x512xf32>
    %30 = arith.maximumf %28, %29 : vector<128x512xf32>
    %31 = arith.truncf %30 : vector<128x512xf32> to vector<128x512xbf16>
    %c0_20 = arith.constant 0 : index
    %c0_21 = arith.constant 0 : index
    %32 = vector.load %arg9[%c0_20, %c0_21] : memref<512x784xbf16, #tpu.memory_space<vmem>>, vector<512x784xbf16>
    %cst_22 = arith.constant dense<0.000000e+00> : vector<128x784xf32>
    %33 = tpu.matmul %31, %32, %cst_22 {dimension_numbers = #tpu.dot_dimension_numbers<[1], [0], [0], [1], [0, 0, 1, 1], [], []>} : vector<128x512xbf16>, vector<512x784xbf16>, vector<128x784xf32> -> vector<128x784xf32>
    %c0_23 = arith.constant 0 : index
    %c0_24 = arith.constant 0 : index
    %34 = vector.load %arg10[%c0_23, %c0_24] : memref<1x784xf32, #tpu.memory_space<vmem>>, vector<1x784xf32>
    %35 = vector.broadcast %34 : vector<1x784xf32> to vector<128x784xf32>
    %36 = arith.addf %33, %35 : vector<128x784xf32>
    %cst_25 = arith.constant 5.000000e-01 : f32
    %37 = vector.broadcast %cst_25 : f32 to vector<128x784xf32>
    %38 = arith.mulf %36, %37 : vector<128x784xf32>
    %39 = math.tanh %38 : vector<128x784xf32>
    %cst_26 = arith.constant 1.000000e+00 : f32
    %40 = vector.broadcast %cst_26 : f32 to vector<128x784xf32>
    %41 = arith.addf %39, %40 : vector<128x784xf32>
    %cst_27 = arith.constant 5.000000e-01 : f32
    %42 = vector.broadcast %cst_27 : f32 to vector<128x784xf32>
    %43 = arith.mulf %42, %41 : vector<128x784xf32>
    %44 = arith.truncf %43 : vector<128x784xf32> to vector<128x784xbf16>
    %c0_28 = arith.constant 0 : index
    %c0_29 = arith.constant 0 : index
    %45 = vector.load %arg11[%c0_28, %c0_29] : memref<128x784xbf16, #tpu.memory_space<vmem>>, vector<128x784xbf16>
    tpu.vector_store %arg11[%c0_28, %c0_29], %44 {strides = array<i32>} : memref<128x784xbf16, #tpu.memory_space<vmem>>, vector<128x784xbf16>,
    %c0_30 = arith.constant 0 : index
    %c0_31 = arith.constant 0 : index
    %46 = vector.load %arg12[%c0_30, %c0_31] : memref<128x128xf32, #tpu.memory_space<vmem>>, vector<128x128xf32>
    tpu.vector_store %arg12[%c0_30, %c0_31], %14 {strides = array<i32>} : memref<128x128xf32, #tpu.memory_space<vmem>>, vector<128x128xf32>,
    %c0_32 = arith.constant 0 : index
    %c0_33 = arith.constant 0 : index
    %47 = vector.load %arg13[%c0_32, %c0_33] : memref<128x128xf32, #tpu.memory_space<vmem>>, vector<128x128xf32>
    tpu.vector_store %arg13[%c0_32, %c0_33], %15 {strides = array<i32>} : memref<128x128xf32, #tpu.memory_space<vmem>>, vector<128x128xf32>,
    return
  }
  func.func @transform_0(%arg0: i32) -> (i32, i32) {
    %c0_i32 = arith.constant 0 : i32
    %c0_i32_0 = arith.constant 0 : i32
    return %arg0, %c0_i32 : i32, i32
  }
  func.func @transform_1(%arg0: i32) -> (i32, i32) {
    %c0_i32 = arith.constant 0 : i32
    %c0_i32_0 = arith.constant 0 : i32
    return %arg0, %c0_i32 : i32, i32
  }
  func.func @transform_2(%arg0: i32) -> (i32, i32) {
    %c0_i32 = arith.constant 0 : i32
    %c0_i32_0 = arith.constant 0 : i32
    %c0_i32_1 = arith.constant 0 : i32
    return %c0_i32, %c0_i32_0 : i32, i32
  }
  func.func @transform_3(%arg0: i32) -> (i32, i32) {
    %c0_i32 = arith.constant 0 : i32
    %c0_i32_0 = arith.constant 0 : i32
    %c0_i32_1 = arith.constant 0 : i32
    return %c0_i32, %c0_i32_0 : i32, i32
  }
  func.func @transform_4(%arg0: i32) -> (i32, i32) {
    %c0_i32 = arith.constant 0 : i32
    %c0_i32_0 = arith.constant 0 : i32
    %c0_i32_1 = arith.constant 0 : i32
    return %c0_i32, %c0_i32_0 : i32, i32
  }
  func.func @transform_5(%arg0: i32) -> (i32, i32) {
    %c0_i32 = arith.constant 0 : i32
    %c0_i32_0 = arith.constant 0 : i32
    %c0_i32_1 = arith.constant 0 : i32
    return %c0_i32, %c0_i32_0 : i32, i32
  }
  func.func @transform_6(%arg0: i32) -> (i32, i32) {
    %c0_i32 = arith.constant 0 : i32
    %c0_i32_0 = arith.constant 0 : i32
    %c0_i32_1 = arith.constant 0 : i32
    return %c0_i32, %c0_i32_0 : i32, i32
  }
  func.func @transform_7(%arg0: i32) -> (i32, i32) {
    %c0_i32 = arith.constant 0 : i32
    %c0_i32_0 = arith.constant 0 : i32
    %c0_i32_1 = arith.constant 0 : i32
    return %c0_i32, %c0_i32_0 : i32, i32
  }
  func.func @transform_8(%arg0: i32) -> (i32, i32) {
    %c0_i32 = arith.constant 0 : i32
    %c0_i32_0 = arith.constant 0 : i32
    %c0_i32_1 = arith.constant 0 : i32
    return %c0_i32, %c0_i32_0 : i32, i32
  }
  func.func @transform_9(%arg0: i32) -> (i32, i32) {
    %c0_i32 = arith.constant 0 : i32
    %c0_i32_0 = arith.constant 0 : i32
    %c0_i32_1 = arith.constant 0 : i32
    return %c0_i32, %c0_i32_0 : i32, i32
  }
  func.func @transform_10(%arg0: i32) -> (i32, i32) {
    %c0_i32 = arith.constant 0 : i32
    %c0_i32_0 = arith.constant 0 : i32
    return %arg0, %c0_i32 : i32, i32
  }
  func.func @transform_11(%arg0: i32) -> (i32, i32) {
    %c0_i32 = arith.constant 0 : i32
    %c0_i32_0 = arith.constant 0 : i32
    return %arg0, %c0_i32 : i32, i32
  }
  func.func @transform_12(%arg0: i32) -> (i32, i32) {
    %c0_i32 = arith.constant 0 : i32
    %c0_i32_0 = arith.constant 0 : i32
    return %arg0, %c0_i32 : i32, i32
  }
}

</mosaic_0001>

<bundles_post_ra>
// kernel: tpu_custom_call.1
= control target key start
LH: loop header
LB: loop body
LE: loop exit
PB: predicated region body
PF: predicated region fallthrough
CT: control target
= control target key end

     0   :  { %s13255_s0 = inlined_call_operand.vmem [shape: bf16[384,784], index: 0, kind: input, shape index: {}]   ;;  %s13256_s1 = inlined_call_operand.vmem [shape: bf16[384,128], index: 1, kind: input, shape index: {}]   ;;  %s13257_s2 = inlined_call_operand.vmem [shape: bf16[784,512], index: 2, kind: input, shape index: {}]   ;;  %s13258_s3 = inlined_call_operand.vmem [shape: f32[1,512], index: 3, kind: input, shape index: {}]   ;;  %s13259_s4 = inlined_call_operand.vmem [shape: bf16[512,256], index: 4, kind: input, shape index: {}]   ;;  %s13260_s5 = inlined_call_operand.vmem [shape: f32[1,256], index: 5, kind: input, shape index: {}]   ;;  %s13261_s6 = inlined_call_operand.vmem [shape: bf16[128,512], index: 6, kind: input, shape index: {}]   ;;  %s13262_s7 = inlined_call_operand.vmem [shape: f32[1,512], index: 7, kind: input, shape index: {}]   ;;  %s13263_s8 = inlined_call_operand.vmem [shape: bf16[512,784], index: 8, kind: input, shape index: {}]   ;;  %s13264_s9 = inlined_call_operand.vmem [shape: f32[1,784], index: 9, kind: input, shape index: {}]   ;;  %s13265_s10 = inlined_call_operand.vmem [shape: bf16[384,784], index: 10, kind: output, shape index: {0}]   ;;  %s13266_s11 = inlined_call_operand.hbm [shape: f32[384,128], index: 11, kind: output, shape index: {1}]   ;;  %s13267_s12 = inlined_call_operand.hbm [shape: f32[384,128], index: 12, kind: output, shape index: {2}]  }
   0x1   :  { %13273 = sst [smem:[#allocation11_spill]] %s13255_s0 }
   0x2   :  { %13274 = sst [smem:[#allocation12_spill]] %s13256_s1 }
   0x3   :  { %18 = vsyncpa [#allocation3], 0 }
   0x4   :  { %20 = vsyncpa [#allocation3 + $0x1], 0 }
   0x5   :  { %21 = vsyncpa [#allocation5], 0 }
   0x6   :  { %23 = vsyncpa [#allocation5 + $0x1], 0  ;;  %s10430_s21 = smov 0   ;;  %s10432_s22 = smov 0  }
   0x7   :  { %s10434_s23 = smov 0   ;;  %s10436_s24 = smov 0  }
   0x8 LB: > { %13275 = sst [smem:[#allocation8_spill]] %s10354_s23  ;;  %s10451_s25 = sadd.s32 4294967295, %s10358_s24   ;;  %s10358_s24 = sphi %s10436_s24, %s13284_s24   ;;  %s10354_s23 = sphi %s10434_s23, %s13286_s23   ;;  %s10350_s22 = sphi %s10432_s22, %s13288_s22   ;;  %s10346_s21 = sphi %s10430_s21, %s13287_s21  }
   0x9   : > { %s7704_s26 = sadd.s32 4294967294, %s10358_s24   ;;  %s10455_s27 = sadd.s32 1, %s10358_s24  }
   0xa   : > { %13276 = sst [smem:[#allocation9_spill]] %s10455_s27  ;;  %s282_s28 = sadd.s32 1, %s10354_s23 }
   0xb   : > { %s279_s29 = ssub.s32 %s10358_s24, %s10455_s27  ;;  %p292_p0 = scmp.ne.s32.totalorder %s10354_s23, %s10350_s22 }
   0xc   : > { %p280_p1 = scmp.eq.s32.totalorder %s279_s29, 0  ;;  %p293_p2 = scmp.eq.s32.totalorder %s10451_s25, 2 }
   0xd   : > { %p298_p3 = scmp.ne.s32.totalorder %s10350_s22, %s10346_s21  ;;  %p299_p4 = scmp.eq.s32.totalorder %s7704_s26, 2 }
   0xe   : > { %s10466_s30 = scalar_select %p280_p1, %s10354_s23, %s282_s28  }
   0xf   : > { %p10468_p5 = por %p293_p2, %p292_p0  ;;  %p10472_p6 = por %p299_p4, %p298_p3 }
  0x10   : > { %13277 = sst [smem:[#allocation10_spill]] %s10466_s30  ;;  %p7707_p7 = scmp.ge.s32.totalorder %s10358_s24, 1 }
  0x11   : > { %p386_p8 = scmp.lt.s32.totalorder %s10358_s24, 4 }
  0x13   : > { %p387_p9 = pnand %p7707_p7, %p386_p8 }
  0x14   : > { %v9169_v0 = vld [vmem:[%s13257_s2 + $0x4] ss:$16 sps:$4 sm:$0xff] (!%p387_p9)   ;;  %v9171_v1 = vld [vmem:[%s13257_s2 + $0xc] ss:$16 sps:$4 sm:$0xff] (!%p387_p9)   ;;  %v9173_v2 = vld [vmem:[%s13257_s2] ss:$16 sps:$4 sm:$0xff] (!%p387_p9)  }
  0x15   : > { %390 = sbr.rel (%p387_p9) target bundleno = 1533 (0x5fd), region = 60  ;;  %2035 = vmatprep.subr.bf16.mxu0 (!%p387_p9), %v9169_v0  ;;  %v9174_v3 = vld [vmem:[%s13257_s2 + $0x8] ss:$16 sps:$4 sm:$0xff] (!%p387_p9)   ;;  %2487 = vmatprep.subr.bf16.mxu1 (!%p387_p9), %v9171_v1  ;;  %v9175_v4 = vld [vmem:[%s13257_s2 + $0x24] ss:$16 sps:$4 sm:$0xff] (!%p387_p9)   ;;  %s7710_s15 = sshll.u32 (!%p387_p9), %s10451_s25, 4 }
  0x16   : > { %2036 = vmatpush1.bf16.msra.mxu0 (!%p387_p9), %v9173_v2  ;;  %2488 = vmatpush1.bf16.msra.mxu1 (!%p387_p9), %v9174_v3  ;;  %v9177_v5 = vld [vmem:[%s13257_s2 + $0x2c] ss:$16 sps:$4 sm:$0xff] (!%p387_p9)   ;;  %v9179_v6 = vld [vmem:[%s13257_s2 + $0x20] ss:$16 sps:$4 sm:$0xff] (!%p387_p9)   ;;  %v9180_v7 = vld [vmem:[%s13257_s2 + $0x28] ss:$16 sps:$4 sm:$0xff] (!%p387_p9)  }
  0x17   : > { %2037 = vmatprep.subr.bf16.mxu0 (!%p387_p9), %v9175_v4  ;;  %2489 = vmatprep.subr.bf16.mxu1 (!%p387_p9), %v9177_v5  ;;  %v9181_v8 = vld [vmem:[%s13257_s2 + $0x44] ss:$16 sps:$4 sm:$0xff] (!%p387_p9)   ;;  %v9183_v9 = vld [vmem:[%s13257_s2 + $0x4c] ss:$16 sps:$4 sm:$0xff] (!%p387_p9)   ;;  %v9185_v10 = vld [vmem:[%s13257_s2 + $0x40] ss:$16 sps:$4 sm:$0xff] (!%p387_p9)  }
  0x18   : > { %v9186_v11 = vld [vmem:[%s13257_s2 + $0x48] ss:$16 sps:$4 sm:$0xff] (!%p387_p9)   ;;  %v9187_v12 = vld [vmem:[%s13257_s2 + $0x64] ss:$16 sps:$4 sm:$0xff] (!%p387_p9)   ;;  %v9189_v13 = vld [vmem:[%s13257_s2 + $0x6c] ss:$16 sps:$4 sm:$0xff] (!%p387_p9)  }
  0x19   : > { %v9191_v14 = vld [vmem:[%s13257_s2 + $0x60] ss:$16 sps:$4 sm:$0xff] (!%p387_p9)   ;;  %v9192_v15 = vld [vmem:[%s13257_s2 + $0x68] ss:$16 sps:$4 sm:$0xff] (!%p387_p9)   ;;  %v9193_v16 = vld [vmem:[%s13257_s2 + $0x84] ss:$16 sps:$4 sm:$0xff] (!%p387_p9)  }
  0x1a   : > { %2038 = vmatpush1.bf16.msra.mxu0 (!%p387_p9), %v9179_v6  ;;  %2490 = vmatpush1.bf16.msra.mxu1 (!%p387_p9), %v9180_v7  ;;  %v9195_v17 = vld [vmem:[%s13257_s2 + $0x8c] ss:$16 sps:$4 sm:$0xff] (!%p387_p9)   ;;  %v9197_v18 = vld [vmem:[%s13257_s2 + $0x80] ss:$16 sps:$4 sm:$0xff] (!%p387_p9)   ;;  %v9198_v19 = vld [vmem:[%s13257_s2 + $0x88] ss:$16 sps:$4 sm:$0xff] (!%p387_p9)  }
  0x1b   : > { %2039 = vmatprep.subr.bf16.mxu0 (!%p387_p9), %v9181_v8  ;;  %2491 = vmatprep.subr.bf16.mxu1 (!%p387_p9), %v9183_v9  ;;  %v9199_v20 = vld [vmem:[%s13257_s2 + $0xa4] ss:$16 sps:$4 sm:$0xff] (!%p387_p9)   ;;  %v9201_v21 = vld [vmem:[%s13257_s2 + $0xac] ss:$16 sps:$4 sm:$0xff] (!%p387_p9)   ;;  %v9203_v22 = vld [vmem:[%s13257_s2 + $0xa0] ss:$16 sps:$4 sm:$0xff] (!%p387_p9)  }
  0x1c   : > { %v9204_v23 = vld [vmem:[%s13257_s2 + $0xa8] ss:$16 sps:$4 sm:$0xff]   ;;  %v9205_v24 = vld [vmem:[%s13257_s2 + $0xc4] ss:$16 sps:$4 sm:$0xff]   ;;  %v9207_v25 = vld [vmem:[%s13257_s2 + $0xcc] ss:$16 sps:$4 sm:$0xff]  }
  0x1d   : > { %v9209_v26 = vld [vmem:[%s13257_s2 + $0xc0] ss:$16 sps:$4 sm:$0xff]   ;;  %v9210_v27 = vld [vmem:[%s13257_s2 + $0xc8] ss:$16 sps:$4 sm:$0xff]   ;;  %v9211_v28 = vld [vmem:[%s13257_s2 + $0xe4] ss:$16 sps:$4 sm:$0xff]  }
  0x1e   : > { %2040 = vmatpush1.bf16.msra.mxu0 %v9185_v10  ;;  %2492 = vmatpush1.bf16.msra.mxu1 %v9186_v11  ;;  %v9213_v29 = vld [vmem:[%s13257_s2 + $0xec] ss:$16 sps:$4 sm:$0xff]   ;;  %v9215_v30 = vld [vmem:[%s13257_s2 + $0xe0] ss:$16 sps:$4 sm:$0xff]   ;;  %v9216_v31 = vld [vmem:[%s13257_s2 + $0xe8] ss:$16 sps:$4 sm:$0xff]  }
  0x1f   : > { %2041 = vmatprep.subr.bf16.mxu0 %v9187_v12  ;;  %2493 = vmatprep.subr.bf16.mxu1 %v9189_v13  ;;  %v9217_v32 = vld [vmem:[%s13257_s2 + $0x104] ss:$16 sps:$4 sm:$0xff]   ;;  %p446_p10 = scmp.lt.s32.totalorder %s7710_s15, 47  ;;  %v9219_v33 = vld [vmem:[%s13257_s2 + $0x10c] ss:$16 sps:$4 sm:$0xff]   ;;  %s13280_s0 = sld [smem:[#allocation11_spill]] }
  0x20   : > { %v9221_v34 = vld [vmem:[%s13257_s2 + $0x100] ss:$16 sps:$4 sm:$0xff]   ;;  %v9222_v35 = vld [vmem:[%s13257_s2 + $0x108] ss:$16 sps:$4 sm:$0xff]   ;;  %v9223_v36 = vld [vmem:[%s13257_s2 + $0x124] ss:$16 sps:$4 sm:$0xff]  }
  0x21   : > { %s13290_s15 = smov (!%p446_p10, %s7710_s15), 47  ;;  %v9225_v37 = vld [vmem:[%s13257_s2 + $0x12c] ss:$16 sps:$4 sm:$0xff]   ;;  %v9227_v38 = vld [vmem:[%s13257_s2 + $0x120] ss:$16 sps:$4 sm:$0xff]   ;;  %vm2010_vm0 = vcmask 130048  }
  0x22   : > { %2042 = vmatpush1.bf16.msra.mxu0 %v9191_v14  ;;  %2494 = vmatpush1.bf16.msra.mxu1 %v9192_v15  ;;  %v9228_v39 = vld [vmem:[%s13257_s2 + $0x128] ss:$16 sps:$4 sm:$0xff]   ;;  %v9229_v40 = vld [vmem:[%s13257_s2 + $0x144] ss:$16 sps:$4 sm:$0xff]   ;;  %s13271_s18 = smul.u32 28, %s13290_s15  ;;  %s11542_s16 = sand.u32 1, %s10350_s22  }
  0x23   : > { %2043 = vmatprep.subr.bf16.mxu0 %v9193_v16  ;;  %2495 = vmatprep.subr.bf16.mxu1 %v9195_v17  ;;  %v9231_v41 = vld [vmem:[%s13257_s2 + $0x14c] ss:$16 sps:$4 sm:$0xff]   ;;  %v9233_v42 = vld [vmem:[%s13257_s2 + $0x140] ss:$16 sps:$4 sm:$0xff]   ;;  %v9234_v43 = vld [vmem:[%s13257_s2 + $0x148] ss:$16 sps:$4 sm:$0xff]  }
  0x24   : > { %v9235_v44 = vld [vmem:[%s13257_s2 + $0x164] ss:$16 sps:$4 sm:$0xff]   ;;  %v9237_v45 = vld [vmem:[%s13257_s2 + $0x16c] ss:$16 sps:$4 sm:$0xff]   ;;  %v9239_v46 = vld [vmem:[%s13257_s2 + $0x160] ss:$16 sps:$4 sm:$0xff]  }
  0x25   : > { %s10622_s19 = scalar_lea.vmem %s13280_s0, %s13271_s18  ;;  %v9240_v47 = vld [vmem:[%s13257_s2 + $0x168] ss:$16 sps:$4 sm:$0xff]   ;;  %v9241_v49 = vld [vmem:[%s13257_s2 + $0x184] ss:$16 sps:$4 sm:$0xff]   ;;  %v9243_v50 = vld [vmem:[%s13257_s2 + $0x18c] ss:$16 sps:$4 sm:$0xff]  }
  0x26   : > { %2044 = vmatpush1.bf16.msra.mxu0 %v9197_v18  ;;  %2496 = vmatpush1.bf16.msra.mxu1 %v9198_v19  ;;  %v9267_v48 = vld [vmem:[%s10622_s19 + $0x4] ss:$28 sps:$4 sm:$0xff]   ;;  %v9246_v52 = vld [vmem:[%s13257_s2 + $0x188] ss:$16 sps:$4 sm:$0xff]   ;;  %v9249_v54 = vld [vmem:[%s13257_s2 + $0x1ac] ss:$16 sps:$4 sm:$0xff]  }
  0x27   : > { %2045 = vmatprep.subr.bf16.mxu0 %v9199_v20  ;;  %2497 = vmatprep.subr.bf16.mxu1 %v9201_v21  ;;  %v9245_v51 = vld [vmem:[%s13257_s2 + $0x180] ss:$16 sps:$4 sm:$0xff]   ;;  %v9247_v53 = vld [vmem:[%s13257_s2 + $0x1a4] ss:$16 sps:$4 sm:$0xff]   ;;  %v9252_v56 = vld [vmem:[%s13257_s2 + $0x1a8] ss:$16 sps:$4 sm:$0xff]  }
  0x28   : > { %2067 = vmatprep.mubr.bf16.mxu0 %v9267_v48  ;;  %2519 = vmatprep.mubr.bf16.mxu1 %v9267_v48  ;;  %v9251_v55 = vld [vmem:[%s13257_s2 + $0x1a0] ss:$16 sps:$4 sm:$0xff]   ;;  %v9253_v57 = vld [vmem:[%s13257_s2 + $0x1c4] ss:$16 sps:$4 sm:$0xff]   ;;  %v9255_v58 = vld [vmem:[%s13257_s2 + $0x1cc] ss:$16 sps:$4 sm:$0xff]  }
  0x29   : > { %v9257_v59 = vld [vmem:[%s13257_s2 + $0x1c0] ss:$16 sps:$4 sm:$0xff]   ;;  %v9258_v60 = vld [vmem:[%s13257_s2 + $0x1c8] ss:$16 sps:$4 sm:$0xff]   ;;  %v9259_v61 = vld [vmem:[%s13257_s2 + $0x1e4] ss:$16 sps:$4 sm:$0xff]  }
  0x2a   : > { %2046 = vmatpush1.bf16.msra.mxu0 %v9203_v22  ;;  %2498 = vmatpush1.bf16.msra.mxu1 %v9204_v23  ;;  %v9261_v62 = vld [vmem:[%s13257_s2 + $0x1ec] ss:$16 sps:$4 sm:$0xff]   ;;  %v9263_v63 = vld [vmem:[%s13257_s2 + $0x1e0] ss:$16 sps:$4 sm:$0xff]   ;;  %v9264_v0 = vld [vmem:[%s13257_s2 + $0x1e8] ss:$16 sps:$4 sm:$0xff]  }
  0x2b   : > { %2047 = vmatprep.subr.bf16.mxu0 %v9205_v24  ;;  %2499 = vmatprep.subr.bf16.mxu1 %v9207_v25  ;;  %v9270_v1 = vld [vmem:[%s13257_s2 + $0x204] ss:$16 sps:$4 sm:$0xff]   ;;  %v9273_v2 = vld [vmem:[%s13257_s2 + $0x20c] ss:$16 sps:$4 sm:$0xff]   ;;  %v9268_v4 = vld [vmem:[%s13257_s2 + $0x200] ss:$16 sps:$4 sm:$0xff]  }
  0x2c   : > { %v9265_v3 = vld [vmem:[%s10622_s19] ss:$28 sps:$4 sm:$0xff]   ;;  %v9271_v5 = vld [vmem:[%s13257_s2 + $0x208] ss:$16 sps:$4 sm:$0xff]   ;;  %v9276_v6 = vld [vmem:[%s13257_s2 + $0x224] ss:$16 sps:$4 sm:$0xff]  }
  0x2d   : > { %v9279_v7 = vld [vmem:[%s13257_s2 + $0x22c] ss:$16 sps:$4 sm:$0xff]   ;;  %v9274_v9 = vld [vmem:[%s13257_s2 + $0x220] ss:$16 sps:$4 sm:$0xff]   ;;  %v9277_v10 = vld [vmem:[%s13257_s2 + $0x228] ss:$16 sps:$4 sm:$0xff]  }
  0x2e   : > { %2048 = vmatpush1.bf16.msra.mxu0 %v9209_v26  ;;  %2500 = vmatpush1.bf16.msra.mxu1 %v9210_v27  ;;  %v9280_v8 = vld [vmem:[%s10622_s19 + $0x3c] ss:$28 sps:$4 sm:$0xff]   ;;  %v9285_v11 = vld [vmem:[%s13257_s2 + $0x244] ss:$16 sps:$4 sm:$0xff]   ;;  %v9283_v14 = vld [vmem:[%s13257_s2 + $0x240] ss:$16 sps:$4 sm:$0xff]  }
  0x2f   : > { %2049 = vmatprep.subr.bf16.mxu0 %v9211_v28  ;;  %2501 = vmatprep.subr.bf16.mxu1 %v9213_v29  ;;  %v9288_v12 = vld [vmem:[%s13257_s2 + $0x24c] ss:$16 sps:$4 sm:$0xff]   ;;  %v9282_v13 = vld [vmem:[%s10622_s19 + $0x38] ss:$28 sps:$4 sm:$0xff]   ;;  %v9289_v19 = vld [vmem:[%s13257_s2 + $0x260] ss:$16 sps:$4 sm:$0xff]  }
  0x30   : > { %v9286_v15 = vld [vmem:[%s13257_s2 + $0x248] ss:$16 sps:$4 sm:$0xff]   ;;  %v9291_v16 = vld [vmem:[%s13257_s2 + $0x264] ss:$16 sps:$4 sm:$0xff]   ;;  %v9294_v17 = vld [vmem:[%s13257_s2 + $0x26c] ss:$16 sps:$4 sm:$0xff]  }
  0x31   : > { %v9295_v18 = vld [vmem:[%s10622_s19 + $0x74] ss:$28 sps:$4 sm:$0xff]   ;;  %v9292_v20 = vld [vmem:[%s13257_s2 + $0x268] ss:$16 sps:$4 sm:$0xff]   ;;  %v9303_v22 = vld [vmem:[%s13257_s2 + $0x28c] ss:$16 sps:$4 sm:$0xff]  }
  0x32   : > { %2050 = vmatpush1.bf16.msra.mxu0 %v9215_v30  ;;  %2502 = vmatpush1.bf16.msra.mxu1 %v9216_v31  ;;  %v9300_v21 = vld [vmem:[%s13257_s2 + $0x284] ss:$16 sps:$4 sm:$0xff]   ;;  %v9297_v23 = vld [vmem:[%s10622_s19 + $0x70] ss:$28 sps:$4 sm:$0xff]   ;;  %v9301_v25 = vld [vmem:[%s13257_s2 + $0x288] ss:$16 sps:$4 sm:$0xff]  }
  0x33   : > { %2051 = vmatprep.subr.bf16.mxu0 %v9217_v32  ;;  %2503 = vmatprep.subr.bf16.mxu1 %v9219_v33  ;;  %v9298_v24 = vld [vmem:[%s13257_s2 + $0x280] ss:$16 sps:$4 sm:$0xff]   ;;  %v9306_v26 = vld [vmem:[%s13257_s2 + $0x2a4] ss:$16 sps:$4 sm:$0xff]   ;;  %v9309_v27 = vld [vmem:[%s13257_s2 + $0x2ac] ss:$16 sps:$4 sm:$0xff]  }
  0x34   : > { %v9310_v28 = vld [vmem:[%s10622_s19 + $0xac] ss:$28 sps:$4 sm:$0xff]   ;;  %v9304_v29 = vld [vmem:[%s13257_s2 + $0x2a0] ss:$16 sps:$4 sm:$0xff]   ;;  %v9315_v31 = vld [vmem:[%s13257_s2 + $0x2c4] ss:$16 sps:$4 sm:$0xff]  }
  0x35   : > { %v9307_v30 = vld [vmem:[%s13257_s2 + $0x2a8] ss:$16 sps:$4 sm:$0xff]   ;;  %v9318_v32 = vld [vmem:[%s13257_s2 + $0x2cc] ss:$16 sps:$4 sm:$0xff]   ;;  %s7708_s20 = sshll.u32 %s11542_s16, 7  ;;  %s7713_s28 = sshll.u32 %s13290_s15, 2 }
  0x36   : > { %2052 = vmatpush1.bf16.msra.mxu0 %v9221_v34  ;;  %2504 = vmatpush1.bf16.msra.mxu1 %v9222_v35  ;;  %v9312_v33 = vld [vmem:[%s10622_s19 + $0xa8] ss:$28 sps:$4 sm:$0xff]   ;;  %v9313_v34 = vld [vmem:[%s13257_s2 + $0x2c0] ss:$16 sps:$4 sm:$0xff]   ;;  %v9340_v48 = vld [vmem:[%s10622_s19 + $0x11c] ss:$28 sps:$4 sm:$0xff]  }
  0x37   : > { %2053 = vmatprep.subr.bf16.mxu0 %v9223_v36  ;;  %2505 = vmatprep.subr.bf16.mxu1 %v9225_v37  ;;  %v9316_v35 = vld [vmem:[%s13257_s2 + $0x2c8] ss:$16 sps:$4 sm:$0xff]   ;;  %v9321_v36 = vld [vmem:[%s13257_s2 + $0x2e4] ss:$16 sps:$4 sm:$0xff]   ;;  %v9324_v37 = vld [vmem:[%s13257_s2 + $0x2ec] ss:$16 sps:$4 sm:$0xff]  }
  0x38   : > { %s11556_s26 = scalar_lea.vmem [#allocation2], %s7708_s20  ;;  %s11562_s27 = scalar_lea.vmem [#allocation4], %s7708_s20 }
  0x39   : > { %s13281_s1 = sld [smem:[#allocation12_spill]]  ;;  %s7556_s30 = sshll.u32 %s11556_s26, 4  ;;  %s12989_s30 = int_to_ptr.vmem [resolvable:$true] %s7556_s30 }
  0x3a   : > { %2054 = vmatpush1.bf16.msra.mxu0 %v9227_v38  ;;  %2506 = vmatpush1.bf16.msra.mxu1 %v9228_v39  ;;  %v9325_v38 = vld [vmem:[%s10622_s19 + $0xe4] ss:$28 sps:$4 sm:$0xff]   ;;  %s10264_s18 = scalar_lea.vmem %s12989_s30, 2048  ;;  %s10361_s20 = smov [#allocation2]  }
  0x3b   : > { %2055 = vmatprep.subr.bf16.mxu0 %v9229_v40  ;;  %2507 = vmatprep.subr.bf16.mxu1 %v9231_v41  ;;  %v9319_v39 = vld [vmem:[%s13257_s2 + $0x2e0] ss:$16 sps:$4 sm:$0xff]   ;;  %v9322_v40 = vld [vmem:[%s13257_s2 + $0x2e8] ss:$16 sps:$4 sm:$0xff]   ;;  %v9330_v41 = vld [vmem:[%s13257_s2 + $0x304] ss:$16 sps:$4 sm:$0xff]   ;;  %p10265_p11 = scmp.ne.s32.totalorder %s12989_s30, %s10264_s18 }
  0x3d   : > { %p10266_p12 = pnand %p10265_p11, %p10468_p5 }
  0x3e   : > { %2056 = vmatpush1.bf16.msra.mxu0 %v9233_v42  ;;  %2508 = vmatpush1.bf16.msra.mxu1 %v9234_v43  ;;  %v9333_v42 = vld [vmem:[%s13257_s2 + $0x30c] ss:$16 sps:$4 sm:$0xff]  }
  0x3f   : > { %2057 = vmatprep.subr.bf16.mxu0 %v9235_v44  ;;  %2509 = vmatprep.subr.bf16.mxu1 %v9237_v45  ;;  %v9327_v43 = vld [vmem:[%s10622_s19 + $0xe0] ss:$28 sps:$4 sm:$0xff]   ;;  %v9331_v45 = vld [vmem:[%s13257_s2 + $0x308] ss:$16 sps:$4 sm:$0xff]   ;;  %s11573_s23 = scalar_lea.vmem %s13281_s1, %s7713_s28  ;;  %p10267_p13 = pneg %p10266_p12 }
  0x40   : > { %v9328_v44 = vld [vmem:[%s13257_s2 + $0x300] ss:$16 sps:$4 sm:$0xff]  }
  0x42   : > { %2058 = vmatpush1.bf16.msra.mxu0 %v9239_v46  ;;  %2510 = vmatpush1.bf16.msra.mxu1 %v9240_v47  ;;  %v9336_v46 = vld [vmem:[%s13257_s2 + $0x324] ss:$16 sps:$4 sm:$0xff]   ;;  %v9339_v47 = vld [vmem:[%s13257_s2 + $0x32c] ss:$16 sps:$4 sm:$0xff]  }
  0x43   : > { %2059 = vmatprep.subr.bf16.mxu0 %v9241_v49  ;;  %2511 = vmatprep.subr.bf16.mxu1 %v9243_v50  ;;  %v9334_v49 = vld [vmem:[%s13257_s2 + $0x320] ss:$16 sps:$4 sm:$0xff]   ;;  %v9337_v50 = vld [vmem:[%s13257_s2 + $0x328] ss:$16 sps:$4 sm:$0xff]  }
  0x46   : > { %2060 = vmatpush1.bf16.msra.mxu0 %v9245_v51  ;;  %2512 = vmatpush1.bf16.msra.mxu1 %v9246_v52  ;;  %v9345_v51 = vld [vmem:[%s13257_s2 + $0x344] ss:$16 sps:$4 sm:$0xff]   ;;  %v9348_v52 = vld [vmem:[%s13257_s2 + $0x34c] ss:$16 sps:$4 sm:$0xff]  }
  0x47   : > { %2061 = vmatprep.subr.bf16.mxu0 %v9247_v53  ;;  %2513 = vmatprep.subr.bf16.mxu1 %v9249_v54  ;;  %v9342_v53 = vld [vmem:[%s10622_s19 + $0x118] ss:$28 sps:$4 sm:$0xff]   ;;  %v9343_v54 = vld [vmem:[%s13257_s2 + $0x340] ss:$16 sps:$4 sm:$0xff]  }
  0x4a   : > { %2062 = vmatpush1.bf16.msra.mxu0 %v9251_v55  ;;  %2514 = vmatpush1.bf16.msra.mxu1 %v9252_v56  ;;  %v9346_v55 = vld [vmem:[%s13257_s2 + $0x348] ss:$16 sps:$4 sm:$0xff]   ;;  %v9351_v56 = vld [vmem:[%s13257_s2 + $0x364] ss:$16 sps:$4 sm:$0xff]  }
  0x4b   : > { %2063 = vmatprep.subr.bf16.mxu0 %v9253_v57  ;;  %2515 = vmatprep.subr.bf16.mxu1 %v9255_v58  ;;  %v9354_v57 = vld [vmem:[%s13257_s2 + $0x36c] ss:$16 sps:$4 sm:$0xff]   ;;  %v9355_v58 = vld [vmem:[%s10622_s19 + $0x154] ss:$28 sps:$4 sm:$0xff]  }
  0x4e   : > { %2064 = vmatpush1.bf16.msra.mxu0 %v9257_v59  ;;  %2516 = vmatpush1.bf16.msra.mxu1 %v9258_v60  ;;  %v9349_v59 = vld [vmem:[%s13257_s2 + $0x360] ss:$16 sps:$4 sm:$0xff]   ;;  %v9352_v60 = vld [vmem:[%s13257_s2 + $0x368] ss:$16 sps:$4 sm:$0xff]  }
  0x4f   : > { %2065 = vmatprep.subr.bf16.mxu0 %v9259_v61  ;;  %2517 = vmatprep.subr.bf16.mxu1 %v9261_v62  ;;  %v9360_v61 = vld [vmem:[%s13257_s2 + $0x384] ss:$16 sps:$4 sm:$0xff]   ;;  %v9363_v62 = vld [vmem:[%s13257_s2 + $0x38c] ss:$16 sps:$4 sm:$0xff]  }
  0x52   : > { %2066 = vmatpush1.bf16.msra.mxu0 %v9263_v63  ;;  %2518 = vmatpush1.bf16.msra.mxu1 %v9264_v0  ;;  %v9357_v63 = vld [vmem:[%s10622_s19 + $0x150] ss:$28 sps:$4 sm:$0xff]  }
  0x53   : > { %2148 = vmatprep.subr.bf16.mxu0 %v9270_v1  ;;  %2600 = vmatprep.subr.bf16.mxu1 %v9273_v2  ;;  %v9358_v0 = vld [vmem:[%s13257_s2 + $0x380] ss:$16 sps:$4 sm:$0xff]   ;;  %v9361_v1 = vld [vmem:[%s13257_s2 + $0x388] ss:$16 sps:$4 sm:$0xff]   ;;  %v9366_v2 = vld [vmem:[%s13257_s2 + $0x3a4] ss:$16 sps:$4 sm:$0xff]  }
  0x55   : > { %2068 = vmatmul.mubr.bf16.vlgmr.msra.gmra.mrb[0].mxu0 %v9265_v3  ;;  %2520 = vmatmul.mubr.bf16.vlgmr.msra.gmra.mrb[0].mxu1 %v9265_v3  ;;  %v9369_v3 = vld [vmem:[%s13257_s2 + $0x3ac] ss:$16 sps:$4 sm:$0xff]  }
  0x56   : > { %2149 = vmatpush1.bf16.msra.mxu0 %v9268_v4  ;;  %2601 = vmatpush1.bf16.msra.mxu1 %v9271_v5  ;;  %v9370_v4 = vld [vmem:[%s10622_s19 + $0x18c] ss:$28 sps:$4 sm:$0xff]   ;;  %v9364_v5 = vld [vmem:[%s13257_s2 + $0x3a0] ss:$16 sps:$4 sm:$0xff]  }
  0x57   : > { %2150 = vmatprep.subr.bf16.mxu0 %v9276_v6  ;;  %2602 = vmatprep.subr.bf16.mxu1 %v9279_v7  ;;  %v9367_v6 = vld [vmem:[%s13257_s2 + $0x3a8] ss:$16 sps:$4 sm:$0xff]   ;;  %v9375_v7 = vld [vmem:[%s13257_s2 + $0x3c4] ss:$16 sps:$4 sm:$0xff]  }
  0x58   : > { %2077 = vmatprep.mubr.bf16.mxu0 %v9280_v8  ;;  %2529 = vmatprep.mubr.bf16.mxu1 %v9280_v8  ;;  %v9378_v8 = vld [vmem:[%s13257_s2 + $0x3cc] ss:$16 sps:$4 sm:$0xff]  }
  0x5a   : > { %2151 = vmatpush1.bf16.msra.mxu0 %v9274_v9  ;;  %2603 = vmatpush1.bf16.msra.mxu1 %v9277_v10  ;;  %v9372_v9 = vld [vmem:[%s10622_s19 + $0x188] ss:$28 sps:$4 sm:$0xff]   ;;  %v9373_v10 = vld [vmem:[%s13257_s2 + $0x3c0] ss:$16 sps:$4 sm:$0xff]  }
  0x5b   : > { %2152 = vmatprep.subr.bf16.mxu0 %v9285_v11  ;;  %2604 = vmatprep.subr.bf16.mxu1 %v9288_v12  ;;  %v9376_v11 = vld [vmem:[%s13257_s2 + $0x3c8] ss:$16 sps:$4 sm:$0xff]   ;;  %v9381_v12 = vld [vmem:[%s13257_s2 + $0x3e4] ss:$16 sps:$4 sm:$0xff]  }
  0x5d   : > { %2078 = vmatmul.mubr.bf16.gmra.mrb[4].mxu0 %v9282_v13  ;;  %2530 = vmatmul.mubr.bf16.gmra.mrb[4].mxu1 %v9282_v13  ;;  %v9384_v13 = vld [vmem:[%s13257_s2 + $0x3ec] ss:$16 sps:$4 sm:$0xff]  }
  0x5e   : > { %2153 = vmatpush1.bf16.msra.mxu0 %v9283_v14  ;;  %2605 = vmatpush1.bf16.msra.mxu1 %v9286_v15  ;;  %v9387_v14 = vld [vmem:[%s10622_s19 + $0xc] ss:$28 sps:$4 sm:$0xff]   ;;  %v9379_v15 = vld [vmem:[%s13257_s2 + $0x3e0] ss:$16 sps:$4 sm:$0xff]  }
  0x5f   : > { %2154 = vmatprep.subr.bf16.mxu0 %v9291_v16  ;;  %2606 = vmatprep.subr.bf16.mxu1 %v9294_v17  ;;  %v9382_v16 = vld [vmem:[%s13257_s2 + $0x3e8] ss:$16 sps:$4 sm:$0xff]   ;;  %v9390_v17 = vld [vmem:[%s13257_s2 + $0x404] ss:$16 sps:$4 sm:$0xff]  }
  0x60   : > { %2087 = vmatprep.mubr.bf16.mxu0 %v9295_v18  ;;  %2539 = vmatprep.mubr.bf16.mxu1 %v9295_v18  ;;  %v9393_v18 = vld [vmem:[%s13257_s2 + $0x40c] ss:$16 sps:$4 sm:$0xff]  }
  0x62   : > { %2155 = vmatpush1.bf16.msra.mxu0 %v9289_v19  ;;  %2607 = vmatpush1.bf16.msra.mxu1 %v9292_v20  ;;  %v9385_v19 = vld [vmem:[%s10622_s19 + $0x8] ss:$28 sps:$4 sm:$0xff]   ;;  %v9388_v20 = vld [vmem:[%s13257_s2 + $0x400] ss:$16 sps:$4 sm:$0xff]  }
  0x63   : > { %2156 = vmatprep.subr.bf16.mxu0 %v9300_v21  ;;  %2608 = vmatprep.subr.bf16.mxu1 %v9303_v22  ;;  %v9391_v21 = vld [vmem:[%s13257_s2 + $0x408] ss:$16 sps:$4 sm:$0xff]   ;;  %v9396_v22 = vld [vmem:[%s13257_s2 + $0x424] ss:$16 sps:$4 sm:$0xff]  }
  0x65   : > { %2088 = vmatmul.mubr.bf16.gmra.mrb[8].mxu0 %v9297_v23  ;;  %2540 = vmatmul.mubr.bf16.gmra.mrb[8].mxu1 %v9297_v23  ;;  %v9399_v23 = vld [vmem:[%s13257_s2 + $0x42c] ss:$16 sps:$4 sm:$0xff]  }
  0x66   : > { %2157 = vmatpush1.bf16.msra.mxu0 %v9298_v24  ;;  %2609 = vmatpush1.bf16.msra.mxu1 %v9301_v25  ;;  %v9400_v24 = vld [vmem:[%s10622_s19 + $0x44] ss:$28 sps:$4 sm:$0xff]  }
  0x67   : > { %2158 = vmatprep.subr.bf16.mxu0 %v9306_v26  ;;  %2610 = vmatprep.subr.bf16.mxu1 %v9309_v27  ;;  %v9394_v25 = vld [vmem:[%s13257_s2 + $0x420] ss:$16 sps:$4 sm:$0xff]   ;;  %v9397_v26 = vld [vmem:[%s13257_s2 + $0x428] ss:$16 sps:$4 sm:$0xff]   ;;  %v9405_v27 = vld [vmem:[%s13257_s2 + $0x444] ss:$16 sps:$4 sm:$0xff]  }
  0x68   : > { %2097 = vmatprep.mubr.bf16.mxu0 %v9310_v28  ;;  %2549 = vmatprep.mubr.bf16.mxu1 %v9310_v28  ;;  %v9408_v28 = vld [vmem:[%s13257_s2 + $0x44c] ss:$16 sps:$4 sm:$0xff]  }
  0x6a   : > { %2159 = vmatpush1.bf16.msra.mxu0 %v9304_v29  ;;  %2611 = vmatpush1.bf16.msra.mxu1 %v9307_v30  ;;  %v9402_v29 = vld [vmem:[%s10622_s19 + $0x40] ss:$28 sps:$4 sm:$0xff]  }
  0x6b   : > { %2160 = vmatprep.subr.bf16.mxu0 %v9315_v31  ;;  %2612 = vmatprep.subr.bf16.mxu1 %v9318_v32  ;;  %v9403_v30 = vld [vmem:[%s13257_s2 + $0x440] ss:$16 sps:$4 sm:$0xff]   ;;  %v9406_v31 = vld [vmem:[%s13257_s2 + $0x448] ss:$16 sps:$4 sm:$0xff]   ;;  %v9411_v32 = vld [vmem:[%s13257_s2 + $0x464] ss:$16 sps:$4 sm:$0xff]  }
  0x6d   : > { %2098 = vmatmul.mubr.bf16.gmra.mrb[12].mxu0 %v9312_v33  ;;  %2550 = vmatmul.mubr.bf16.gmra.mrb[12].mxu1 %v9312_v33  ;;  %v9414_v33 = vld [vmem:[%s13257_s2 + $0x46c] ss:$16 sps:$4 sm:$0xff]  }
  0x6e   : > { %2161 = vmatpush1.bf16.msra.mxu0 %v9313_v34  ;;  %2613 = vmatpush1.bf16.msra.mxu1 %v9316_v35  ;;  %v9415_v34 = vld [vmem:[%s10622_s19 + $0x7c] ss:$28 sps:$4 sm:$0xff]   ;;  %v9409_v35 = vld [vmem:[%s13257_s2 + $0x460] ss:$16 sps:$4 sm:$0xff]  }
  0x6f   : > { %2162 = vmatprep.subr.bf16.mxu0 %v9321_v36  ;;  %2614 = vmatprep.subr.bf16.mxu1 %v9324_v37  ;;  %v9412_v36 = vld [vmem:[%s13257_s2 + $0x468] ss:$16 sps:$4 sm:$0xff]   ;;  %v9420_v37 = vld [vmem:[%s13257_s2 + $0x484] ss:$16 sps:$4 sm:$0xff]  }
  0x70   : > { %2107 = vmatprep.mubr.bf16.mxu0 %v9325_v38  ;;  %2559 = vmatprep.mubr.bf16.mxu1 %v9325_v38  ;;  %v9423_v38 = vld [vmem:[%s13257_s2 + $0x48c] ss:$16 sps:$4 sm:$0xff]  }
  0x72   : > { %2163 = vmatpush1.bf16.msra.mxu0 %v9319_v39  ;;  %2615 = vmatpush1.bf16.msra.mxu1 %v9322_v40  ;;  %v9417_v39 = vld [vmem:[%s10622_s19 + $0x78] ss:$28 sps:$4 sm:$0xff]   ;;  %v9418_v40 = vld [vmem:[%s13257_s2 + $0x480] ss:$16 sps:$4 sm:$0xff]  }
  0x73   : > { %2164 = vmatprep.subr.bf16.mxu0 %v9330_v41  ;;  %2616 = vmatprep.subr.bf16.mxu1 %v9333_v42  ;;  %v9421_v41 = vld [vmem:[%s13257_s2 + $0x488] ss:$16 sps:$4 sm:$0xff]   ;;  %v9426_v42 = vld [vmem:[%s13257_s2 + $0x4a4] ss:$16 sps:$4 sm:$0xff]  }
  0x75   : > { %2108 = vmatmul.mubr.bf16.gmra.mrb[16].mxu0 %v9327_v43  ;;  %2560 = vmatmul.mubr.bf16.gmra.mrb[16].mxu1 %v9327_v43  ;;  %v9429_v43 = vld [vmem:[%s13257_s2 + $0x4ac] ss:$16 sps:$4 sm:$0xff]  }
  0x76   : > { %2165 = vmatpush1.bf16.msra.mxu0 %v9328_v44  ;;  %2617 = vmatpush1.bf16.msra.mxu1 %v9331_v45  ;;  %v9430_v44 = vld [vmem:[%s10622_s19 + $0xb4] ss:$28 sps:$4 sm:$0xff]  }
  0x77   : > { %2166 = vmatprep.subr.bf16.mxu0 %v9336_v46  ;;  %2618 = vmatprep.subr.bf16.mxu1 %v9339_v47  ;;  %v9424_v45 = vld [vmem:[%s13257_s2 + $0x4a0] ss:$16 sps:$4 sm:$0xff]   ;;  %v9427_v46 = vld [vmem:[%s13257_s2 + $0x4a8] ss:$16 sps:$4 sm:$0xff]   ;;  %v9435_v47 = vld [vmem:[%s13257_s2 + $0x4c4] ss:$16 sps:$4 sm:$0xff]  }
  0x78   : > { %2117 = vmatprep.mubr.bf16.mxu0 %v9340_v48  ;;  %2569 = vmatprep.mubr.bf16.mxu1 %v9340_v48  ;;  %v9438_v48 = vld [vmem:[%s13257_s2 + $0x4cc] ss:$16 sps:$4 sm:$0xff]  }
  0x7a   : > { %2167 = vmatpush1.bf16.msra.mxu0 %v9334_v49  ;;  %2619 = vmatpush1.bf16.msra.mxu1 %v9337_v50  ;;  %v9432_v49 = vld [vmem:[%s10622_s19 + $0xb0] ss:$28 sps:$4 sm:$0xff]  }
  0x7b   : > { %2168 = vmatprep.subr.bf16.mxu0 %v9345_v51  ;;  %2620 = vmatprep.subr.bf16.mxu1 %v9348_v52  ;;  %v9433_v50 = vld [vmem:[%s13257_s2 + $0x4c0] ss:$16 sps:$4 sm:$0xff]   ;;  %v9436_v51 = vld [vmem:[%s13257_s2 + $0x4c8] ss:$16 sps:$4 sm:$0xff]   ;;  %v9441_v52 = vld [vmem:[%s13257_s2 + $0x4e4] ss:$16 sps:$4 sm:$0xff]  }
  0x7d   : > { %2118 = vmatmul.mubr.bf16.gmra.mrb[20].mxu0 %v9342_v53  ;;  %2570 = vmatmul.mubr.bf16.gmra.mrb[20].mxu1 %v9342_v53  ;;  %v9444_v53 = vld [vmem:[%s13257_s2 + $0x4ec] ss:$16 sps:$4 sm:$0xff]  }
  0x7e   : > { %2169 = vmatpush1.bf16.msra.mxu0 %v9343_v54  ;;  %2621 = vmatpush1.bf16.msra.mxu1 %v9346_v55  ;;  %v9445_v54 = vld [vmem:[%s10622_s19 + $0xec] ss:$28 sps:$4 sm:$0xff]   ;;  %v9439_v55 = vld [vmem:[%s13257_s2 + $0x4e0] ss:$16 sps:$4 sm:$0xff]  }
  0x7f   : > { %2170 = vmatprep.subr.bf16.mxu0 %v9351_v56  ;;  %2622 = vmatprep.subr.bf16.mxu1 %v9354_v57  ;;  %v9442_v56 = vld [vmem:[%s13257_s2 + $0x4e8] ss:$16 sps:$4 sm:$0xff]   ;;  %v9450_v57 = vld [vmem:[%s13257_s2 + $0x504] ss:$16 sps:$4 sm:$0xff]  }
  0x80   : > { %2127 = vmatprep.mubr.bf16.mxu0 %v9355_v58  ;;  %2579 = vmatprep.mubr.bf16.mxu1 %v9355_v58  ;;  %v9453_v58 = vld [vmem:[%s13257_s2 + $0x50c] ss:$16 sps:$4 sm:$0xff]  }
  0x82   : > { %2171 = vmatpush1.bf16.msra.mxu0 %v9349_v59  ;;  %2623 = vmatpush1.bf16.msra.mxu1 %v9352_v60  ;;  %v9447_v59 = vld [vmem:[%s10622_s19 + $0xe8] ss:$28 sps:$4 sm:$0xff]   ;;  %v9448_v60 = vld [vmem:[%s13257_s2 + $0x500] ss:$16 sps:$4 sm:$0xff]  }
  0x83   : > { %2172 = vmatprep.subr.bf16.mxu0 %v9360_v61  ;;  %2624 = vmatprep.subr.bf16.mxu1 %v9363_v62  ;;  %v9451_v61 = vld [vmem:[%s13257_s2 + $0x508] ss:$16 sps:$4 sm:$0xff]   ;;  %v9456_v62 = vld [vmem:[%s13257_s2 + $0x524] ss:$16 sps:$4 sm:$0xff]  }
  0x85   : > { %2128 = vmatmul.mubr.bf16.gmra.mrb[24].mxu0 %v9357_v63  ;;  %2580 = vmatmul.mubr.bf16.gmra.mrb[24].mxu1 %v9357_v63  ;;  %v9459_v63 = vld [vmem:[%s13257_s2 + $0x52c] ss:$16 sps:$4 sm:$0xff]  }
  0x86   : > { %2173 = vmatpush1.bf16.msra.mxu0 %v9358_v0  ;;  %2625 = vmatpush1.bf16.msra.mxu1 %v9361_v1  ;;  %v9454_v0 = vld [vmem:[%s13257_s2 + $0x520] ss:$16 sps:$4 sm:$0xff]  }
  0x87   : > { %2174 = vmatprep.subr.bf16.mxu0 %v9366_v2  ;;  %2626 = vmatprep.subr.bf16.mxu1 %v9369_v3  ;;  %v9460_v1 = vld [vmem:[%s10622_s19 + $0x124] ss:$28 sps:$4 sm:$0xff]   ;;  %v9457_v2 = vld [vmem:[%s13257_s2 + $0x528] ss:$16 sps:$4 sm:$0xff]  }
  0x88   : > { %2137 = vmatprep.mubr.bf16.mxu0 %v9370_v4  ;;  %2589 = vmatprep.mubr.bf16.mxu1 %v9370_v4  ;;  %v9465_v3 = vld [vmem:[%s13257_s2 + $0x544] ss:$16 sps:$4 sm:$0xff]   ;;  %v9462_v4 = vld [vmem:[%s10622_s19 + $0x120] ss:$28 sps:$4 sm:$0xff]  }
  0x8a   : > { %2175 = vmatpush1.bf16.msra.mxu0 %v9364_v5  ;;  %2627 = vmatpush1.bf16.msra.mxu1 %v9367_v6  ;;  %v9468_v5 = vld [vmem:[%s13257_s2 + $0x54c] ss:$16 sps:$4 sm:$0xff]   ;;  %v9463_v6 = vld [vmem:[%s13257_s2 + $0x540] ss:$16 sps:$4 sm:$0xff]  }
  0x8b   : > { %2176 = vmatprep.subr.bf16.mxu0 %v9375_v7  ;;  %2628 = vmatprep.subr.bf16.mxu1 %v9378_v8  ;;  %v9466_v7 = vld [vmem:[%s13257_s2 + $0x548] ss:$16 sps:$4 sm:$0xff]   ;;  %v9471_v8 = vld [vmem:[%s13257_s2 + $0x564] ss:$16 sps:$4 sm:$0xff]  }
  0x8d   : > { %2138 = vmatmul.mubr.bf16.gmra.mrb[28].mxu0 %v9372_v9  ;;  %2590 = vmatmul.mubr.bf16.gmra.mrb[28].mxu1 %v9372_v9  ;;  %v9474_v9 = vld [vmem:[%s13257_s2 + $0x56c] ss:$16 sps:$4 sm:$0xff]  }
  0x8e   : > { %2177 = vmatpush1.bf16.msra.mxu0 %v9373_v10  ;;  %2629 = vmatpush1.bf16.msra.mxu1 %v9376_v11  ;;  %v9475_v10 = vld [vmem:[%s10622_s19 + $0x15c] ss:$28 sps:$4 sm:$0xff]   ;;  %v9469_v11 = vld [vmem:[%s13257_s2 + $0x560] ss:$16 sps:$4 sm:$0xff]  }
  0x8f   : > { %2178 = vmatprep.subr.bf16.mxu0 %v9381_v12  ;;  %2630 = vmatprep.subr.bf16.mxu1 %v9384_v13  ;;  %v9472_v12 = vld [vmem:[%s13257_s2 + $0x568] ss:$16 sps:$4 sm:$0xff]   ;;  %v9480_v13 = vld [vmem:[%s13257_s2 + $0x584] ss:$16 sps:$4 sm:$0xff]  }
  0x90   : > { %2180 = vmatprep.mubr.bf16.mxu0 %v9387_v14  ;;  %2632 = vmatprep.mubr.bf16.mxu1 %v9387_v14  ;;  %v9483_v14 = vld [vmem:[%s13257_s2 + $0x58c] ss:$16 sps:$4 sm:$0xff]  }
  0x92   : > { %2179 = vmatpush1.bf16.msra.mxu0 %v9379_v15  ;;  %2631 = vmatpush1.bf16.msra.mxu1 %v9382_v16  ;;  %v9477_v15 = vld [vmem:[%s10622_s19 + $0x158] ss:$28 sps:$4 sm:$0xff]   ;;  %v9478_v16 = vld [vmem:[%s13257_s2 + $0x580] ss:$16 sps:$4 sm:$0xff]  }
  0x93   : > { %2261 = vmatprep.subr.bf16.mxu0 %v9390_v17  ;;  %2713 = vmatprep.subr.bf16.mxu1 %v9393_v18  ;;  %v9481_v17 = vld [vmem:[%s13257_s2 + $0x588] ss:$16 sps:$4 sm:$0xff]   ;;  %v9486_v18 = vld [vmem:[%s13257_s2 + $0x5a4] ss:$16 sps:$4 sm:$0xff]  }
  0x95   : > { %2181 = vmatmul.mubr.bf16.vlgmr.msra.gmra.mrb[0].mxu0 %v9385_v19  ;;  %2633 = vmatmul.mubr.bf16.vlgmr.msra.gmra.mrb[0].mxu1 %v9385_v19  ;;  %v9489_v19 = vld [vmem:[%s13257_s2 + $0x5ac] ss:$16 sps:$4 sm:$0xff]  }
  0x96   : > { %2262 = vmatpush1.bf16.msra.mxu0 %v9388_v20  ;;  %2714 = vmatpush1.bf16.msra.mxu1 %v9391_v21  ;;  %v9490_v20 = vld [vmem:[%s10622_s19 + $0x194] ss:$28 sps:$4 sm:$0xff]  }
  0x97   : > { %2263 = vmatprep.subr.bf16.mxu0 %v9396_v22  ;;  %2715 = vmatprep.subr.bf16.mxu1 %v9399_v23  ;;  %v9484_v21 = vld [vmem:[%s13257_s2 + $0x5a0] ss:$16 sps:$4 sm:$0xff]   ;;  %v9487_v22 = vld [vmem:[%s13257_s2 + $0x5a8] ss:$16 sps:$4 sm:$0xff]   ;;  %v9495_v23 = vld [vmem:[%s13257_s2 + $0x5c4] ss:$16 sps:$4 sm:$0xff]  }
  0x98   : > { %2190 = vmatprep.mubr.bf16.mxu0 %v9400_v24  ;;  %2642 = vmatprep.mubr.bf16.mxu1 %v9400_v24  ;;  %v9498_v24 = vld [vmem:[%s13257_s2 + $0x5cc] ss:$16 sps:$4 sm:$0xff]  }
  0x9a   : > { %2264 = vmatpush1.bf16.msra.mxu0 %v9394_v25  ;;  %2716 = vmatpush1.bf16.msra.mxu1 %v9397_v26  ;;  %v9492_v25 = vld [vmem:[%s10622_s19 + $0x190] ss:$28 sps:$4 sm:$0xff]  }
  0x9b   : > { %2265 = vmatprep.subr.bf16.mxu0 %v9405_v27  ;;  %2717 = vmatprep.subr.bf16.mxu1 %v9408_v28  ;;  %v9493_v26 = vld [vmem:[%s13257_s2 + $0x5c0] ss:$16 sps:$4 sm:$0xff]   ;;  %v9496_v27 = vld [vmem:[%s13257_s2 + $0x5c8] ss:$16 sps:$4 sm:$0xff]   ;;  %v9501_v28 = vld [vmem:[%s13257_s2 + $0x5e4] ss:$16 sps:$4 sm:$0xff]  }
  0x9d   : > { %2191 = vmatmul.mubr.bf16.gmra.mrb[4].mxu0 %v9402_v29  ;;  %2643 = vmatmul.mubr.bf16.gmra.mrb[4].mxu1 %v9402_v29  ;;  %v9504_v29 = vld [vmem:[%s13257_s2 + $0x5ec] ss:$16 sps:$4 sm:$0xff]  }
  0x9e   : > { %2266 = vmatpush1.bf16.msra.mxu0 %v9403_v30  ;;  %2718 = vmatpush1.bf16.msra.mxu1 %v9406_v31  ;;  %v9507_v30 = vld [vmem:[%s10622_s19 + $0x14] ss:$28 sps:$4 sm:$0xff]  }
  0x9f   : > { %2267 = vmatprep.subr.bf16.mxu0 %v9411_v32  ;;  %2719 = vmatprep.subr.bf16.mxu1 %v9414_v33  ;;  %v9499_v31 = vld [vmem:[%s13257_s2 + $0x5e0] ss:$16 sps:$4 sm:$0xff]   ;;  %v9502_v32 = vld [vmem:[%s13257_s2 + $0x5e8] ss:$16 sps:$4 sm:$0xff]   ;;  %v9510_v33 = vld [vmem:[%s13257_s2 + $0x604] ss:$16 sps:$4 sm:$0xff]  }
  0xa0   : > { %2200 = vmatprep.mubr.bf16.mxu0 %v9415_v34  ;;  %2652 = vmatprep.mubr.bf16.mxu1 %v9415_v34  ;;  %v9534_v34 = vld [vmem:[%s13257_s2 + $0x60c] ss:$16 sps:$4 sm:$0xff]  }
  0xa2   : > { %2268 = vmatpush1.bf16.msra.mxu0 %v9409_v35  ;;  %2720 = vmatpush1.bf16.msra.mxu1 %v9412_v36  ;;  %v9505_v35 = vld [vmem:[%s10622_s19 + $0x10] ss:$28 sps:$4 sm:$0xff]  }
  0xa3   : > { %2269 = vmatprep.subr.bf16.mxu0 %v9420_v37  ;;  %2721 = vmatprep.subr.bf16.mxu1 %v9423_v38  ;;  %v9508_v36 = vld [vmem:[%s13257_s2 + $0x600] ss:$16 sps:$4 sm:$0xff]   ;;  %v9511_v37 = vld [vmem:[%s10622_s19 + $0x4c] ss:$28 sps:$4 sm:$0xff]  }
  0xa4   : > { %v9532_v38 = vld [vmem:[%s13257_s2 + $0x608] ss:$16 sps:$4 sm:$0xff]  }
  0xa5   : > { %2201 = vmatmul.mubr.bf16.gmra.mrb[8].mxu0 %v9417_v39  ;;  %2653 = vmatmul.mubr.bf16.gmra.mrb[8].mxu1 %v9417_v39  ;;  %v9545_v39 = vld [vmem:[%s13259_s4 + $0x4] ss:$8 sps:$4 sm:$0xff]  }
  0xa6   : > { %2270 = vmatpush1.bf16.msra.mxu0 %v9418_v40  ;;  %2722 = vmatpush1.bf16.msra.mxu1 %v9421_v41  ;;  %v9513_v40 = vld [vmem:[%s10622_s19 + $0x48] ss:$28 sps:$4 sm:$0xff]  }
  0xa7   : > { %2271 = vmatprep.subr.bf16.mxu0 %v9426_v42  ;;  %2723 = vmatprep.subr.bf16.mxu1 %v9429_v43  ;;  %v9514_v41 = vld [vmem:[%s10622_s19 + $0x84] ss:$28 sps:$4 sm:$0xff]   ;;  %v9517_v43 = vld [vmem:[%s10622_s19 + $0xbc] ss:$28 sps:$4 sm:$0xff]  }
  0xa8   : > { %2210 = vmatprep.mubr.bf16.mxu0 %v9430_v44  ;;  %2662 = vmatprep.mubr.bf16.mxu1 %v9430_v44  ;;  %v9516_v42 = vld [vmem:[%s10622_s19 + $0x80] ss:$28 sps:$4 sm:$0xff]   ;;  %v9519_v44 = vld [vmem:[%s10622_s19 + $0xb8] ss:$28 sps:$4 sm:$0xff]  }
  0xaa   : > { %2272 = vmatpush1.bf16.msra.mxu0 %v9424_v45  ;;  %2724 = vmatpush1.bf16.msra.mxu1 %v9427_v46  ;;  %v9520_v45 = vld [vmem:[%s10622_s19 + $0xf4] ss:$28 sps:$4 sm:$0xff]  }
  0xab   : > { %2273 = vmatprep.subr.bf16.mxu0 %v9435_v47  ;;  %2725 = vmatprep.subr.bf16.mxu1 %v9438_v48  ;;  %v9522_v46 = vld [vmem:[%s10622_s19 + $0xf0] ss:$28 sps:$4 sm:$0xff]   ;;  %v9525_v48 = vld [vmem:[%s10622_s19 + $0x128] ss:$28 sps:$4 sm:$0xff]  }
  0xac   : > { %v9523_v47 = vld [vmem:[%s10622_s19 + $0x12c] ss:$28 sps:$4 sm:$0xff]  }
  0xad   : > { %2211 = vmatmul.mubr.bf16.gmra.mrb[12].mxu0 %v9432_v49  ;;  %2663 = vmatmul.mubr.bf16.gmra.mrb[12].mxu1 %v9432_v49  ;;  %v9526_v49 = vld [vmem:[%s10622_s19 + $0x164] ss:$28 sps:$4 sm:$0xff]  }
  0xae   : > { %2274 = vmatpush1.bf16.msra.mxu0 %v9433_v50  ;;  %2726 = vmatpush1.bf16.msra.mxu1 %v9436_v51  ;;  %v9528_v50 = vld [vmem:[%s10622_s19 + $0x160] ss:$28 sps:$4 sm:$0xff]  }
  0xaf   : > { %2275 = vmatprep.subr.bf16.mxu0 %v9441_v52  ;;  %2727 = vmatprep.subr.bf16.mxu1 %v9444_v53  ;;  %v9529_v51 = vld [vmem:[%s10622_s19 + $0x19c] ss:$28 sps:$4 sm:$0xff]   ;;  %v10360_v53 = vmov 0  }
  0xb0   : > { %2220 = vmatprep.mubr.bf16.mxu0 %v9445_v54  ;;  %2672 = vmatprep.mubr.bf16.mxu1 %v9445_v54  ;;  %v9531_v52 = vld [vmem:[%s10622_s19 + $0x198] ss:$28 sps:$4 sm:$0xff]  }
  0xb1   : > { %v9535_v54 = vld [vmem:[%s10622_s19 + $0x18] ss:$28 sps:$4 sm:$0xff]  }
  0xb2   : > { %2276 = vmatpush1.bf16.msra.mxu0 %v9439_v55  ;;  %2728 = vmatpush1.bf16.msra.mxu1 %v9442_v56  ;;  %v9543_v55 = vld [vmem:[%s13259_s4] ss:$8 sps:$4 sm:$0xff]   ;;  %v9548_v56 = vld [vmem:[%s13259_s4 + $0x14] ss:$8 sps:$4 sm:$0xff]  }
  0xb3   : > { %2277 = vmatprep.subr.bf16.mxu0 %v9450_v57  ;;  %2729 = vmatprep.subr.bf16.mxu1 %v9453_v58  ;;  %v9546_v57 = vld [vmem:[%s13259_s4 + $0x10] ss:$8 sps:$4 sm:$0xff]   ;;  %v9551_v58 = vld [vmem:[%s13259_s4 + $0x24] ss:$8 sps:$4 sm:$0xff]  }
  0xb5   : > { %2221 = vmatmul.mubr.bf16.gmra.mrb[16].mxu0 %v9447_v59  ;;  %2673 = vmatmul.mubr.bf16.gmra.mrb[16].mxu1 %v9447_v59  ;;  %v9536_v59 = vld [vmem:[%s10622_s19 + $0x50] ss:$28 sps:$4 sm:$0xff]  }
  0xb6   : > { %2278 = vmatpush1.bf16.msra.mxu0 %v9448_v60  ;;  %2730 = vmatpush1.bf16.msra.mxu1 %v9451_v61  ;;  %v9549_v60 = vld [vmem:[%s13259_s4 + $0x20] ss:$8 sps:$4 sm:$0xff]   ;;  %v9554_v61 = vld [vmem:[%s13259_s4 + $0x34] ss:$8 sps:$4 sm:$0xff]  }
  0xb7   : > { %2279 = vmatprep.subr.bf16.mxu0 %v9456_v62  ;;  %2731 = vmatprep.subr.bf16.mxu1 %v9459_v63  ;;  %v9552_v62 = vld [vmem:[%s13259_s4 + $0x30] ss:$8 sps:$4 sm:$0xff]   ;;  %v9557_v63 = vld [vmem:[%s13259_s4 + $0x44] ss:$8 sps:$4 sm:$0xff]  }
  0xb8   : > { %2230 = vmatprep.mubr.bf16.mxu0 %v9460_v1  ;;  %2682 = vmatprep.mubr.bf16.mxu1 %v9460_v1  ;;  %v9555_v1 = vld [vmem:[%s13259_s4 + $0x40] ss:$8 sps:$4 sm:$0xff]  }
  0xba   : > { %2280 = vmatpush1.bf16.msra.mxu0 %v9454_v0  ;;  %2732 = vmatpush1.bf16.msra.mxu1 %v9457_v2  ;;  %v9537_v0 = vld [vmem:[%s10622_s19 + $0x88] ss:$28 sps:$4 sm:$0xff]   ;;  %v9560_v2 = vld [vmem:[%s13259_s4 + $0x54] ss:$8 sps:$4 sm:$0xff]  }
  0xbb   : > { %2281 = vmatprep.subr.bf16.mxu0 %v9465_v3  ;;  %2733 = vmatprep.subr.bf16.mxu1 %v9468_v5  ;;  %v9558_v3 = vld [vmem:[%s13259_s4 + $0x50] ss:$8 sps:$4 sm:$0xff]   ;;  %v9538_v5 = vld [vmem:[%s10622_s19 + $0xc0] ss:$28 sps:$4 sm:$0xff]  }
  0xbd   : > { %2231 = vmatmul.mubr.bf16.gmra.mrb[20].mxu0 %v9462_v4  ;;  %2683 = vmatmul.mubr.bf16.gmra.mrb[20].mxu1 %v9462_v4  ;;  %v9563_v4 = vld [vmem:[%s13259_s4 + $0x64] ss:$8 sps:$4 sm:$0xff]  }
  0xbe   : > { %2282 = vmatpush1.bf16.msra.mxu0 %v9463_v6  ;;  %2734 = vmatpush1.bf16.msra.mxu1 %v9466_v7  ;;  %v9561_v6 = vld [vmem:[%s13259_s4 + $0x60] ss:$8 sps:$4 sm:$0xff]   ;;  %v9566_v7 = vld [vmem:[%s13259_s4 + $0x74] ss:$8 sps:$4 sm:$0xff]  }
  0xbf   : > { %2283 = vmatprep.subr.bf16.mxu0 %v9471_v8  ;;  %2735 = vmatprep.subr.bf16.mxu1 %v9474_v9  ;;  %v9564_v8 = vld [vmem:[%s13259_s4 + $0x70] ss:$8 sps:$4 sm:$0xff]   ;;  %v9569_v9 = vld [vmem:[%s13259_s4 + $0x84] ss:$8 sps:$4 sm:$0xff]  }
  0xc0   : > { %2240 = vmatprep.mubr.bf16.mxu0 %v9475_v10  ;;  %2692 = vmatprep.mubr.bf16.mxu1 %v9475_v10  ;;  %v9539_v10 = vld [vmem:[%s10622_s19 + $0xf8] ss:$28 sps:$4 sm:$0xff]  }
  0xc2   : > { %2284 = vmatpush1.bf16.msra.mxu0 %v9469_v11  ;;  %2736 = vmatpush1.bf16.msra.mxu1 %v9472_v12  ;;  %v9567_v11 = vld [vmem:[%s13259_s4 + $0x80] ss:$8 sps:$4 sm:$0xff]   ;;  %v9572_v12 = vld [vmem:[%s13259_s4 + $0x94] ss:$8 sps:$4 sm:$0xff]  }
  0xc3   : > { %2285 = vmatprep.subr.bf16.mxu0 %v9480_v13  ;;  %2737 = vmatprep.subr.bf16.mxu1 %v9483_v14  ;;  %v9570_v13 = vld [vmem:[%s13259_s4 + $0x90] ss:$8 sps:$4 sm:$0xff]   ;;  %v9575_v14 = vld [vmem:[%s13259_s4 + $0xa4] ss:$8 sps:$4 sm:$0xff]  }
  0xc5   : > { %2241 = vmatmul.mubr.bf16.gmra.mrb[24].mxu0 %v9477_v15  ;;  %2693 = vmatmul.mubr.bf16.gmra.mrb[24].mxu1 %v9477_v15  ;;  %v9540_v15 = vld [vmem:[%s10622_s19 + $0x130] ss:$28 sps:$4 sm:$0xff]  }
  0xc6   : > { %2286 = vmatpush1.bf16.msra.mxu0 %v9478_v16  ;;  %2738 = vmatpush1.bf16.msra.mxu1 %v9481_v17  ;;  %v9573_v16 = vld [vmem:[%s13259_s4 + $0xa0] ss:$8 sps:$4 sm:$0xff]   ;;  %v9578_v17 = vld [vmem:[%s13259_s4 + $0xb4] ss:$8 sps:$4 sm:$0xff]  }
  0xc7   : > { %2287 = vmatprep.subr.bf16.mxu0 %v9486_v18  ;;  %2739 = vmatprep.subr.bf16.mxu1 %v9489_v19  ;;  %v9576_v18 = vld [vmem:[%s13259_s4 + $0xb0] ss:$8 sps:$4 sm:$0xff]   ;;  %v9581_v19 = vld [vmem:[%s13259_s4 + $0xc4] ss:$8 sps:$4 sm:$0xff]  }
  0xc8   : > { %2250 = vmatprep.mubr.bf16.mxu0 %v9490_v20  ;;  %2702 = vmatprep.mubr.bf16.mxu1 %v9490_v20  ;;  %v9541_v20 = vld [vmem:[%s10622_s19 + $0x168] ss:$28 sps:$4 sm:$0xff]  }
  0xca   : > { %2288 = vmatpush1.bf16.msra.mxu0 %v9484_v21  ;;  %2740 = vmatpush1.bf16.msra.mxu1 %v9487_v22  ;;  %v9579_v21 = vld [vmem:[%s13259_s4 + $0xc0] ss:$8 sps:$4 sm:$0xff]   ;;  %v9584_v22 = vld [vmem:[%s13259_s4 + $0xd4] ss:$8 sps:$4 sm:$0xff]  }
  0xcb   : > { %2289 = vmatprep.subr.bf16.mxu0 %v9495_v23  ;;  %2741 = vmatprep.subr.bf16.mxu1 %v9498_v24  ;;  %v9582_v23 = vld [vmem:[%s13259_s4 + $0xd0] ss:$8 sps:$4 sm:$0xff]   ;;  %v9542_v24 = vld [vmem:[%s10622_s19 + $0x1a0] ss:$28 sps:$4 sm:$0xff]  }
  0xcd   : > { %2251 = vmatmul.mubr.bf16.gmra.mrb[28].mxu0 %v9492_v25  ;;  %2703 = vmatmul.mubr.bf16.gmra.mrb[28].mxu1 %v9492_v25  ;;  %v9587_v25 = vld [vmem:[%s13259_s4 + $0xe4] ss:$8 sps:$4 sm:$0xff]  }
  0xce   : > { %2290 = vmatpush1.bf16.msra.mxu0 %v9493_v26  ;;  %2742 = vmatpush1.bf16.msra.mxu1 %v9496_v27  ;;  %v9585_v26 = vld [vmem:[%s13259_s4 + $0xe0] ss:$8 sps:$4 sm:$0xff]   ;;  %v9590_v27 = vld [vmem:[%s13259_s4 + $0xf4] ss:$8 sps:$4 sm:$0xff]  }
  0xcf   : > { %2291 = vmatprep.subr.bf16.mxu0 %v9501_v28  ;;  %2743 = vmatprep.subr.bf16.mxu1 %v9504_v29  ;;  %v9588_v28 = vld [vmem:[%s13259_s4 + $0xf0] ss:$8 sps:$4 sm:$0xff]   ;;  %v9593_v29 = vld [vmem:[%s13259_s4 + $0x104] ss:$8 sps:$4 sm:$0xff]  }
  0xd0   : > { %2293 = vmatprep.mubr.bf16.mxu0 %v9507_v30  ;;  %2745 = vmatprep.mubr.bf16.mxu1 %v9507_v30  ;;  %v730_v30 = vlaneseq }
  0xd2   : > { %2292 = vmatpush1.bf16.msra.mxu0 %v9499_v31  ;;  %2744 = vmatpush1.bf16.msra.mxu1 %v9502_v32  ;;  %v11265_v31 = vshrl.u32 %v730_v30, 7  ;;  %v9594_v30 = vld [vmem:[%s13259_s4 + $0x110] ss:$8 sps:$4 sm:$0xff]  }
  0xd3   : > { %2374 = vmatprep.subr.bf16.mxu0 %v9510_v33  ;;  %2826 = vmatprep.subr.bf16.mxu1 %v9534_v34  ;;  %v728_v34 = vld [vmem:[%s13258_s3] sm:$0xf] }
  0xd4   : > { %v11268_v32 = vsub.s32 0, %v11265_v31  ;;  %v11271_v33 = vsub.s32 2, %v11265_v31 }
  0xd5   : > { %2294 = vmatmul.mubr.bf16.vlgmr.msra.gmra.mrb[0].mxu0 %v9505_v35  ;;  %2746 = vmatmul.mubr.bf16.vlgmr.msra.gmra.mrb[0].mxu1 %v9505_v35  ;;  %v11277_v35 = vsub.s32 1, %v11265_v31 }
  0xd6   : > { %2375 = vmatpush1.bf16.msra.mxu0 %v9508_v36  ;;  %2303 = vmatprep.mubr.bf16.mxu0 %v9511_v37  ;;  %v11280_v36 = vsub.s32 3, %v11265_v31 }
  0xd7   : > { %2755 = vmatprep.mubr.bf16.mxu1 %v9511_v37  ;;  %2827 = vmatpush1.bf16.msra.mxu1 %v9532_v38  ;;  %v11283_v37 = vrot.slane %v728_v34, %v11268_v32  ;;  %v11286_v38 = vrot.slane %v728_v34, %v11271_v33 }
  0xd8   : > { %3431 = vmatprep.subr.bf16.mxu0 %v9545_v39  ;;  %v11289_v39 = vrot.slane %v728_v34, %v11277_v35 }
  0xdd   : > { %2304 = vmatmul.mubr.bf16.gmra.mrb[4].mxu0 %v9513_v40  ;;  %2756 = vmatmul.mubr.bf16.gmra.mrb[4].mxu1 %v9513_v40  ;;  %v11292_v40 = vrot.slane %v728_v34, %v11280_v36  ;;  %v9650_v34 = vld [vmem:[%s13261_s6 + $0x64] ss:$16 sps:$4 sm:$0xff]  }
  0xde   : > { %2313 = vmatprep.mubr.bf16.mxu0 %v9514_v41  ;;  %2765 = vmatprep.mubr.bf16.mxu1 %v9514_v41 }
  0xe5   : > { %2314 = vmatmul.mubr.bf16.gmra.mrb[8].mxu0 %v9516_v42  ;;  %2766 = vmatmul.mubr.bf16.gmra.mrb[8].mxu1 %v9516_v42 }
  0xe6   : > { %2323 = vmatprep.mubr.bf16.mxu0 %v9517_v43  ;;  %2775 = vmatprep.mubr.bf16.mxu1 %v9517_v43 }
  0xed   : > { %2324 = vmatmul.mubr.bf16.gmra.mrb[12].mxu0 %v9519_v44  ;;  %2776 = vmatmul.mubr.bf16.gmra.mrb[12].mxu1 %v9519_v44 }
  0xee   : > { %2333 = vmatprep.mubr.bf16.mxu0 %v9520_v45  ;;  %2785 = vmatprep.mubr.bf16.mxu1 %v9520_v45 }
  0xf5   : > { %2334 = vmatmul.mubr.bf16.gmra.mrb[16].mxu0 %v9522_v46  ;;  %2786 = vmatmul.mubr.bf16.gmra.mrb[16].mxu1 %v9522_v46 }
  0xf6   : > { %2343 = vmatprep.mubr.bf16.mxu0 %v9523_v47  ;;  %2795 = vmatprep.mubr.bf16.mxu1 %v9523_v47 }
  0xfd   : > { %2344 = vmatmul.mubr.bf16.gmra.mrb[20].mxu0 %v9525_v48  ;;  %2796 = vmatmul.mubr.bf16.gmra.mrb[20].mxu1 %v9525_v48 }
  0xfe   : > { %2353 = vmatprep.mubr.bf16.mxu0 %v9526_v49  ;;  %2805 = vmatprep.mubr.bf16.mxu1 %v9526_v49 }
 0x105   : > { %2354 = vmatmul.mubr.bf16.gmra.mrb[24].mxu0 %v9528_v50  ;;  %2806 = vmatmul.mubr.bf16.gmra.mrb[24].mxu1 %v9528_v50 }
 0x106   : > { %2363 = vmatprep.mubr.bf16.mxu0 %v9529_v51  ;;  %2815 = vmatprep.mubr.bf16.mxu1 %v9529_v51 }
 0x10d   : > { %2364 = vmatmul.mubr.bf16.gmra.mrb[28].mxu0 %v9531_v52  ;;  %2816 = vmatmul.mubr.bf16.gmra.mrb[28].mxu1 %v9531_v52 }
 0x10e   : > { %2406 = vmatprep.mubr.bf16.mxu0 %v10360_v53  ;;  %2858 = vmatprep.mubr.bf16.mxu1 %v10360_v53 }
 0x115   : > { %7968 = vmatmul.mubr.msk.bf16.vlgmr.msra.gmra.mrb[0].mxu0 %vm2010_vm0, %v9535_v54  ;;  %7976 = vmatmul.mubr.msk.bf16.vlgmr.msra.gmra.mrb[0].mxu1 %vm2010_vm0, %v9535_v54 }
 0x116   : > { %2416 = vmatprep.mubr.bf16.mxu0 %v10360_v53  ;;  %2868 = vmatprep.mubr.bf16.mxu1 %v10360_v53 }
 0x117   : > { %3432 = vmatpush1.bf16.msra.mxu0 %v9543_v55 }
 0x118   : > { %3433 = vmatprep.subr.bf16.mxu0 %v9548_v56  ;;  %v9639_v56 = vld [vmem:[%s13261_s6] ss:$16 sps:$4 sm:$0xff]  }
 0x11b   : > { %3434 = vmatpush1.bf16.msra.mxu0 %v9546_v57 }
 0x11c   : > { %3435 = vmatprep.subr.bf16.mxu0 %v9551_v58 }
 0x11d   : > { %7969 = vmatmul.mubr.msk.bf16.gmra.mrb[4].mxu0 %vm2010_vm0, %v9536_v59  ;;  %7977 = vmatmul.mubr.msk.bf16.gmra.mrb[4].mxu1 %vm2010_vm0, %v9536_v59  ;;  %v9641_v59 = vld [vmem:[%s13261_s6 + $0x4] ss:$16 sps:$4 sm:$0xff]  }
 0x11e   : > { %2426 = vmatprep.mubr.bf16.mxu0 %v10360_v53  ;;  %2878 = vmatprep.mubr.bf16.mxu1 %v10360_v53 }
 0x11f   : > { %3436 = vmatpush1.bf16.msra.mxu0 %v9549_v60  ;;  %3991 = vmatprep.subr.bf16.mxu1 %v9641_v59  ;;  %v9653_v59 = vld [vmem:[%s13261_s6 + $0x84] ss:$16 sps:$4 sm:$0xff]  }
 0x120   : > { %3437 = vmatprep.subr.bf16.mxu0 %v9554_v61  ;;  %3992 = vmatpush1.bf16.msra.mxu1 %v9639_v56 }
 0x123   : > { %3438 = vmatpush1.bf16.msra.mxu0 %v9552_v62 }
 0x124   : > { %3439 = vmatprep.subr.bf16.mxu0 %v9557_v63 }
 0x125   : > { %7970 = vmatmul.mubr.msk.bf16.gmra.mrb[8].mxu0 %vm2010_vm0, %v9537_v0  ;;  %7978 = vmatmul.mubr.msk.bf16.gmra.mrb[8].mxu1 %vm2010_vm0, %v9537_v0  ;;  %v9644_v0 = vld [vmem:[%s13261_s6 + $0x24] ss:$16 sps:$4 sm:$0xff]  }
 0x126   : > { %2436 = vmatprep.mubr.bf16.mxu0 %v10360_v53  ;;  %2888 = vmatprep.mubr.bf16.mxu1 %v10360_v53 }
 0x127   : > { %3440 = vmatpush1.bf16.msra.mxu0 %v9555_v1  ;;  %3993 = vmatprep.subr.bf16.mxu1 %v9644_v0  ;;  %v9602_v0 = vld [vmem:[%s13259_s4 + $0x134] ss:$8 sps:$4 sm:$0xff]  }
 0x128   : > { %3441 = vmatprep.subr.bf16.mxu0 %v9560_v2 }
 0x12b   : > { %3442 = vmatpush1.bf16.msra.mxu0 %v9558_v3 }
 0x12c   : > { %3443 = vmatprep.subr.bf16.mxu0 %v9563_v4 }
 0x12d   : > { %7971 = vmatmul.mubr.msk.bf16.gmra.mrb[12].mxu0 %vm2010_vm0, %v9538_v5  ;;  %7979 = vmatmul.mubr.msk.bf16.gmra.mrb[12].mxu1 %vm2010_vm0, %v9538_v5 }
 0x12e   : > { %2446 = vmatprep.mubr.bf16.mxu0 %v10360_v53  ;;  %2898 = vmatprep.mubr.bf16.mxu1 %v10360_v53 }
 0x12f   : > { %3444 = vmatpush1.bf16.msra.mxu0 %v9561_v6 }
 0x130   : > { %3445 = vmatprep.subr.bf16.mxu0 %v9566_v7  ;;  %v9642_v7 = vld [vmem:[%s13261_s6 + $0x20] ss:$16 sps:$4 sm:$0xff]  }
 0x131   : > { %3994 = vmatpush1.bf16.msra.mxu1 %v9642_v7 }
 0x133   : > { %3446 = vmatpush1.bf16.msra.mxu0 %v9564_v8 }
 0x134   : > { %3447 = vmatprep.subr.bf16.mxu0 %v9569_v9 }
 0x135   : > { %7972 = vmatmul.mubr.msk.bf16.gmra.mrb[16].mxu0 %vm2010_vm0, %v9539_v10  ;;  %7980 = vmatmul.mubr.msk.bf16.gmra.mrb[16].mxu1 %vm2010_vm0, %v9539_v10 }
 0x136   : > { %2456 = vmatprep.mubr.bf16.mxu0 %v10360_v53  ;;  %2908 = vmatprep.mubr.bf16.mxu1 %v10360_v53 }
 0x137   : > { %3448 = vmatpush1.bf16.msra.mxu0 %v9567_v11 }
 0x138   : > { %3449 = vmatprep.subr.bf16.mxu0 %v9572_v12  ;;  %v9591_v12 = vld [vmem:[%s13259_s4 + $0x100] ss:$8 sps:$4 sm:$0xff]  }
 0x13b   : > { %3450 = vmatpush1.bf16.msra.mxu0 %v9570_v13  ;;  %v9647_v13 = vld [vmem:[%s13261_s6 + $0x44] ss:$16 sps:$4 sm:$0xff]  }
 0x13c   : > { %3451 = vmatprep.subr.bf16.mxu0 %v9575_v14  ;;  %3995 = vmatprep.subr.bf16.mxu1 %v9647_v13 }
 0x13d   : > { %7973 = vmatmul.mubr.msk.bf16.gmra.mrb[20].mxu0 %vm2010_vm0, %v9540_v15  ;;  %7981 = vmatmul.mubr.msk.bf16.gmra.mrb[20].mxu1 %vm2010_vm0, %v9540_v15 }
 0x13e   : > { %2466 = vmatprep.mubr.bf16.mxu0 %v10360_v53  ;;  %2918 = vmatprep.mubr.bf16.mxu1 %v10360_v53 }
 0x13f   : > { %3452 = vmatpush1.bf16.msra.mxu0 %v9573_v16 }
 0x140   : > { %3453 = vmatprep.subr.bf16.mxu0 %v9578_v17 }
 0x143   : > { %3454 = vmatpush1.bf16.msra.mxu0 %v9576_v18  ;;  %v9596_v18 = vld [vmem:[%s13259_s4 + $0x114] ss:$8 sps:$4 sm:$0xff]  }
 0x144   : > { %3455 = vmatprep.subr.bf16.mxu0 %v9581_v19 }
 0x145   : > { %7974 = vmatmul.mubr.msk.bf16.gmra.mrb[24].mxu0 %vm2010_vm0, %v9541_v20  ;;  %7982 = vmatmul.mubr.msk.bf16.gmra.mrb[24].mxu1 %vm2010_vm0, %v9541_v20 }
 0x146   : > { %2476 = vmatprep.mubr.bf16.mxu0 %v10360_v53  ;;  %2928 = vmatprep.mubr.bf16.mxu1 %v10360_v53 }
 0x147   : > { %3456 = vmatpush1.bf16.msra.mxu0 %v9579_v21 }
 0x148   : > { %3457 = vmatprep.subr.bf16.mxu0 %v9584_v22 }
 0x14b   : > { %3458 = vmatpush1.bf16.msra.mxu0 %v9582_v23 }
 0x14c   : > { %3459 = vmatprep.subr.bf16.mxu0 %v9587_v25 }
 0x14d   : > { %7975 = vmatmul.mubr.msk.bf16.gmra.mrb[28].mxu0 %vm2010_vm0, %v9542_v24  ;;  %7983 = vmatmul.mubr.msk.bf16.gmra.mrb[28].mxu1 %vm2010_vm0, %v9542_v24 }
 0x14e   : > { %4023 = vmatprep.mubr.bf16.mxu1 %v10360_v53 }
 0x14f   : > { %3460 = vmatpush1.bf16.msra.mxu0 %v9585_v26 }
 0x150   : > { %3461 = vmatprep.subr.bf16.mxu0 %v9590_v27  ;;  %v9645_v27 = vld [vmem:[%s13261_s6 + $0x40] ss:$16 sps:$4 sm:$0xff]  }
 0x151   : > { %3996 = vmatpush1.bf16.msra.mxu1 %v9645_v27 }
 0x152   : > { %3997 = vmatprep.subr.bf16.mxu1 %v9650_v34 }
 0x153   : > { %3462 = vmatpush1.bf16.msra.mxu0 %v9588_v28 }
 0x154   : > { %3544 = vmatprep.subr.bf16.mxu0 %v9593_v29 }
 0x1e8   : > { %v2408_v41 = vpop.f32.mrb[0].mxu0  ;;  %v2860_v42 = vpop.f32.mrb[0].mxu1 }
 0x1e9   : > { %v8609_v43 = vadd.f32 %v2408_v41, %v11283_v37  ;;  %v8641_v44 = vadd.f32 %v2860_v42, %v11286_v38  ;;  %v2410_v45 = vpop.f32.mrb[1].mxu0  ;;  %v2862_v46 = vpop.f32.mrb[1].mxu1 }
 0x1ea   : > { %v8610_v47 = vadd.f32 %v2410_v45, %v11289_v39  ;;  %v8642_v48 = vadd.f32 %v2862_v46, %v11292_v40  ;;  %v2412_v49 = vpop.f32.mrb[2].mxu0  ;;  %v2864_v50 = vpop.f32.mrb[2].mxu1  ;;  %v9599_v45 = vld [vmem:[%s13259_s4 + $0x124] ss:$8 sps:$4 sm:$0xff]  }
 0x1eb   : > { %v8611_v51 = vadd.f32 %v2412_v49, %v11283_v37  ;;  %v8643_v52 = vadd.f32 %v2864_v50, %v11286_v38  ;;  %v2414_v54 = vpop.f32.mrb[3].mxu0  ;;  %v2866_v55 = vpop.f32.mrb[3].mxu1  ;;  %v2939_v60 = vmax.f32 %v8609_v43, 0.0  ;;  %v2941_v61 = vmax.f32 %v8641_v44, 0.0 }
 0x1ec   : > { %v8612_v57 = vadd.f32 %v2414_v54, %v11289_v39  ;;  %v8644_v58 = vadd.f32 %v2866_v55, %v11292_v40  ;;  %v2940_v1 = vmax.f32 %v8610_v47, 0.0  ;;  %v2942_v2 = vmax.f32 %v8642_v48, 0.0 }
 0x1ed   : > { %v2943_v62 = vmax.f32 %v8611_v51, 0.0  ;;  %v2945_v63 = vmax.f32 %v8643_v52, 0.0  ;;  %v9648_v52 = vld [vmem:[%s13261_s6 + $0x60] ss:$16 sps:$4 sm:$0xff]  }
 0x1ee   : > { %v2944_v3 = vmax.f32 %v8612_v57, 0.0  ;;  %v2946_v4 = vmax.f32 %v8644_v58, 0.0  ;;  %v9597_v58 = vld [vmem:[%s13259_s4 + $0x120] ss:$8 sps:$4 sm:$0xff]   ;;  %3998 = vmatpush1.bf16.msra.mxu1 %v9648_v52 }
 0x1ef   : > { %v3003_v5 = vpack.c.bf16 %v2943_v62, %v2939_v60  ;;  %v11311_v6 = vpack.c.bf16 %v2945_v63, %v2941_v61  ;;  %3999 = vmatprep.subr.bf16.mxu1 %v9653_v59 }
 0x1f0   : > { %v3004_v8 = vpack.c.bf16 %v2944_v3, %v2940_v1  ;;  %v11316_v9 = vpack.c.bf16 %v2946_v4, %v2942_v2  ;;  %v2418_v10 = vpop.f32.mrb[4].mxu0  ;;  %v2870_v11 = vpop.f32.mrb[4].mxu1 }
 0x1f1   : > { %v8613_v14 = vadd.f32 %v2418_v10, %v11283_v37  ;;  %v8645_v15 = vadd.f32 %v2870_v11, %v11286_v38  ;;  %v2420_v16 = vpop.f32.mrb[5].mxu0  ;;  %v2872_v17 = vpop.f32.mrb[5].mxu1  ;;  %v9651_v11 = vld [vmem:[%s13261_s6 + $0x80] ss:$16 sps:$4 sm:$0xff]  }
 0x1f2   : > { %v8614_v19 = vadd.f32 %v2420_v16, %v11289_v39  ;;  %v8646_v20 = vadd.f32 %v2872_v17, %v11292_v40  ;;  %v2422_v21 = vpop.f32.mrb[6].mxu0  ;;  %v2874_v22 = vpop.f32.mrb[6].mxu1  ;;  %3463 = vmatprep.mubr.bf16.mxu0 %v3004_v8  ;;  %4000 = vmatpush1.bf16.msra.mxu1 %v9651_v11 }
 0x1f3   : > { %v8615_v23 = vadd.f32 %v2422_v21, %v11283_v37  ;;  %v8647_v24 = vadd.f32 %v2874_v22, %v11286_v38  ;;  %v2424_v25 = vpop.f32.mrb[7].mxu0  ;;  %v2876_v26 = vpop.f32.mrb[7].mxu1  ;;  %3464 = vmatmul.mubr.bf16.vlgmr.msra.gmra.mrb[32].mxu0 %v3003_v5  ;;  %v2947_v41 = vmax.f32 %v8613_v14, 0.0  ;;  %v2949_v42 = vmax.f32 %v8645_v15, 0.0  ;;  %v9600_v14 = vld [vmem:[%s13259_s4 + $0x130] ss:$8 sps:$4 sm:$0xff]  }
 0x1f4   : > { %v8616_v28 = vadd.f32 %v2424_v25, %v11289_v39  ;;  %v8648_v29 = vadd.f32 %v2876_v26, %v11292_v40  ;;  %3545 = vmatpush1.bf16.msra.mxu0 %v9591_v12  ;;  %v2948_v46 = vmax.f32 %v8614_v19, 0.0  ;;  %v2950_v47 = vmax.f32 %v8646_v20, 0.0  ;;  %v9605_v19 = vld [vmem:[%s13259_s4 + $0x144] ss:$8 sps:$4 sm:$0xff]  }
 0x1f5   : > { %v2951_v43 = vmax.f32 %v8615_v23, 0.0  ;;  %v2953_v44 = vmax.f32 %v8647_v24, 0.0  ;;  %3546 = vmatprep.subr.bf16.mxu0 %v9596_v18 }
 0x1f6   : > { %v2952_v48 = vmax.f32 %v8616_v28, 0.0  ;;  %v2954_v49 = vmax.f32 %v8648_v29, 0.0 }
 0x1f7   : > { %v3007_v50 = vpack.c.bf16 %v2951_v43, %v2947_v41  ;;  %v11347_v51 = vpack.c.bf16 %v2953_v44, %v2949_v42  ;;  %v9608_v44 = vld [vmem:[%s13259_s4 + $0x154] ss:$8 sps:$4 sm:$0xff]  }
 0x1f8   : > { %v3008_v54 = vpack.c.bf16 %v2952_v48, %v2948_v46  ;;  %v11352_v55 = vpack.c.bf16 %v2954_v49, %v2950_v47  ;;  %v2428_v56 = vpop.f32.mrb[8].mxu0  ;;  %v2880_v57 = vpop.f32.mrb[8].mxu1  ;;  %3547 = vmatpush1.bf16.msra.mxu0 %v9594_v30  ;;  %v9603_v30 = vld [vmem:[%s13259_s4 + $0x140] ss:$8 sps:$4 sm:$0xff]  }
 0x1f9   : > { %v8617_v60 = vadd.f32 %v2428_v56, %v11283_v37  ;;  %v8649_v61 = vadd.f32 %v2880_v57, %v11286_v38  ;;  %v2430_v62 = vpop.f32.mrb[9].mxu0  ;;  %v2882_v63 = vpop.f32.mrb[9].mxu1  ;;  %3548 = vmatprep.subr.bf16.mxu0 %v9599_v45 }
 0x1fa   : > { %v8618_v1 = vadd.f32 %v2430_v62, %v11289_v39  ;;  %v8650_v2 = vadd.f32 %v2882_v63, %v11292_v40  ;;  %v2432_v3 = vpop.f32.mrb[10].mxu0  ;;  %v2884_v4 = vpop.f32.mrb[10].mxu1  ;;  %3473 = vmatprep.mubr.bf16.mxu0 %v3008_v54  ;;  %v9611_v63 = vld [vmem:[%s13259_s4 + $0x164] ss:$8 sps:$4 sm:$0xff]  }
 0x1fb   : > { %v8619_v5 = vadd.f32 %v2432_v3, %v11283_v37  ;;  %v8651_v7 = vadd.f32 %v2884_v4, %v11286_v38  ;;  %v2434_v8 = vpop.f32.mrb[11].mxu0  ;;  %v2886_v10 = vpop.f32.mrb[11].mxu1  ;;  %3474 = vmatmul.mubr.bf16.gmra.mrb[36].mxu0 %v3007_v50  ;;  %v2955_v15 = vmax.f32 %v8617_v60, 0.0  ;;  %v2957_v16 = vmax.f32 %v8649_v61, 0.0 }
 0x1fc   : > { %v8620_v12 = vadd.f32 %v2434_v8, %v11289_v39  ;;  %v8652_v13 = vadd.f32 %v2886_v10, %v11292_v40  ;;  %3549 = vmatpush1.bf16.msra.mxu0 %v9597_v58  ;;  %v2956_v20 = vmax.f32 %v8618_v1, 0.0  ;;  %v2958_v21 = vmax.f32 %v8650_v2, 0.0  ;;  %v9606_v58 = vld [vmem:[%s13259_s4 + $0x150] ss:$8 sps:$4 sm:$0xff]  }
 0x1fd   : > { %v2959_v17 = vmax.f32 %v8619_v5, 0.0  ;;  %v2961_v18 = vmax.f32 %v8651_v7, 0.0  ;;  %3550 = vmatprep.subr.bf16.mxu0 %v9602_v0 }
 0x1fe   : > { %v2960_v22 = vmax.f32 %v8620_v12, 0.0  ;;  %v2962_v23 = vmax.f32 %v8652_v13, 0.0  ;;  %v9609_v12 = vld [vmem:[%s13259_s4 + $0x160] ss:$8 sps:$4 sm:$0xff]  }
 0x1ff   : > { %v3011_v24 = vpack.c.bf16 %v2959_v17, %v2955_v15  ;;  %v11380_v25 = vpack.c.bf16 %v2961_v18, %v2957_v16  ;;  %v9614_v17 = vld [vmem:[%s13259_s4 + $0x174] ss:$8 sps:$4 sm:$0xff]  }
 0x200   : > { %v3012_v26 = vpack.c.bf16 %v2960_v22, %v2956_v20  ;;  %v11382_v27 = vpack.c.bf16 %v2962_v23, %v2958_v21  ;;  %v2438_v28 = vpop.f32.mrb[12].mxu0  ;;  %v2890_v29 = vpop.f32.mrb[12].mxu1  ;;  %3551 = vmatpush1.bf16.msra.mxu0 %v9600_v14 }
 0x201   : > { %v8621_v34 = vadd.f32 %v2438_v28, %v11283_v37  ;;  %v8653_v41 = vadd.f32 %v2890_v29, %v11286_v38  ;;  %v2440_v42 = vpop.f32.mrb[13].mxu0  ;;  %v2892_v43 = vpop.f32.mrb[13].mxu1  ;;  %3552 = vmatprep.subr.bf16.mxu0 %v9605_v19 }
 0x202   : > { %v8622_v45 = vadd.f32 %v2440_v42, %v11289_v39  ;;  %v8654_v46 = vadd.f32 %v2892_v43, %v11292_v40  ;;  %v2442_v47 = vpop.f32.mrb[14].mxu0  ;;  %v2894_v48 = vpop.f32.mrb[14].mxu1  ;;  %3483 = vmatprep.mubr.bf16.mxu0 %v3012_v26 }
 0x203   : > { %v8623_v49 = vadd.f32 %v2442_v47, %v11283_v37  ;;  %v8655_v50 = vadd.f32 %v2894_v48, %v11286_v38  ;;  %v2444_v52 = vpop.f32.mrb[15].mxu0  ;;  %v2896_v54 = vpop.f32.mrb[15].mxu1  ;;  %3484 = vmatmul.mubr.bf16.gmra.mrb[40].mxu0 %v3011_v24  ;;  %v2963_v59 = vmax.f32 %v8621_v34, 0.0  ;;  %v2965_v60 = vmax.f32 %v8653_v41, 0.0 }
 0x204   : > { %v8624_v56 = vadd.f32 %v2444_v52, %v11289_v39  ;;  %v8656_v57 = vadd.f32 %v2896_v54, %v11292_v40  ;;  %3553 = vmatpush1.bf16.msra.mxu0 %v9603_v30  ;;  %v2964_v0 = vmax.f32 %v8622_v45, 0.0  ;;  %v2966_v1 = vmax.f32 %v8654_v46, 0.0  ;;  %v9612_v30 = vld [vmem:[%s13259_s4 + $0x170] ss:$8 sps:$4 sm:$0xff]  }
 0x205   : > { %v2967_v61 = vmax.f32 %v8623_v49, 0.0  ;;  %v2969_v62 = vmax.f32 %v8655_v50, 0.0  ;;  %3554 = vmatprep.subr.bf16.mxu0 %v9608_v44  ;;  %v9617_v44 = vld [vmem:[%s13259_s4 + $0x184] ss:$8 sps:$4 sm:$0xff]  }
 0x206   : > { %v2968_v2 = vmax.f32 %v8624_v56, 0.0  ;;  %v2970_v3 = vmax.f32 %v8656_v57, 0.0 }
 0x207   : > { %v3015_v4 = vpack.c.bf16 %v2967_v61, %v2963_v59  ;;  %v11404_v5 = vpack.c.bf16 %v2969_v62, %v2965_v60 }
 0x208   : > { %v3016_v7 = vpack.c.bf16 %v2968_v2, %v2964_v0  ;;  %v11406_v8 = vpack.c.bf16 %v2970_v3, %v2966_v1  ;;  %v2448_v10 = vpop.f32.mrb[16].mxu0  ;;  %v2900_v11 = vpop.f32.mrb[16].mxu1  ;;  %3555 = vmatpush1.bf16.msra.mxu0 %v9606_v58  ;;  %v9615_v58 = vld [vmem:[%s13259_s4 + $0x180] ss:$8 sps:$4 sm:$0xff]  }
 0x209   : > { %v8625_v13 = vadd.f32 %v2448_v10, %v11283_v37  ;;  %v8657_v14 = vadd.f32 %v2900_v11, %v11286_v38  ;;  %v2450_v15 = vpop.f32.mrb[17].mxu0  ;;  %v2902_v16 = vpop.f32.mrb[17].mxu1  ;;  %3556 = vmatprep.subr.bf16.mxu0 %v9611_v63  ;;  %v9620_v63 = vld [vmem:[%s13259_s4 + $0x194] ss:$8 sps:$4 sm:$0xff]  }
 0x20a   : > { %v8626_v18 = vadd.f32 %v2450_v15, %v11289_v39  ;;  %v8658_v19 = vadd.f32 %v2902_v16, %v11292_v40  ;;  %v2452_v20 = vpop.f32.mrb[18].mxu0  ;;  %v2904_v21 = vpop.f32.mrb[18].mxu1  ;;  %3493 = vmatprep.mubr.bf16.mxu0 %v3016_v7 }
 0x20b   : > { %v8627_v22 = vadd.f32 %v2452_v20, %v11283_v37  ;;  %v8659_v23 = vadd.f32 %v2904_v21, %v11286_v38  ;;  %v2454_v24 = vpop.f32.mrb[19].mxu0  ;;  %v2906_v26 = vpop.f32.mrb[19].mxu1  ;;  %3494 = vmatmul.mubr.bf16.gmra.mrb[44].mxu0 %v3015_v4  ;;  %v2971_v34 = vmax.f32 %v8625_v13, 0.0  ;;  %v2973_v41 = vmax.f32 %v8657_v14, 0.0  ;;  %v9618_v14 = vld [vmem:[%s13259_s4 + $0x190] ss:$8 sps:$4 sm:$0xff]  }
 0x20c   : > { %v8628_v28 = vadd.f32 %v2454_v24, %v11289_v39  ;;  %v8660_v29 = vadd.f32 %v2906_v26, %v11292_v40  ;;  %3557 = vmatpush1.bf16.msra.mxu0 %v9609_v12  ;;  %v2972_v45 = vmax.f32 %v8626_v18, 0.0  ;;  %v2974_v46 = vmax.f32 %v8658_v19, 0.0  ;;  %v9623_v19 = vld [vmem:[%s13259_s4 + $0x1a4] ss:$8 sps:$4 sm:$0xff]  }
 0x20d   : > { %v2975_v42 = vmax.f32 %v8627_v22, 0.0  ;;  %v2977_v43 = vmax.f32 %v8659_v23, 0.0  ;;  %3558 = vmatprep.subr.bf16.mxu0 %v9614_v17 }
 0x20e   : > { %v2976_v47 = vmax.f32 %v8628_v28, 0.0  ;;  %v2978_v48 = vmax.f32 %v8660_v29, 0.0 }
 0x20f   : > { %v3019_v49 = vpack.c.bf16 %v2975_v42, %v2971_v34  ;;  %v11428_v50 = vpack.c.bf16 %v2977_v43, %v2973_v41  ;;  %v9621_v41 = vld [vmem:[%s13259_s4 + $0x1a0] ss:$8 sps:$4 sm:$0xff]  }
 0x210   : > { %v3020_v52 = vpack.c.bf16 %v2976_v47, %v2972_v45  ;;  %v11430_v54 = vpack.c.bf16 %v2978_v48, %v2974_v46  ;;  %v2458_v56 = vpop.f32.mrb[20].mxu0  ;;  %v2910_v57 = vpop.f32.mrb[20].mxu1  ;;  %3559 = vmatpush1.bf16.msra.mxu0 %v9612_v30  ;;  %v9626_v46 = vld [vmem:[%s13259_s4 + $0x1b4] ss:$8 sps:$4 sm:$0xff]  }
 0x211   : > { %v8629_v59 = vadd.f32 %v2458_v56, %v11283_v37  ;;  %v8661_v60 = vadd.f32 %v2910_v57, %v11286_v38  ;;  %v2460_v61 = vpop.f32.mrb[21].mxu0  ;;  %v2912_v62 = vpop.f32.mrb[21].mxu1  ;;  %3560 = vmatprep.subr.bf16.mxu0 %v9617_v44 }
 0x212   : > { %v8630_v0 = vadd.f32 %v2460_v61, %v11289_v39  ;;  %v8662_v1 = vadd.f32 %v2912_v62, %v11292_v40  ;;  %v2462_v2 = vpop.f32.mrb[22].mxu0  ;;  %v2914_v3 = vpop.f32.mrb[22].mxu1  ;;  %3503 = vmatprep.mubr.bf16.mxu0 %v3020_v52  ;;  %v9624_v62 = vld [vmem:[%s13259_s4 + $0x1b0] ss:$8 sps:$4 sm:$0xff]  }
 0x213   : > { %v8631_v4 = vadd.f32 %v2462_v2, %v11283_v37  ;;  %v8663_v7 = vadd.f32 %v2914_v3, %v11286_v38  ;;  %v2464_v10 = vpop.f32.mrb[23].mxu0  ;;  %v2916_v11 = vpop.f32.mrb[23].mxu1  ;;  %3504 = vmatmul.mubr.bf16.gmra.mrb[48].mxu0 %v3019_v49  ;;  %v2979_v15 = vmax.f32 %v8629_v59, 0.0  ;;  %v2981_v16 = vmax.f32 %v8661_v60, 0.0  ;;  %v9629_v3 = vld [vmem:[%s13259_s4 + $0x1c4] ss:$8 sps:$4 sm:$0xff]  }
 0x214   : > { %v8632_v12 = vadd.f32 %v2464_v10, %v11289_v39  ;;  %v8664_v13 = vadd.f32 %v2916_v11, %v11292_v40  ;;  %3561 = vmatpush1.bf16.msra.mxu0 %v9615_v58  ;;  %v2980_v20 = vmax.f32 %v8630_v0, 0.0  ;;  %v2982_v21 = vmax.f32 %v8662_v1, 0.0 }
 0x215   : > { %v2983_v17 = vmax.f32 %v8631_v4, 0.0  ;;  %v2985_v18 = vmax.f32 %v8663_v7, 0.0  ;;  %3562 = vmatprep.subr.bf16.mxu0 %v9620_v63 }
 0x216   : > { %v2984_v22 = vmax.f32 %v8632_v12, 0.0  ;;  %v2986_v23 = vmax.f32 %v8664_v13, 0.0 }
 0x217   : > { %v3023_v24 = vpack.c.bf16 %v2983_v17, %v2979_v15  ;;  %v11452_v26 = vpack.c.bf16 %v2985_v18, %v2981_v16  ;;  %v9627_v18 = vld [vmem:[%s13259_s4 + $0x1c0] ss:$8 sps:$4 sm:$0xff]  }
 0x218   : > { %v3024_v28 = vpack.c.bf16 %v2984_v22, %v2980_v20  ;;  %v11454_v29 = vpack.c.bf16 %v2986_v23, %v2982_v21  ;;  %v2468_v30 = vpop.f32.mrb[24].mxu0  ;;  %v2920_v34 = vpop.f32.mrb[24].mxu1  ;;  %3563 = vmatpush1.bf16.msra.mxu0 %v9618_v14  ;;  %v9632_v23 = vld [vmem:[%s13259_s4 + $0x1d4] ss:$8 sps:$4 sm:$0xff]  }
 0x219   : > { %v8633_v42 = vadd.f32 %v2468_v30, %v11283_v37  ;;  %v8665_v43 = vadd.f32 %v2920_v34, %v11286_v38  ;;  %v2470_v44 = vpop.f32.mrb[25].mxu0  ;;  %v2922_v45 = vpop.f32.mrb[25].mxu1  ;;  %3564 = vmatprep.subr.bf16.mxu0 %v9623_v19 }
 0x21a   : > { %v8634_v47 = vadd.f32 %v2470_v44, %v11289_v39  ;;  %v8666_v48 = vadd.f32 %v2922_v45, %v11292_v40  ;;  %v2472_v49 = vpop.f32.mrb[26].mxu0  ;;  %v2924_v52 = vpop.f32.mrb[26].mxu1  ;;  %3513 = vmatprep.mubr.bf16.mxu0 %v3024_v28 }
 0x21b   : > { %v8635_v56 = vadd.f32 %v2472_v49, %v11283_v37  ;;  %v8667_v57 = vadd.f32 %v2924_v52, %v11286_v38  ;;  %v2474_v58 = vpop.f32.mrb[27].mxu0  ;;  %v2926_v59 = vpop.f32.mrb[27].mxu1  ;;  %3514 = vmatmul.mubr.bf16.gmra.mrb[52].mxu0 %v3023_v24  ;;  %v2987_v63 = vmax.f32 %v8633_v42, 0.0  ;;  %v2989_v0 = vmax.f32 %v8665_v43, 0.0 }
 0x21c   : > { %v8636_v60 = vadd.f32 %v2474_v58, %v11289_v39  ;;  %v8668_v61 = vadd.f32 %v2926_v59, %v11292_v40  ;;  %3565 = vmatpush1.bf16.msra.mxu0 %v9621_v41  ;;  %v2988_v4 = vmax.f32 %v8634_v47, 0.0  ;;  %v2990_v7 = vmax.f32 %v8666_v48, 0.0  ;;  %v9630_v47 = vld [vmem:[%s13259_s4 + $0x1d0] ss:$8 sps:$4 sm:$0xff]  }
 0x21d   : > { %v2991_v1 = vmax.f32 %v8635_v56, 0.0  ;;  %v2993_v2 = vmax.f32 %v8667_v57, 0.0  ;;  %3566 = vmatprep.subr.bf16.mxu0 %v9626_v46 }
 0x21e   : > { %v2992_v10 = vmax.f32 %v8636_v60, 0.0  ;;  %v2994_v11 = vmax.f32 %v8668_v61, 0.0 }
 0x21f   : > { %v3027_v12 = vpack.c.bf16 %v2991_v1, %v2987_v63  ;;  %v11476_v13 = vpack.c.bf16 %v2993_v2, %v2989_v0  ;;  %v9638_v63 = vld [vmem:[%s13259_s4 + $0x1f4] ss:$8 sps:$4 sm:$0xff]   ;;  %v9636_v0 = vld [vmem:[%s13259_s4 + $0x1f0] ss:$8 sps:$4 sm:$0xff]  }
 0x220   : > { %v3028_v14 = vpack.c.bf16 %v2992_v10, %v2988_v4  ;;  %v3030_v15 = vpack.c.bf16 %v2994_v11, %v2990_v7  ;;  %v2478_v16 = vpop.f32.mrb[28].mxu0  ;;  %v2930_v17 = vpop.f32.mrb[28].mxu1  ;;  %3567 = vmatpush1.bf16.msra.mxu0 %v9624_v62  ;;  %v9633_v62 = vld [vmem:[%s13259_s4 + $0x1e0] ss:$8 sps:$4 sm:$0xff]  }
 0x221   : > { %v8637_v19 = vadd.f32 %v2478_v16, %v11283_v37  ;;  %v8669_v20 = vadd.f32 %v2930_v17, %v11286_v38  ;;  %v2480_v21 = vpop.f32.mrb[29].mxu0  ;;  %v2932_v22 = vpop.f32.mrb[29].mxu1  ;;  %3568 = vmatprep.subr.bf16.mxu0 %v9629_v3 }
 0x222   : > { %v8638_v24 = vadd.f32 %v2480_v21, %v11289_v39  ;;  %v8670_v28 = vadd.f32 %v2932_v22, %v11292_v40  ;;  %v2482_v30 = vpop.f32.mrb[30].mxu0  ;;  %v2934_v34 = vpop.f32.mrb[30].mxu1  ;;  %3523 = vmatprep.mubr.bf16.mxu0 %v3028_v14  ;;  %v8443_v22 = vld [vmem:[%s11573_s23] sm:$0xff]  }
 0x223   : > { %v8639_v41 = vadd.f32 %v2482_v30, %v11283_v37  ;;  %v8671_v42 = vadd.f32 %v2934_v34, %v11286_v38  ;;  %v2484_v43 = vpop.f32.mrb[31].mxu0  ;;  %v2936_v44 = vpop.f32.mrb[31].mxu1  ;;  %3524 = vmatmul.mubr.bf16.gmra.mrb[56].mxu0 %v3027_v12  ;;  %v2995_v48 = vmax.f32 %v8637_v19, 0.0  ;;  %v2997_v49 = vmax.f32 %v8669_v20, 0.0  ;;  %v9635_v37 = vld [vmem:[%s13259_s4 + $0x1e4] ss:$8 sps:$4 sm:$0xff]  }
 0x224   : > { %v8640_v45 = vadd.f32 %v2484_v43, %v11289_v39  ;;  %v8672_v46 = vadd.f32 %v2936_v44, %v11292_v40  ;;  %3569 = vmatpush1.bf16.msra.mxu0 %v9627_v18  ;;  %v2996_v38 = vmax.f32 %v8638_v24, 0.0  ;;  %v2998_v57 = vmax.f32 %v8670_v28, 0.0 }
 0x225   : > { %v2999_v52 = vmax.f32 %v8639_v41, 0.0  ;;  %v3001_v56 = vmax.f32 %v8671_v42, 0.0  ;;  %3570 = vmatprep.subr.bf16.mxu0 %v9632_v23  ;;  %v8444_v34 = vunpack.c.l.bf16 %v8443_v22  ;;  %v8445_v43 = vunpack.c.h.bf16 %v8443_v22 }
 0x226   : > { %v3000_v58 = vmax.f32 %v8640_v45, 0.0  ;;  %v3002_v39 = vmax.f32 %v8672_v46, 0.0 }
 0x227   : > { %v3031_v59 = vpack.c.bf16 %v2999_v52, %v2995_v48  ;;  %v3033_v40 = vpack.c.bf16 %v3001_v56, %v2997_v49 }
 0x228   : > { %v3032_v60 = vpack.c.bf16 %v3000_v58, %v2996_v38  ;;  %v3034_v61 = vpack.c.bf16 %v3002_v39, %v2998_v57  ;;  %3571 = vmatpush1.bf16.msra.mxu0 %v9630_v47  ;;  %v9689_v38 = vld [vmem:[%s13263_s8 + $0x4] ss:$28 sps:$4 sm:$0xff]  }
 0x229   : > { %3572 = vmatprep.subr.bf16.mxu0 %v9635_v37  ;;  %v9687_v37 = vld [vmem:[%s13263_s8] ss:$28 sps:$4 sm:$0xff]  }
 0x22a   : > { %3533 = vmatprep.mubr.bf16.mxu0 %v3032_v60 }
 0x22b   : > { %3534 = vmatmul.mubr.bf16.gmra.mrb[60].mxu0 %v3031_v59  ;;  %v8474_v59 = vld [vmem:[%s11573_s23 + $0x8] sm:$0xff]  }
 0x22c   : > { %3573 = vmatpush1.bf16.msra.mxu0 %v9633_v62  ;;  %3576 = vmatprep.mubr.bf16.mxu0 %v11316_v9  ;;  %v9654_v9 = vld [vmem:[%s13261_s6 + $0xa0] ss:$16 sps:$4 sm:$0xff]  }
 0x22d   : > { %3574 = vmatprep.subr.bf16.mxu0 %v9638_v63 }
 0x230   : > { %3575 = vmatpush1.bf16.msra.mxu0 %v9636_v0  ;;  %v9693_v0 = vld [vmem:[%s13263_s8 + $0x38] ss:$28 sps:$4 sm:$0xff]  }
 0x231   : > { %5758 = vmatprep.subr.bf16.mxu0 %v9689_v38 }
 0x233   : > { %3577 = vmatmul.mubr.bf16.vlgmr.msra.gmra.mrb[32].mxu0 %v11311_v6  ;;  %v9656_v6 = vld [vmem:[%s13261_s6 + $0xa4] ss:$16 sps:$4 sm:$0xff]  }
 0x234   : > { %3586 = vmatprep.mubr.bf16.mxu0 %v11352_v55  ;;  %4001 = vmatprep.subr.bf16.mxu1 %v9656_v6  ;;  %v9657_v55 = vld [vmem:[%s13261_s6 + $0xc0] ss:$16 sps:$4 sm:$0xff]  }
 0x235   : > { %4002 = vmatpush1.bf16.msra.mxu1 %v9654_v9  ;;  %5759 = vmatpush1.bf16.msra.mxu0 %v9687_v37  ;;  %v8448_v9 = vunpack.c.l.bf16 %v8474_v59 }
 0x23b   : > { %3587 = vmatmul.mubr.bf16.gmra.mrb[36].mxu0 %v11347_v51  ;;  %v9659_v51 = vld [vmem:[%s13261_s6 + $0xc4] ss:$16 sps:$4 sm:$0xff]  }
 0x23c   : > { %3596 = vmatprep.mubr.bf16.mxu0 %v11382_v27  ;;  %4003 = vmatprep.subr.bf16.mxu1 %v9659_v51  ;;  %v9660_v27 = vld [vmem:[%s13261_s6 + $0xe0] ss:$16 sps:$4 sm:$0xff]  }
 0x23d   : > { %4004 = vmatpush1.bf16.msra.mxu1 %v9657_v55  ;;  %v9701_v51 = vld [vmem:[%s13263_s8 + $0x74] ss:$28 sps:$4 sm:$0xff]  }
 0x243   : > { %3597 = vmatmul.mubr.bf16.gmra.mrb[40].mxu0 %v11380_v25  ;;  %v9662_v25 = vld [vmem:[%s13261_s6 + $0xe4] ss:$16 sps:$4 sm:$0xff]  }
 0x244   : > { %3606 = vmatprep.mubr.bf16.mxu0 %v11406_v8  ;;  %4005 = vmatprep.subr.bf16.mxu1 %v9662_v25  ;;  %v3099_v8 = vld [vmem:[%s13260_s5] sm:$0x3] }
 0x245   : > { %4006 = vmatpush1.bf16.msra.mxu1 %v9660_v27  ;;  %v9663_v27 = vld [vmem:[%s13261_s6 + $0x8] ss:$16 sps:$4 sm:$0xff]  }
 0x24b   : > { %3607 = vmatmul.mubr.bf16.gmra.mrb[44].mxu0 %v11404_v5  ;;  %v9665_v5 = vld [vmem:[%s13261_s6 + $0xc] ss:$16 sps:$4 sm:$0xff]  }
 0x24c   : > { %3616 = vmatprep.mubr.bf16.mxu0 %v11430_v54  ;;  %4104 = vmatprep.subr.bf16.mxu1 %v9665_v5  ;;  %v11552_v54 = vrot.slane %v3099_v8, %v11277_v35 }
 0x253   : > { %3617 = vmatmul.mubr.bf16.gmra.mrb[48].mxu0 %v11428_v50  ;;  %v11549_v50 = vrot.slane %v3099_v8, %v11268_v32 }
 0x254   : > { %3626 = vmatprep.mubr.bf16.mxu0 %v11454_v29 }
 0x25b   : > { %3627 = vmatmul.mubr.bf16.gmra.mrb[52].mxu0 %v11452_v26 }
 0x25c   : > { %3636 = vmatprep.mubr.bf16.mxu0 %v3030_v15 }
 0x263   : > { %3637 = vmatmul.mubr.bf16.gmra.mrb[56].mxu0 %v11476_v13 }
 0x264   : > { %3646 = vmatprep.mubr.bf16.mxu0 %v3034_v61  ;;  %v9695_v61 = vld [vmem:[%s13263_s8 + $0x3c] ss:$28 sps:$4 sm:$0xff]  }
 0x265   : > { %5760 = vmatprep.subr.bf16.mxu0 %v9695_v61 }
 0x266   : > { %5761 = vmatpush1.bf16.msra.mxu0 %v9693_v0  ;;  %v9672_v0 = vld [vmem:[%s13261_s6 + $0x68] ss:$16 sps:$4 sm:$0xff]  }
 0x267   : > { %5762 = vmatprep.subr.bf16.mxu0 %v9701_v51  ;;  %v9677_v51 = vld [vmem:[%s13261_s6 + $0x8c] ss:$16 sps:$4 sm:$0xff]  }
 0x26b   : > { %3647 = vmatmul.mubr.bf16.gmra.mrb[60].mxu0 %v3033_v40 }
 0x306   : > { %v3578_v26 = vpop.f32.mrb[32].mxu0 }
 0x307   : > { %v8673_v29 = vadd.f32 %v3578_v26, %v11549_v50  ;;  %v3580_v1 = vpop.f32.mrb[33].mxu0 }
 0x308   : > { %v8674_v2 = vadd.f32 %v3580_v1, %v11552_v54  ;;  %v3582_v3 = vpop.f32.mrb[34].mxu0  ;;  %v9668_v1 = vld [vmem:[%s13261_s6 + $0x2c] ss:$16 sps:$4 sm:$0xff]  }
 0x309   : > { %7495 = vst [vmem:[%s11556_s26] sm:$0xff] %v8673_v29  ;;  %v11560_v4 = vadd.f32 %v3582_v3, %v11549_v50  ;;  %v3584_v7 = vpop.f32.mrb[35].mxu0 }
 0x30a   : > { %v3657_v10 = vmul.f32 0.5, %v8674_v2  ;;  %7511 = vst [vmem:[%s11562_s27] sm:$0xff] %v8674_v2  ;;  %v8676_v11 = vadd.f32 %v3584_v7, %v11552_v54  ;;  %v9699_v7 = vld [vmem:[%s13263_s8 + $0x70] ss:$28 sps:$4 sm:$0xff]  }
 0x30b   : > { %7496 = vst [vmem:[%s11556_s26 + $0x8] sm:$0xff] %v11560_v4  ;;  %5763 = vmatpush1.bf16.msra.mxu0 %v9699_v7 }
 0x30c   : > { %v3673_v12 = vmul.f32 1.442695, %v3657_v10  ;;  %v3658_v13 = vmul.f32 0.5, %v8676_v11  ;;  %7512 = vst [vmem:[%s11562_s27 + $0x8] sm:$0xff] %v8676_v11 }
 0x30e   : > { %10007 = vpow2.f32 %v3673_v12  ;;  %v3675_v14 = vmul.f32 1.442695, %v3658_v13  ;;  %v3588_v15 = vpop.f32.mrb[36].mxu0  ;;  %v9707_v13 = vld [vmem:[%s13263_s8 + $0xac] ss:$28 sps:$4 sm:$0xff]  }
 0x30f   : > { %v11576_v16 = vadd.f32 %v3588_v15, %v11549_v50  ;;  %v3590_v17 = vpop.f32.mrb[37].mxu0  ;;  %5764 = vmatprep.subr.bf16.mxu0 %v9707_v13 }
 0x310   : > { %10009 = vpow2.f32 %v3675_v14  ;;  %v8678_v18 = vadd.f32 %v3590_v17, %v11552_v54  ;;  %v3592_v19 = vpop.f32.mrb[38].mxu0 }
 0x311   : > { %7497 = vst [vmem:[%s11556_s26 + $0x10] sm:$0xff] %v11576_v16  ;;  %v11582_v20 = vadd.f32 %v3592_v19, %v11549_v50  ;;  %v3594_v21 = vpop.f32.mrb[39].mxu0  ;;  %v8475_v19 = vld [vmem:[%s11573_s23 + $0x10] sm:$0xff]  }
 0x312   : > { %v3659_v23 = vmul.f32 0.5, %v8678_v18  ;;  %7513 = vst [vmem:[%s11562_s27 + $0x10] sm:$0xff] %v8678_v18  ;;  %v8680_v24 = vadd.f32 %v3594_v21, %v11552_v54  ;;  %v9666_v18 = vld [vmem:[%s13261_s6 + $0x28] ss:$16 sps:$4 sm:$0xff]  }
 0x313   : > { %7498 = vst [vmem:[%s11556_s26 + $0x18] sm:$0xff] %v11582_v20 }
 0x314   : > { %v3677_v28 = vmul.f32 1.442695, %v3659_v23  ;;  %v3660_v30 = vmul.f32 0.5, %v8680_v24  ;;  %7514 = vst [vmem:[%s11562_s27 + $0x18] sm:$0xff] %v8680_v24  ;;  %v9671_v23 = vld [vmem:[%s13261_s6 + $0x4c] ss:$16 sps:$4 sm:$0xff]  }
 0x316   : > { %10011 = vpow2.f32 %v3677_v28  ;;  %v3679_v41 = vmul.f32 1.442695, %v3660_v30  ;;  %v3598_v42 = vpop.f32.mrb[40].mxu0  ;;  %v9705_v30 = vld [vmem:[%s13263_s8 + $0xa8] ss:$28 sps:$4 sm:$0xff]  }
 0x317   : > { %v11591_v44 = vadd.f32 %v3598_v42, %v11549_v50  ;;  %v3600_v45 = vpop.f32.mrb[41].mxu0  ;;  %5765 = vmatpush1.bf16.msra.mxu0 %v9705_v30  ;;  %v8477_v30 = vld [vmem:[%s11573_s23 + $0x20] sm:$0xff]  }
 0x318   : > { %v10008_v46 = vpop.eup %10007  ;;  %10013 = vpow2.f32 %v3679_v41  ;;  %v8682_v47 = vadd.f32 %v3600_v45, %v11552_v54  ;;  %v3602_v48 = vpop.f32.mrb[42].mxu0  ;;  %v8452_v41 = vunpack.c.l.bf16 %v8475_v19  ;;  %v9669_v45 = vld [vmem:[%s13261_s6 + $0x48] ss:$16 sps:$4 sm:$0xff]  }
 0x319   : > { %v3737_v49 = vmul.f32 %v10008_v46, %v8444_v34  ;;  %7499 = vst [vmem:[%s11556_s26 + $0x20] sm:$0xff] %v11591_v44  ;;  %v11597_v52 = vadd.f32 %v3602_v48, %v11549_v50  ;;  %v3604_v56 = vpop.f32.mrb[43].mxu0  ;;  %v8453_v48 = vunpack.c.h.bf16 %v8475_v19 }
 0x31a   : > { %v10010_v57 = vpop.eup %10009  ;;  %v3661_v58 = vmul.f32 0.5, %v8682_v47  ;;  %7515 = vst [vmem:[%s11562_s27 + $0x20] sm:$0xff] %v8682_v47  ;;  %v8684_v39 = vadd.f32 %v3604_v56, %v11552_v54 }
 0x31b   : > { %v3738_v40 = vmul.f32 %v10010_v57, %v8445_v43  ;;  %7500 = vst [vmem:[%s11556_s26 + $0x28] sm:$0xff] %v11597_v52  ;;  %v3753_v60 = vadd.f32 %v8673_v29, %v3737_v49  ;;  %v8449_v29 = vunpack.c.h.bf16 %v8474_v59  ;;  %v9674_v49 = vld [vmem:[%s13261_s6 + $0x6c] ss:$16 sps:$4 sm:$0xff]  }
 0x31c   : > { %v3681_v62 = vmul.f32 1.442695, %v3661_v58  ;;  %v3662_v63 = vmul.f32 0.5, %v8684_v39  ;;  %7516 = vst [vmem:[%s11562_s27 + $0x28] sm:$0xff] %v8684_v39  ;;  %v9711_v57 = vld [vmem:[%s13263_s8 + $0xe0] ss:$28 sps:$4 sm:$0xff]  }
 0x31d   : > { %v3754_v6 = vadd.f32 %v11560_v4, %v3738_v40  ;;  %v9719_v40 = vld [vmem:[%s13263_s8 + $0x11c] ss:$28 sps:$4 sm:$0xff]  }
 0x31e   : > { %10015 = vpow2.f32 %v3681_v62  ;;  %v3683_v55 = vmul.f32 1.442695, %v3662_v63  ;;  %v3608_v25 = vpop.f32.mrb[44].mxu0  ;;  %v8476_v63 = vld [vmem:[%s11573_s23 + $0x18] sm:$0xff]  }
 0x31f   : > { %v11625_v5 = vadd.f32 %v3608_v25, %v11549_v50  ;;  %v3610_v8 = vpop.f32.mrb[45].mxu0  ;;  %v11627_v26 = vpack.c.bf16 %v3754_v6, %v3753_v60 }
 0x320   : > { %v10012_v2 = vpop.eup %10011  ;;  %10017 = vpow2.f32 %v3683_v55  ;;  %v8686_v3 = vadd.f32 %v3610_v8, %v11552_v54  ;;  %v3612_v4 = vpop.f32.mrb[46].mxu0 }
 0x321   : > { %7501 = vst [vmem:[%s11556_s26 + $0x30] sm:$0xff] %v11625_v5  ;;  %v11639_v10 = vadd.f32 %v3612_v4, %v11549_v50  ;;  %v3614_v11 = vpop.f32.mrb[47].mxu0  ;;  %4024 = vmatmul.mubr.bf16.vlgmr.msra.gmra.mrb[32].mxu1 %v11627_v26  ;;  %v3739_v12 = vmul.f32 %v10012_v2, %v8448_v9 }
 0x322   : > { %v10014_v14 = vpop.eup %10013  ;;  %v3663_v15 = vmul.f32 0.5, %v8686_v3  ;;  %7517 = vst [vmem:[%s11562_s27 + $0x30] sm:$0xff] %v8686_v3  ;;  %v8688_v17 = vadd.f32 %v3614_v11, %v11552_v54  ;;  %4105 = vmatpush1.bf16.msra.mxu1 %v9663_v27  ;;  %4033 = vmatprep.mubr.bf16.mxu1 %v10360_v53  ;;  %v9717_v27 = vld [vmem:[%s13263_s8 + $0x118] ss:$28 sps:$4 sm:$0xff]   ;;  %v8457_v11 = vunpack.c.h.bf16 %v8476_v63 }
 0x323   : > { %7502 = vst [vmem:[%s11556_s26 + $0x38] sm:$0xff] %v11639_v10  ;;  %v3740_v21 = vmul.f32 %v10014_v14, %v8449_v29  ;;  %v3755_v22 = vadd.f32 %v11576_v16, %v3739_v12  ;;  %4106 = vmatprep.subr.bf16.mxu1 %v9668_v1  ;;  %v9713_v16 = vld [vmem:[%s13263_s8 + $0xe4] ss:$28 sps:$4 sm:$0xff]   ;;  %v8456_v29 = vunpack.c.l.bf16 %v8476_v63  ;;  %v9675_v3 = vld [vmem:[%s13261_s6 + $0x88] ss:$16 sps:$4 sm:$0xff]  }
 0x324   : > { %v3685_v24 = vmul.f32 1.442695, %v3663_v15  ;;  %v3664_v28 = vmul.f32 0.5, %v8688_v17  ;;  %7518 = vst [vmem:[%s11562_s27 + $0x38] sm:$0xff] %v8688_v17  ;;  %5766 = vmatprep.subr.bf16.mxu0 %v9713_v16  ;;  %v9680_v12 = vld [vmem:[%s13261_s6 + $0xac] ss:$16 sps:$4 sm:$0xff]  }
 0x325   : > { %v3756_v34 = vadd.f32 %v11582_v20, %v3740_v21  ;;  %5767 = vmatpush1.bf16.msra.mxu0 %v9711_v57  ;;  %v9723_v17 = vld [vmem:[%s13263_s8 + $0x150] ss:$28 sps:$4 sm:$0xff]   ;;  %v9735_v63 = vld [vmem:[%s13263_s8 + $0x1c0] ss:$28 sps:$4 sm:$0xff]  }
 0x326   : > { %10019 = vpow2.f32 %v3685_v24  ;;  %v3687_v42 = vmul.f32 1.442695, %v3664_v28  ;;  %v3618_v43 = vpop.f32.mrb[48].mxu0  ;;  %4107 = vmatpush1.bf16.msra.mxu1 %v9666_v18  ;;  %5768 = vmatprep.subr.bf16.mxu0 %v9719_v40  ;;  %v9686_v40 = vld [vmem:[%s13261_s6 + $0xec] ss:$16 sps:$4 sm:$0xff]  }
 0x327   : > { %v11670_v46 = vadd.f32 %v3618_v43, %v11549_v50  ;;  %v3620_v47 = vpop.f32.mrb[49].mxu0  ;;  %v11672_v20 = vpack.c.bf16 %v3756_v34, %v3755_v22  ;;  %4108 = vmatprep.subr.bf16.mxu1 %v9671_v23  ;;  %v9731_v22 = vld [vmem:[%s13263_s8 + $0x18c] ss:$28 sps:$4 sm:$0xff]  }
 0x328   : > { %v10016_v56 = vpop.eup %10015  ;;  %10021 = vpow2.f32 %v3687_v42  ;;  %v8690_v37 = vadd.f32 %v3620_v47, %v11552_v54  ;;  %v3622_v38 = vpop.f32.mrb[50].mxu0  ;;  %v9678_v34 = vld [vmem:[%s13261_s6 + $0xa8] ss:$16 sps:$4 sm:$0xff]   ;;  %v9683_v42 = vld [vmem:[%s13261_s6 + $0xcc] ss:$16 sps:$4 sm:$0xff]  }
 0x329   : > { %7503 = vst [vmem:[%s11556_s26 + $0x40] sm:$0xff] %v11670_v46  ;;  %v11684_v58 = vadd.f32 %v3622_v38, %v11549_v50  ;;  %v3624_v39 = vpop.f32.mrb[51].mxu0  ;;  %4034 = vmatmul.mubr.bf16.gmra.mrb[36].mxu1 %v11672_v20  ;;  %v3741_v59 = vmul.f32 %v10016_v56, %v8452_v41  ;;  %5769 = vmatpush1.bf16.msra.mxu0 %v9717_v27  ;;  %v9729_v47 = vld [vmem:[%s13263_s8 + $0x188] ss:$28 sps:$4 sm:$0xff]  }
 0x32a   : > { %v10018_v60 = vpop.eup %10017  ;;  %v3665_v61 = vmul.f32 0.5, %v8690_v37  ;;  %7519 = vst [vmem:[%s11562_s27 + $0x40] sm:$0xff] %v8690_v37  ;;  %v8692_v62 = vadd.f32 %v3624_v39, %v11552_v54  ;;  %4043 = vmatprep.mubr.bf16.mxu1 %v10360_v53  ;;  %4109 = vmatpush1.bf16.msra.mxu1 %v9669_v45  ;;  %v9681_v38 = vld [vmem:[%s13261_s6 + $0xc8] ss:$16 sps:$4 sm:$0xff]  }
 0x32b   : > { %7504 = vst [vmem:[%s11556_s26 + $0x48] sm:$0xff] %v11684_v58  ;;  %v3742_v6 = vmul.f32 %v10018_v60, %v8453_v48  ;;  %v3757_v9 = vadd.f32 %v11591_v44, %v3741_v59  ;;  %4110 = vmatprep.subr.bf16.mxu1 %v9674_v49  ;;  %v9725_v44 = vld [vmem:[%s13263_s8 + $0x154] ss:$28 sps:$4 sm:$0xff]   ;;  %v8460_v49 = vunpack.c.l.bf16 %v8477_v30  ;;  %v8461_v59 = vunpack.c.h.bf16 %v8477_v30 }
 0x32c   : > { %v3689_v55 = vmul.f32 1.442695, %v3665_v61  ;;  %v3666_v25 = vmul.f32 0.5, %v8692_v62  ;;  %7520 = vst [vmem:[%s11562_s27 + $0x48] sm:$0xff] %v8692_v62  ;;  %5770 = vmatprep.subr.bf16.mxu0 %v9725_v44 }
 0x32d   : > { %v3758_v8 = vadd.f32 %v11597_v52, %v3742_v6  ;;  %5771 = vmatpush1.bf16.msra.mxu0 %v9723_v17 }
 0x32e   : > { %10023 = vpow2.f32 %v3689_v55  ;;  %v3691_v1 = vmul.f32 1.442695, %v3666_v25  ;;  %v3628_v2 = vpop.f32.mrb[52].mxu0  ;;  %4111 = vmatpush1.bf16.msra.mxu1 %v9672_v0  ;;  %5772 = vmatprep.subr.bf16.mxu0 %v9731_v22 }
 0x32f   : > { %v11715_v4 = vadd.f32 %v3628_v2, %v11549_v50  ;;  %v3630_v7 = vpop.f32.mrb[53].mxu0  ;;  %v11717_v52 = vpack.c.bf16 %v3758_v8, %v3757_v9  ;;  %4112 = vmatprep.subr.bf16.mxu1 %v9677_v51  ;;  %v9743_v51 = vld [vmem:[%s13263_s8 + $0x1fc] ss:$28 sps:$4 sm:$0xff]   ;;  %v8478_v8 = vld [vmem:[%s11573_s23 + $0x28] sm:$0xff]  }
 0x330   : > { %v10020_v13 = vpop.eup %10019  ;;  %10025 = vpow2.f32 %v3691_v1  ;;  %v8694_v14 = vadd.f32 %v3630_v7, %v11552_v54  ;;  %v3632_v15 = vpop.f32.mrb[54].mxu0  ;;  %v9692_v2 = vld [vmem:[%s13263_s8 + $0xc] ss:$28 sps:$4 sm:$0xff]   ;;  %v8465_v22 = vunpack.c.h.bf16 %v8478_v8 }
 0x331   : > { %7505 = vst [vmem:[%s11556_s26 + $0x50] sm:$0xff] %v11715_v4  ;;  %v11729_v18 = vadd.f32 %v3632_v15, %v11549_v50  ;;  %v3634_v19 = vpop.f32.mrb[55].mxu0  ;;  %4044 = vmatmul.mubr.bf16.gmra.mrb[40].mxu1 %v11717_v52  ;;  %v3743_v21 = vmul.f32 %v10020_v13, %v8456_v29  ;;  %5773 = vmatpush1.bf16.msra.mxu0 %v9729_v47  ;;  %v9684_v29 = vld [vmem:[%s13261_s6 + $0xe8] ss:$16 sps:$4 sm:$0xff]   ;;  %v8464_v13 = vunpack.c.l.bf16 %v8478_v8  ;;  %v8479_v47 = vld [vmem:[%s11573_s23 + $0x30] sm:$0xff]  }
 0x332   : > { %v10022_v23 = vpop.eup %10021  ;;  %v3667_v24 = vmul.f32 0.5, %v8694_v14  ;;  %7521 = vst [vmem:[%s11562_s27 + $0x50] sm:$0xff] %v8694_v14  ;;  %v8696_v28 = vadd.f32 %v3634_v19, %v11552_v54  ;;  %4053 = vmatprep.mubr.bf16.mxu1 %v10360_v53  ;;  %4113 = vmatpush1.bf16.msra.mxu1 %v9675_v3 }
 0x333   : > { %7506 = vst [vmem:[%s11556_s26 + $0x58] sm:$0xff] %v11729_v18  ;;  %v3744_v41 = vmul.f32 %v10022_v23, %v8457_v11  ;;  %v3759_v16 = vadd.f32 %v11625_v5, %v3743_v21  ;;  %4114 = vmatprep.subr.bf16.mxu1 %v9680_v12  ;;  %v9737_v5 = vld [vmem:[%s13263_s8 + $0x1c4] ss:$28 sps:$4 sm:$0xff]   ;;  %v9741_v11 = vld [vmem:[%s13263_s8 + $0x1f8] ss:$28 sps:$4 sm:$0xff]  }
 0x334   : > { %v3693_v43 = vmul.f32 1.442695, %v3667_v24  ;;  %v3668_v45 = vmul.f32 0.5, %v8696_v28  ;;  %7522 = vst [vmem:[%s11562_s27 + $0x58] sm:$0xff] %v8696_v28  ;;  %5774 = vmatprep.subr.bf16.mxu0 %v9737_v5  ;;  %v9747_v28 = vld [vmem:[%s13263_s8 + $0x230] ss:$28 sps:$4 sm:$0xff]  }
 0x335   : > { %v3760_v48 = vadd.f32 %v11639_v10, %v3744_v41  ;;  %5775 = vmatpush1.bf16.msra.mxu0 %v9735_v63  ;;  %v8480_v63 = vld [vmem:[%s11573_s23 + $0x38] sm:$0xff]   ;;  %s13282_s23 = smul.u32 28, %s13290_s15  ;;  %s13272_s15 = sshll.u32 %s10451_s25, 11 }
 0x336   : > { %10027 = vpow2.f32 %v3693_v43  ;;  %v3695_v56 = vmul.f32 1.442695, %v3668_v45  ;;  %v3638_v37 = vpop.f32.mrb[56].mxu0  ;;  %4115 = vmatpush1.bf16.msra.mxu1 %v9678_v34  ;;  %5776 = vmatprep.subr.bf16.mxu0 %v9743_v51  ;;  %v9765_v51 = vld [vmem:[%s13263_s8 + $0x2d8] ss:$28 sps:$4 sm:$0xff]   ;;  %v8473_v8 = vunpack.c.h.bf16 %v8480_v63  ;;  %s12987_s17 = scalar_lea.hbm %s13266_s11, %s13272_s15 }
 0x337   : > { %v11760_v57 = vadd.f32 %v3638_v37, %v11549_v50  ;;  %v3640_v39 = vpop.f32.mrb[57].mxu0  ;;  %v11762_v10 = vpack.c.bf16 %v3760_v48, %v3759_v16  ;;  %4116 = vmatprep.subr.bf16.mxu1 %v9683_v42  ;;  %v9755_v16 = vld [vmem:[%s13263_s8 + $0x26c] ss:$28 sps:$4 sm:$0xff]   ;;  %s12774_s1 = scalar_lea.vmem %s13265_s10, %s13282_s23  ;;  %s10268_s23 = sshll.u32 %s10361_s20, 4  ;;  %s10269_s23 = int_to_ptr.vmem [resolvable:$false] %s10268_s23 }
 0x338   : > { %v10024_v60 = vpop.eup %10023  ;;  %10029 = vpow2.f32 %v3695_v56  ;;  %v8698_v61 = vadd.f32 %v3640_v39, %v11552_v54  ;;  %v3642_v62 = vpop.f32.mrb[58].mxu0  ;;  %v9753_v56 = vld [vmem:[%s13263_s8 + $0x268] ss:$28 sps:$4 sm:$0xff]   ;;  %s10270_s28 = scalar_lea.vmem %s10269_s23, 4096  ;;  %p10271_p0 = scmp.lt.s32.totalorder %s12989_s30, %s10269_s23 }
 0x339   : > { %7507 = vst [vmem:[%s11556_s26 + $0x60] sm:$0xff] %v11760_v57  ;;  %v11774_v0 = vadd.f32 %v3642_v62, %v11549_v50  ;;  %v3644_v6 = vpop.f32.mrb[59].mxu0  ;;  %4054 = vmatmul.mubr.bf16.gmra.mrb[44].mxu1 %v11762_v10  ;;  %v3745_v9 = vmul.f32 %v10024_v60, %v8460_v49  ;;  %5777 = vmatpush1.bf16.msra.mxu0 %v9741_v11  ;;  %v9759_v60 = vld [vmem:[%s13263_s8 + $0x2a0] ss:$28 sps:$4 sm:$0xff]   ;;  %p10272_p1 = scmp.lt.s32.totalorder %s10270_s28, %s10264_s18 }
 0x33a   : > { %v10026_v55 = vpop.eup %10025  ;;  %v3669_v25 = vmul.f32 0.5, %v8698_v61  ;;  %7523 = vst [vmem:[%s11562_s27 + $0x60] sm:$0xff] %v8698_v61  ;;  %v8700_v27 = vadd.f32 %v3644_v6, %v11552_v54  ;;  %4063 = vmatprep.mubr.bf16.mxu1 %v10360_v53  ;;  %4117 = vmatpush1.bf16.msra.mxu1 %v9681_v38  ;;  %v8468_v38 = vunpack.c.l.bf16 %v8479_v47  ;;  %v9767_v61 = vld [vmem:[%s13263_s8 + $0x2dc] ss:$28 sps:$4 sm:$0xff]   ;;  %v9698_v11 = vld [vmem:[%s13263_s8 + $0x44] ss:$28 sps:$4 sm:$0xff]  }
 0x33b   : > { %7508 = vst [vmem:[%s11556_s26 + $0x68] sm:$0xff] %v11774_v0  ;;  %v3746_v44 = vmul.f32 %v10026_v55, %v8461_v59  ;;  %v3761_v1 = vadd.f32 %v11670_v46, %v3745_v9  ;;  %4118 = vmatprep.subr.bf16.mxu1 %v9686_v40  ;;  %v9749_v46 = vld [vmem:[%s13263_s8 + $0x234] ss:$28 sps:$4 sm:$0xff]   ;;  %v8469_v59 = vunpack.c.h.bf16 %v8479_v47  ;;  %p10273_p2 = por %p10272_p1, %p10271_p0 }
 0x33c   : > { %v3697_v3 = vmul.f32 1.442695, %v3669_v25  ;;  %v3670_v7 = vmul.f32 0.5, %v8700_v27  ;;  %7524 = vst [vmem:[%s11562_s27 + $0x68] sm:$0xff] %v8700_v27  ;;  %5778 = vmatprep.subr.bf16.mxu0 %v9749_v46  ;;  %v8472_v25 = vunpack.c.l.bf16 %v8480_v63  ;;  %v9702_v46 = vld [vmem:[%s13263_s8 + $0x78] ss:$28 sps:$4 sm:$0xff]  }
 0x33d   : > { %v3762_v12 = vadd.f32 %v11684_v58, %v3746_v44  ;;  %5779 = vmatpush1.bf16.msra.mxu0 %v9747_v28  ;;  %v9779_v28 = vld [vmem:[%s13263_s8 + $0x34c] ss:$28 sps:$4 sm:$0xff]   ;;  %v9750_v47 = vld [vmem:[%s13263_s8 + $0x238] ss:$28 sps:$4 sm:$0xff]   ;;  %p10274_p3 = pnand %p10273_p2, %p10267_p13 }
 0x33e   : > { %10031 = vpow2.f32 %v3697_v3  ;;  %v3699_v14 = vmul.f32 1.442695, %v3670_v7  ;;  %v3648_v15 = vpop.f32.mrb[60].mxu0  ;;  %4119 = vmatpush1.bf16.msra.mxu1 %v9684_v29  ;;  %5780 = vmatprep.subr.bf16.mxu0 %v9755_v16  ;;  %v9738_v16 = vld [vmem:[%s13263_s8 + $0x1c8] ss:$28 sps:$4 sm:$0xff]  }
 0x33f   : > { %v11802_v17 = vadd.f32 %v3648_v15, %v11549_v50  ;;  %v3650_v19 = vpop.f32.mrb[61].mxu0  ;;  %v11804_v21 = vpack.c.bf16 %v3762_v12, %v3761_v1  ;;  %5984 = vmatprep.subr.bf16.mxu1 %v9692_v2  ;;  %v9696_v12 = vld [vmem:[%s13263_s8 + $0x40] ss:$28 sps:$4 sm:$0xff]   ;;  %v9716_v15 = vld [vmem:[%s13263_s8 + $0xec] ss:$28 sps:$4 sm:$0xff]  }
 0x340   : > { %v10028_v58 = vpop.eup %10027  ;;  %10033 = vpow2.f32 %v3699_v14  ;;  %v8702_v23 = vadd.f32 %v3650_v19, %v11552_v54  ;;  %v3652_v24 = vpop.f32.mrb[62].mxu0  ;;  %v9708_v14 = vld [vmem:[%s13263_s8 + $0xb0] ss:$28 sps:$4 sm:$0xff]   ;;  %v9720_v19 = vld [vmem:[%s13263_s8 + $0x120] ss:$28 sps:$4 sm:$0xff]  }
 0x341   : > { %7509 = vst [vmem:[%s11556_s26 + $0x70] sm:$0xff] %v11802_v17  ;;  %v8703_v30 = vadd.f32 %v3652_v24, %v11549_v50  ;;  %v3654_v34 = vpop.f32.mrb[63].mxu0  ;;  %4064 = vmatmul.mubr.bf16.gmra.mrb[48].mxu1 %v11804_v21  ;;  %v3747_v41 = vmul.f32 %v10028_v58, %v8464_v13  ;;  %5781 = vmatpush1.bf16.msra.mxu0 %v9753_v56  ;;  %v9704_v13 = vld [vmem:[%s13263_s8 + $0x7c] ss:$28 sps:$4 sm:$0xff]   ;;  %v9773_v58 = vld [vmem:[%s13263_s8 + $0x314] ss:$28 sps:$4 sm:$0xff]  }
 0x342   : > { %v10030_v42 = vpop.eup %10029  ;;  %v3671_v43 = vmul.f32 0.5, %v8702_v23  ;;  %7525 = vst [vmem:[%s11562_s27 + $0x70] sm:$0xff] %v8702_v23  ;;  %v8704_v45 = vadd.f32 %v3654_v34, %v11552_v54  ;;  %4073 = vmatprep.mubr.bf16.mxu1 %v10360_v53  ;;  %v9761_v54 = vld [vmem:[%s13263_s8 + $0x2a4] ss:$28 sps:$4 sm:$0xff]   ;;  %v9771_v23 = vld [vmem:[%s13263_s8 + $0x310] ss:$28 sps:$4 sm:$0xff]  }
 0x343   : > { %7510 = vst [vmem:[%s11556_s26 + $0x78] sm:$0xff] %v8703_v30  ;;  %v3748_v50 = vmul.f32 %v10030_v42, %v8465_v22  ;;  %v3763_v48 = vadd.f32 %v11715_v4, %v3747_v41  ;;  %5782 = vmatprep.subr.bf16.mxu0 %v9761_v54  ;;  %v9728_v22 = vld [vmem:[%s13263_s8 + $0x15c] ss:$28 sps:$4 sm:$0xff]   ;;  %v9734_v24 = vld [vmem:[%s13263_s8 + $0x194] ss:$28 sps:$4 sm:$0xff]   ;;  %s7534_s26 = scalar_lea.sflag [#allocation3], %s11542_s16 }
 0x344   : > { %v3701_v49 = vmul.f32 1.442695, %v3671_v43  ;;  %v3672_v5 = vmul.f32 0.5, %v8704_v45  ;;  %7526 = vst [vmem:[%s11562_s27 + $0x78] sm:$0xff] %v8704_v45  ;;  %v9777_v34 = vld [vmem:[%s13263_s8 + $0x348] ss:$28 sps:$4 sm:$0xff]  }
 0x345   : > { %v3764_v37 = vadd.f32 %v11729_v18, %v3748_v50  ;;  %5783 = vmatpush1.bf16.msra.mxu0 %v9759_v60  ;;  %v9785_v41 = vld [vmem:[%s13263_s8 + $0x384] ss:$28 sps:$4 sm:$0xff]   ;;  %v9752_v45 = vld [vmem:[%s13263_s8 + $0x23c] ss:$28 sps:$4 sm:$0xff]   ;;  %v9756_v50 = vld [vmem:[%s13263_s8 + $0x270] ss:$28 sps:$4 sm:$0xff]  }
 0x346   : > { %10035 = vpow2.f32 %v3701_v49  ;;  %v3703_v39 = vmul.f32 1.442695, %v3672_v5  ;;  %5784 = vmatprep.subr.bf16.mxu0 %v9767_v61  ;;  %v9746_v42 = vld [vmem:[%s13263_s8 + $0x204] ss:$28 sps:$4 sm:$0xff]   ;;  %v9780_v54 = vld [vmem:[%s13263_s8 + $0x350] ss:$28 sps:$4 sm:$0xff]  }
 0x347   : > { %v11831_v4 = vpack.c.bf16 %v3764_v37, %v3763_v48  ;;  %v9744_v43 = vld [vmem:[%s13263_s8 + $0x200] ss:$28 sps:$4 sm:$0xff]   ;;  %v9764_v48 = vld [vmem:[%s13263_s8 + $0x2ac] ss:$28 sps:$4 sm:$0xff]  }
 0x348   : > { %v10032_v40 = vpop.eup %10031  ;;  %10037 = vpow2.f32 %v3703_v39  ;;  %v9762_v49 = vld [vmem:[%s13263_s8 + $0x2a8] ss:$28 sps:$4 sm:$0xff]   ;;  %v9768_v56 = vld [vmem:[%s13263_s8 + $0x2e0] ss:$28 sps:$4 sm:$0xff]  }
 0x349   : > { %4074 = vmatmul.mubr.bf16.gmra.mrb[52].mxu1 %v11831_v4  ;;  %v3749_v18 = vmul.f32 %v10032_v40, %v8468_v38  ;;  %5785 = vmatpush1.bf16.msra.mxu0 %v9765_v51  ;;  %v9770_v5 = vld [vmem:[%s13263_s8 + $0x2e4] ss:$28 sps:$4 sm:$0xff]   ;;  %v9776_v37 = vld [vmem:[%s13263_s8 + $0x31c] ss:$28 sps:$4 sm:$0xff]   ;;  %v9788_v39 = vld [vmem:[%s13263_s8 + $0x38c] ss:$28 sps:$4 sm:$0xff]  }
 0x34a   : > { %v10034_v62 = vpop.eup %10033  ;;  %4083 = vmatprep.mubr.bf16.mxu1 %v10360_v53  ;;  %5786 = vmatprep.subr.bf16.mxu0 %v9773_v58  ;;  %v9774_v38 = vld [vmem:[%s13263_s8 + $0x318] ss:$28 sps:$4 sm:$0xff]  }
 0x34b   : > { %v3750_v6 = vmul.f32 %v10034_v62, %v8469_v59  ;;  %v3765_v9 = vadd.f32 %v11760_v57, %v3749_v18  ;;  %v9800_v58 = vld [vmem:[%s13263_s8 + $0x3fc] ss:$28 sps:$4 sm:$0xff]  }
 0x34d   : > { %v3766_v55 = vadd.f32 %v11774_v0, %v3750_v6  ;;  %v9690_v0 = vld [vmem:[%s13263_s8 + $0x8] ss:$28 sps:$4 sm:$0xff]   ;;  %5787 = vmatpush1.bf16.msra.mxu0 %v9771_v23 }
 0x34e   : > { %5788 = vmatprep.subr.bf16.mxu0 %v9779_v28 }
 0x34f   : > { %v11847_v27 = vpack.c.bf16 %v3766_v55, %v3765_v9 }
 0x350   : > { %v10036_v29 = vpop.eup %10035 }
 0x351   : > { %4084 = vmatmul.mubr.bf16.gmra.mrb[56].mxu1 %v11847_v27  ;;  %v3751_v44 = vmul.f32 %v10036_v29, %v8472_v25  ;;  %5789 = vmatpush1.bf16.msra.mxu0 %v9777_v34  ;;  %v9795_v34 = vld [vmem:[%s13263_s8 + $0x3f0] ss:$28 sps:$4 sm:$0xff]  }
 0x352   : > { %v10038_v1 = vpop.eup %10037  ;;  %4093 = vmatprep.mubr.bf16.mxu1 %v10360_v53  ;;  %5871 = vmatprep.subr.bf16.mxu0 %v9785_v41 }
 0x353   : > { %v3752_v57 = vmul.f32 %v10038_v1, %v8473_v8  ;;  %v3767_v2 = vadd.f32 %v11802_v17, %v3751_v44  ;;  %v9714_v17 = vld [vmem:[%s13263_s8 + $0xe8] ss:$28 sps:$4 sm:$0xff]  }
 0x355   : > { %v3768_v3 = vadd.f32 %v8703_v30, %v3752_v57  ;;  %v9732_v30 = vld [vmem:[%s13263_s8 + $0x190] ss:$28 sps:$4 sm:$0xff]   ;;  %v9783_v57 = vld [vmem:[%s13263_s8 + $0x380] ss:$28 sps:$4 sm:$0xff]  }
 0x357   : > { %v11852_v7 = vpack.c.bf16 %v3768_v3, %v3767_v2  ;;  %v9786_v2 = vld [vmem:[%s13263_s8 + $0x388] ss:$28 sps:$4 sm:$0xff]  }
 0x359   : > { %4094 = vmatmul.mubr.bf16.gmra.mrb[60].mxu1 %v11852_v7 }
 0x35a   : > { %4136 = vmatprep.mubr.bf16.mxu1 %v10360_v53 }
 0x361   : > { %4137 = vmatmul.mubr.bf16.vlgmr.msra.gmra.mrb[64].mxu1 %v11627_v26  ;;  %v9710_v26 = vld [vmem:[%s13263_s8 + $0xb4] ss:$28 sps:$4 sm:$0xff]  }
 0x362   : > { %4146 = vmatprep.mubr.bf16.mxu1 %v10360_v53  ;;  %5985 = vmatpush1.bf16.msra.mxu1 %v9690_v0  ;;  %v9791_v0 = vld [vmem:[%s13263_s8 + $0x3bc] ss:$28 sps:$4 sm:$0xff]  }
 0x363   : > { %5986 = vmatprep.subr.bf16.mxu1 %v9698_v11  ;;  %v9794_v11 = vld [vmem:[%s13263_s8 + $0x3c4] ss:$28 sps:$4 sm:$0xff]  }
 0x366   : > { %5987 = vmatpush1.bf16.msra.mxu1 %v9696_v12 }
 0x367   : > { %5988 = vmatprep.subr.bf16.mxu1 %v9704_v13 }
 0x369   : > { %4147 = vmatmul.mubr.bf16.gmra.mrb[68].mxu1 %v11672_v20  ;;  %v9722_v20 = vld [vmem:[%s13263_s8 + $0x124] ss:$28 sps:$4 sm:$0xff]  }
 0x36a   : > { %4156 = vmatprep.mubr.bf16.mxu1 %v10360_v53  ;;  %5989 = vmatpush1.bf16.msra.mxu1 %v9702_v46 }
 0x36b   : > { %5990 = vmatprep.subr.bf16.mxu1 %v9710_v26 }
 0x36e   : > { %5991 = vmatpush1.bf16.msra.mxu1 %v9708_v14 }
 0x36f   : > { %5992 = vmatprep.subr.bf16.mxu1 %v9716_v15  ;;  %v9789_v15 = vld [vmem:[%s13263_s8 + $0x3b8] ss:$28 sps:$4 sm:$0xff]  }
 0x371   : > { %4157 = vmatmul.mubr.bf16.gmra.mrb[72].mxu1 %v11717_v52  ;;  %v9726_v52 = vld [vmem:[%s13263_s8 + $0x158] ss:$28 sps:$4 sm:$0xff]  }
 0x372   : > { %4166 = vmatprep.mubr.bf16.mxu1 %v10360_v53  ;;  %5993 = vmatpush1.bf16.msra.mxu1 %v9714_v17  ;;  %v9792_v17 = vld [vmem:[%s13263_s8 + $0x3c0] ss:$28 sps:$4 sm:$0xff]  }
 0x373   : > { %5994 = vmatprep.subr.bf16.mxu1 %v9722_v20 }
 0x376   : > { %5995 = vmatpush1.bf16.msra.mxu1 %v9720_v19 }
 0x377   : > { %5996 = vmatprep.subr.bf16.mxu1 %v9728_v22  ;;  %v9797_v22 = vld [vmem:[%s13263_s8 + $0x3f4] ss:$28 sps:$4 sm:$0xff]  }
 0x379   : > { %4167 = vmatmul.mubr.bf16.gmra.mrb[76].mxu1 %v11762_v10  ;;  %v9740_v10 = vld [vmem:[%s13263_s8 + $0x1cc] ss:$28 sps:$4 sm:$0xff]  }
 0x37a   : > { %4176 = vmatprep.mubr.bf16.mxu1 %v10360_v53  ;;  %5997 = vmatpush1.bf16.msra.mxu1 %v9726_v52 }
 0x37b   : > { %5998 = vmatprep.subr.bf16.mxu1 %v9734_v24 }
 0x37e   : > { %5999 = vmatpush1.bf16.msra.mxu1 %v9732_v30 }
 0x37f   : > { %6000 = vmatprep.subr.bf16.mxu1 %v9740_v10  ;;  %v9798_v10 = vld [vmem:[%s13263_s8 + $0x3f8] ss:$28 sps:$4 sm:$0xff]  }
 0x381   : > { %4177 = vmatmul.mubr.bf16.gmra.mrb[80].mxu1 %v11804_v21  ;;  %v9758_v21 = vld [vmem:[%s13263_s8 + $0x274] ss:$28 sps:$4 sm:$0xff]  }
 0x382   : > { %4186 = vmatprep.mubr.bf16.mxu1 %v10360_v53  ;;  %6001 = vmatpush1.bf16.msra.mxu1 %v9738_v16 }
 0x383   : > { %6002 = vmatprep.subr.bf16.mxu1 %v9746_v42  ;;  %v9803_v42 = vld [vmem:[%s13263_s8 + $0x42c] ss:$28 sps:$4 sm:$0xff]  }
 0x386   : > { %6003 = vmatpush1.bf16.msra.mxu1 %v9744_v43  ;;  %v9806_v43 = vld [vmem:[%s13263_s8 + $0x434] ss:$28 sps:$4 sm:$0xff]  }
 0x387   : > { %6004 = vmatprep.subr.bf16.mxu1 %v9752_v45 }
 0x389   : > { %4187 = vmatmul.mubr.bf16.gmra.mrb[84].mxu1 %v11831_v4  ;;  %v11985_v4 = vld [vmem:[%s13262_s7] sm:$0xf] }
 0x38a   : > { %4196 = vmatprep.mubr.bf16.mxu1 %v10360_v53  ;;  %6005 = vmatpush1.bf16.msra.mxu1 %v9750_v47  ;;  %v11989_v59 = vrot.slane %v11985_v4, %v11268_v32  ;;  %v11993_v40 = vrot.slane %v11985_v4, %v11277_v35 }
 0x38b   : > { %6006 = vmatprep.subr.bf16.mxu1 %v9758_v21 }
 0x38e   : > { %6007 = vmatpush1.bf16.msra.mxu1 %v9756_v50 }
 0x38f   : > { %6008 = vmatprep.subr.bf16.mxu1 %v9764_v48 }
 0x391   : > { %4197 = vmatmul.mubr.bf16.gmra.mrb[88].mxu1 %v11847_v27 }
 0x392   : > { %4206 = vmatprep.mubr.bf16.mxu1 %v10360_v53  ;;  %6009 = vmatpush1.bf16.msra.mxu1 %v9762_v49  ;;  %v9782_v53 = vld [vmem:[%s13263_s8 + $0x354] ss:$28 sps:$4 sm:$0xff]   ;;  %v9801_v49 = vld [vmem:[%s13263_s8 + $0x428] ss:$28 sps:$4 sm:$0xff]  }
 0x393   : > { %6010 = vmatprep.subr.bf16.mxu1 %v9770_v5  ;;  %v9804_v5 = vld [vmem:[%s13263_s8 + $0x430] ss:$28 sps:$4 sm:$0xff]  }
 0x396   : > { %6011 = vmatpush1.bf16.msra.mxu1 %v9768_v56 }
 0x397   : > { %6012 = vmatprep.subr.bf16.mxu1 %v9776_v37 }
 0x399   : > { %4207 = vmatmul.mubr.bf16.gmra.mrb[92].mxu1 %v11852_v7 }
 0x39a   : > { %6013 = vmatpush1.bf16.msra.mxu1 %v9774_v38  ;;  %v9809_v38 = vld [vmem:[%s13263_s8 + $0x464] ss:$28 sps:$4 sm:$0xff]  }
 0x39b   : > { %6014 = vmatprep.subr.bf16.mxu1 %v9782_v53  ;;  %v9812_v53 = vld [vmem:[%s13263_s8 + $0x46c] ss:$28 sps:$4 sm:$0xff]  }
 0x39e   : > { %6015 = vmatpush1.bf16.msra.mxu1 %v9780_v54 }
 0x39f   : > { %6097 = vmatprep.subr.bf16.mxu1 %v9788_v39 }
 0x3f4   : > { %v4025_v60 = vpop.f32.mrb[32].mxu1 }
 0x3f5   : > { %v4026_v18 = vadd.f32 %v4025_v60, %v11989_v59  ;;  %v4027_v61 = vpop.f32.mrb[33].mxu1 }
 0x3f6   : > { %v4028_v62 = vadd.f32 %v4027_v61, %v11993_v40  ;;  %v4029_v63 = vpop.f32.mrb[34].mxu1 }
 0x3f7   : > { %v4030_v6 = vadd.f32 %v4029_v63, %v11989_v59  ;;  %v4031_v9 = vpop.f32.mrb[35].mxu1  ;;  %v4217_v55 = vmax.f32 %v4026_v18, 0.0  ;;  %v9810_v63 = vld [vmem:[%s13263_s8 + $0x468] ss:$28 sps:$4 sm:$0xff]  }
 0x3f8   : > { %v4032_v51 = vadd.f32 %v4031_v9, %v11993_v40  ;;  %v4218_v27 = vmax.f32 %v4028_v62, 0.0  ;;  %v9807_v62 = vld [vmem:[%s13263_s8 + $0x460] ss:$28 sps:$4 sm:$0xff]  }
 0x3f9   : > { %v4221_v25 = vmax.f32 %v4030_v6, 0.0 }
 0x3fa   : > { %v4222_v8 = vmax.f32 %v4032_v51, 0.0  ;;  %v9815_v51 = vld [vmem:[%s13263_s8 + $0x49c] ss:$28 sps:$4 sm:$0xff]  }
 0x3fb   : > { %v11999_v29 = vpack.c.bf16 %v4221_v25, %v4217_v55  ;;  %v9818_v55 = vld [vmem:[%s13263_s8 + $0x4a4] ss:$28 sps:$4 sm:$0xff]  }
 0x3fc   : > { %v12001_v44 = vpack.c.bf16 %v4222_v8, %v4218_v27  ;;  %v4035_v1 = vpop.f32.mrb[36].mxu1 }
 0x3fd   : > { %v4036_v3 = vadd.f32 %v4035_v1, %v11989_v59  ;;  %v4037_v7 = vpop.f32.mrb[37].mxu1 }
 0x3fe   : > { %v4038_v12 = vadd.f32 %v4037_v7, %v11993_v40  ;;  %v4039_v13 = vpop.f32.mrb[38].mxu1  ;;  %5790 = vmatprep.mubr.bf16.mxu0 %v12001_v44  ;;  %6016 = vmatprep.mubr.bf16.mxu1 %v12001_v44 }
 0x3ff   : > { %v4040_v46 = vadd.f32 %v4039_v13, %v11989_v59  ;;  %v4041_v26 = vpop.f32.mrb[39].mxu1  ;;  %5791 = vmatmul.mubr.bf16.vlgmr.msra.gmra.mrb[64].mxu0 %v11999_v29  ;;  %6017 = vmatmul.mubr.bf16.vlgmr.msra.gmra.mrb[96].mxu1 %v11999_v29  ;;  %v4225_v20 = vmax.f32 %v4036_v3, 0.0  ;;  %v9816_v3 = vld [vmem:[%s13263_s8 + $0x4a0] ss:$28 sps:$4 sm:$0xff]  }
 0x400   : > { %v4042_v14 = vadd.f32 %v4041_v26, %v11993_v40  ;;  %5872 = vmatpush1.bf16.msra.mxu0 %v9783_v57  ;;  %6098 = vmatpush1.bf16.msra.mxu1 %v9786_v2  ;;  %v4226_v52 = vmax.f32 %v4038_v12, 0.0  ;;  %v9813_v2 = vld [vmem:[%s13263_s8 + $0x498] ss:$28 sps:$4 sm:$0xff]  }
 0x401   : > { %v4229_v19 = vmax.f32 %v4040_v46, 0.0  ;;  %5873 = vmatprep.subr.bf16.mxu0 %v9791_v0  ;;  %6099 = vmatprep.subr.bf16.mxu1 %v9794_v11  ;;  %v9821_v11 = vld [vmem:[%s13263_s8 + $0x4d4] ss:$28 sps:$4 sm:$0xff]   ;;  %v9824_v12 = vld [vmem:[%s13263_s8 + $0x4dc] ss:$28 sps:$4 sm:$0xff]  }
 0x402   : > { %v4230_v23 = vmax.f32 %v4042_v14, 0.0 }
 0x403   : > { %v12035_v24 = vpack.c.bf16 %v4229_v19, %v4225_v20  ;;  %v9822_v20 = vld [vmem:[%s13263_s8 + $0x4d8] ss:$28 sps:$4 sm:$0xff]  }
 0x404   : > { %v12037_v28 = vpack.c.bf16 %v4230_v23, %v4226_v52  ;;  %v4045_v30 = vpop.f32.mrb[40].mxu1  ;;  %5874 = vmatpush1.bf16.msra.mxu0 %v9789_v15  ;;  %6100 = vmatpush1.bf16.msra.mxu1 %v9792_v17  ;;  %v9819_v17 = vld [vmem:[%s13263_s8 + $0x4d0] ss:$28 sps:$4 sm:$0xff]  }
 0x405   : > { %v4046_v41 = vadd.f32 %v4045_v30, %v11989_v59  ;;  %v4047_v16 = vpop.f32.mrb[41].mxu1  ;;  %5875 = vmatprep.subr.bf16.mxu0 %v9797_v22  ;;  %6101 = vmatprep.subr.bf16.mxu1 %v9800_v58  ;;  %v9827_v58 = vld [vmem:[%s13263_s8 + $0x50c] ss:$28 sps:$4 sm:$0xff]   ;;  %v9830_v52 = vld [vmem:[%s13263_s8 + $0x514] ss:$28 sps:$4 sm:$0xff]  }
 0x406   : > { %v4048_v45 = vadd.f32 %v4047_v16, %v11993_v40  ;;  %v4049_v47 = vpop.f32.mrb[42].mxu1  ;;  %5800 = vmatprep.mubr.bf16.mxu0 %v12037_v28  ;;  %6026 = vmatprep.mubr.bf16.mxu1 %v12037_v28  ;;  %v9825_v16 = vld [vmem:[%s13263_s8 + $0x508] ss:$28 sps:$4 sm:$0xff]  }
 0x407   : > { %v4050_v21 = vadd.f32 %v4049_v47, %v11989_v59  ;;  %v4051_v50 = vpop.f32.mrb[43].mxu1  ;;  %5801 = vmatmul.mubr.bf16.gmra.mrb[68].mxu0 %v12035_v24  ;;  %6027 = vmatmul.mubr.bf16.gmra.mrb[100].mxu1 %v12035_v24  ;;  %v4233_v56 = vmax.f32 %v4046_v41, 0.0  ;;  %v9833_v47 = vld [vmem:[%s13263_s8 + $0x544] ss:$28 sps:$4 sm:$0xff]  }
 0x408   : > { %v4052_v48 = vadd.f32 %v4051_v50, %v11993_v40  ;;  %5876 = vmatpush1.bf16.msra.mxu0 %v9795_v34  ;;  %6102 = vmatpush1.bf16.msra.mxu1 %v9798_v10  ;;  %v4234_v54 = vmax.f32 %v4048_v45, 0.0 }
 0x409   : > { %v4237_v37 = vmax.f32 %v4050_v21, 0.0  ;;  %5877 = vmatprep.subr.bf16.mxu0 %v9803_v42  ;;  %6103 = vmatprep.subr.bf16.mxu1 %v9806_v43  ;;  %v9828_v42 = vld [vmem:[%s13263_s8 + $0x510] ss:$28 sps:$4 sm:$0xff]  }
 0x40a   : > { %v4238_v39 = vmax.f32 %v4052_v48, 0.0  ;;  %v9836_v21 = vld [vmem:[%s13263_s8 + $0x54c] ss:$28 sps:$4 sm:$0xff]  }
 0x40b   : > { %v12071_v60 = vpack.c.bf16 %v4237_v37, %v4233_v56  ;;  %v9831_v37 = vld [vmem:[%s13263_s8 + $0x540] ss:$28 sps:$4 sm:$0xff]  }
 0x40c   : > { %v12073_v18 = vpack.c.bf16 %v4238_v39, %v4234_v54  ;;  %v4055_v61 = vpop.f32.mrb[44].mxu1  ;;  %5878 = vmatpush1.bf16.msra.mxu0 %v9801_v49  ;;  %6104 = vmatpush1.bf16.msra.mxu1 %v9804_v5  ;;  %v9839_v39 = vld [vmem:[%s13263_s8 + $0x57c] ss:$28 sps:$4 sm:$0xff]  }
 0x40d   : > { %v4056_v6 = vadd.f32 %v4055_v61, %v11989_v59  ;;  %v4057_v9 = vpop.f32.mrb[45].mxu1  ;;  %5879 = vmatprep.subr.bf16.mxu0 %v9809_v38  ;;  %6105 = vmatprep.subr.bf16.mxu1 %v9812_v53  ;;  %v9834_v38 = vld [vmem:[%s13263_s8 + $0x548] ss:$28 sps:$4 sm:$0xff]  }
 0x40e   : > { %v4058_v25 = vadd.f32 %v4057_v9, %v11993_v40  ;;  %v4059_v27 = vpop.f32.mrb[46].mxu1  ;;  %5810 = vmatprep.mubr.bf16.mxu0 %v12073_v18  ;;  %6036 = vmatprep.mubr.bf16.mxu1 %v12073_v18  ;;  %v9842_v61 = vld [vmem:[%s13263_s8 + $0x584] ss:$28 sps:$4 sm:$0xff]  }
 0x40f   : > { %v4060_v8 = vadd.f32 %v4059_v27, %v11989_v59  ;;  %v4061_v1 = vpop.f32.mrb[47].mxu1  ;;  %5811 = vmatmul.mubr.bf16.gmra.mrb[72].mxu0 %v12071_v60  ;;  %6037 = vmatmul.mubr.bf16.gmra.mrb[104].mxu1 %v12071_v60  ;;  %v4241_v7 = vmax.f32 %v4056_v6, 0.0 }
 0x410   : > { %v4062_v57 = vadd.f32 %v4061_v1, %v11993_v40  ;;  %5880 = vmatpush1.bf16.msra.mxu0 %v9807_v62  ;;  %6106 = vmatpush1.bf16.msra.mxu1 %v9810_v63  ;;  %v4242_v13 = vmax.f32 %v4058_v25, 0.0  ;;  %v9840_v25 = vld [vmem:[%s13263_s8 + $0x580] ss:$28 sps:$4 sm:$0xff]   ;;  %v9845_v1 = vld [vmem:[%s13263_s8 + $0x5b4] ss:$28 sps:$4 sm:$0xff]  }
 0x411   : > { %v4245_v0 = vmax.f32 %v4060_v8, 0.0  ;;  %5881 = vmatprep.subr.bf16.mxu0 %v9815_v51  ;;  %6107 = vmatprep.subr.bf16.mxu1 %v9818_v55  ;;  %v9837_v55 = vld [vmem:[%s13263_s8 + $0x578] ss:$28 sps:$4 sm:$0xff]  }
 0x412   : > { %v4246_v46 = vmax.f32 %v4062_v57, 0.0  ;;  %v9848_v57 = vld [vmem:[%s13263_s8 + $0x5bc] ss:$28 sps:$4 sm:$0xff]  }
 0x413   : > { %v12107_v26 = vpack.c.bf16 %v4245_v0, %v4241_v7 }
 0x414   : > { %v12109_v14 = vpack.c.bf16 %v4246_v46, %v4242_v13  ;;  %v4065_v15 = vpop.f32.mrb[48].mxu1  ;;  %5882 = vmatpush1.bf16.msra.mxu0 %v9813_v2  ;;  %6108 = vmatpush1.bf16.msra.mxu1 %v9816_v3  ;;  %v9846_v13 = vld [vmem:[%s13263_s8 + $0x5b8] ss:$28 sps:$4 sm:$0xff]  }
 0x415   : > { %v4066_v19 = vadd.f32 %v4065_v15, %v11989_v59  ;;  %v4067_v22 = vpop.f32.mrb[49].mxu1  ;;  %5883 = vmatprep.subr.bf16.mxu0 %v9821_v11  ;;  %6109 = vmatprep.subr.bf16.mxu1 %v9824_v12  ;;  %v9843_v12 = vld [vmem:[%s13263_s8 + $0x5b0] ss:$28 sps:$4 sm:$0xff]  }
 0x416   : > { %v4068_v23 = vadd.f32 %v4067_v22, %v11993_v40  ;;  %v4069_v30 = vpop.f32.mrb[50].mxu1  ;;  %5820 = vmatprep.mubr.bf16.mxu0 %v12109_v14  ;;  %6046 = vmatprep.mubr.bf16.mxu1 %v12109_v14 }
 0x417   : > { %v4070_v34 = vadd.f32 %v4069_v30, %v11989_v59  ;;  %v4071_v10 = vpop.f32.mrb[51].mxu1  ;;  %5821 = vmatmul.mubr.bf16.gmra.mrb[76].mxu0 %v12107_v26  ;;  %6047 = vmatmul.mubr.bf16.gmra.mrb[108].mxu1 %v12107_v26  ;;  %v4249_v43 = vmax.f32 %v4066_v19, 0.0  ;;  %v9849_v30 = vld [vmem:[%s13263_s8 + $0x5e8] ss:$28 sps:$4 sm:$0xff]  }
 0x418   : > { %v4072_v41 = vadd.f32 %v4071_v10, %v11993_v40  ;;  %5884 = vmatpush1.bf16.msra.mxu0 %v9819_v17  ;;  %6110 = vmatpush1.bf16.msra.mxu1 %v9822_v20  ;;  %v4250_v50 = vmax.f32 %v4068_v23, 0.0  ;;  %v9851_v17 = vld [vmem:[%s13263_s8 + $0x5ec] ss:$28 sps:$4 sm:$0xff]   ;;  %v9854_v20 = vld [vmem:[%s13263_s8 + $0x5f4] ss:$28 sps:$4 sm:$0xff]  }
 0x419   : > { %v4253_v45 = vmax.f32 %v4070_v34, 0.0  ;;  %5885 = vmatprep.subr.bf16.mxu0 %v9827_v58  ;;  %6111 = vmatprep.subr.bf16.mxu1 %v9830_v52  ;;  %v9852_v34 = vld [vmem:[%s13263_s8 + $0x5f0] ss:$28 sps:$4 sm:$0xff]  }
 0x41a   : > { %v4254_v48 = vmax.f32 %v4072_v41, 0.0 }
 0x41b   : > { %v12143_v49 = vpack.c.bf16 %v4253_v45, %v4249_v43 }
 0x41c   : > { %v12145_v5 = vpack.c.bf16 %v4254_v48, %v4250_v50  ;;  %v4075_v56 = vpop.f32.mrb[52].mxu1  ;;  %5886 = vmatpush1.bf16.msra.mxu0 %v9825_v16  ;;  %6112 = vmatpush1.bf16.msra.mxu1 %v9828_v42  ;;  %v9857_v16 = vld [vmem:[%s13263_s8 + $0x624] ss:$28 sps:$4 sm:$0xff]   ;;  %v9860_v42 = vld [vmem:[%s13263_s8 + $0x62c] ss:$28 sps:$4 sm:$0xff]  }
 0x41d   : > { %v4076_v53 = vadd.f32 %v4075_v56, %v11989_v59  ;;  %v4077_v54 = vpop.f32.mrb[53].mxu1  ;;  %5887 = vmatprep.subr.bf16.mxu0 %v9833_v47  ;;  %6113 = vmatprep.subr.bf16.mxu1 %v9836_v21  ;;  %v9855_v48 = vld [vmem:[%s13263_s8 + $0x620] ss:$28 sps:$4 sm:$0xff]   ;;  %v9858_v56 = vld [vmem:[%s13263_s8 + $0x628] ss:$28 sps:$4 sm:$0xff]  }
 0x41e   : > { %v4078_v62 = vadd.f32 %v4077_v54, %v11993_v40  ;;  %v4079_v63 = vpop.f32.mrb[54].mxu1  ;;  %5830 = vmatprep.mubr.bf16.mxu0 %v12145_v5  ;;  %6056 = vmatprep.mubr.bf16.mxu1 %v12145_v5  ;;  %v9866_v54 = vld [vmem:[%s13263_s8 + $0x664] ss:$28 sps:$4 sm:$0xff]  }
 0x41f   : > { %v4080_v6 = vadd.f32 %v4079_v63, %v11989_v59  ;;  %v4081_v9 = vpop.f32.mrb[55].mxu1  ;;  %5831 = vmatmul.mubr.bf16.gmra.mrb[80].mxu0 %v12143_v49  ;;  %6057 = vmatmul.mubr.bf16.gmra.mrb[112].mxu1 %v12143_v49  ;;  %v4257_v27 = vmax.f32 %v4076_v53, 0.0  ;;  %v9863_v53 = vld [vmem:[%s13263_s8 + $0x65c] ss:$28 sps:$4 sm:$0xff]  }
 0x420   : > { %v4082_v51 = vadd.f32 %v4081_v9, %v11993_v40  ;;  %5888 = vmatpush1.bf16.msra.mxu0 %v9831_v37  ;;  %6114 = vmatpush1.bf16.msra.mxu1 %v9834_v38  ;;  %v4258_v2 = vmax.f32 %v4078_v62, 0.0  ;;  %v9861_v9 = vld [vmem:[%s13263_s8 + $0x658] ss:$28 sps:$4 sm:$0xff]  }
 0x421   : > { %v4261_v8 = vmax.f32 %v4080_v6, 0.0  ;;  %5889 = vmatprep.subr.bf16.mxu0 %v9839_v39  ;;  %6115 = vmatprep.subr.bf16.mxu1 %v9842_v61 }
 0x422   : > { %v4262_v3 = vmax.f32 %v4082_v51, 0.0  ;;  %v9864_v51 = vld [vmem:[%s13263_s8 + $0x660] ss:$28 sps:$4 sm:$0xff]  }
 0x423   : > { %v12179_v7 = vpack.c.bf16 %v4261_v8, %v4257_v27  ;;  %v9872_v27 = vld [vmem:[%s13263_s8 + $0x69c] ss:$28 sps:$4 sm:$0xff]  }
 0x424   : > { %v12181_v0 = vpack.c.bf16 %v4262_v3, %v4258_v2  ;;  %v4085_v11 = vpop.f32.mrb[56].mxu1  ;;  %5890 = vmatpush1.bf16.msra.mxu0 %v9837_v55  ;;  %6116 = vmatpush1.bf16.msra.mxu1 %v9840_v25 }
 0x425   : > { %v4086_v46 = vadd.f32 %v4085_v11, %v11989_v59  ;;  %v4087_v15 = vpop.f32.mrb[57].mxu1  ;;  %5891 = vmatprep.subr.bf16.mxu0 %v9845_v1  ;;  %6117 = vmatprep.subr.bf16.mxu1 %v9848_v57  ;;  %v12257_v57 = vrot.slane %v11985_v4, %v11280_v36 }
 0x426   : > { %v4088_v19 = vadd.f32 %v4087_v15, %v11993_v40  ;;  %v4089_v22 = vpop.f32.mrb[58].mxu1  ;;  %5840 = vmatprep.mubr.bf16.mxu0 %v12181_v0  ;;  %6066 = vmatprep.mubr.bf16.mxu1 %v12181_v0 }
 0x427   : > { %v4090_v58 = vadd.f32 %v4089_v22, %v11989_v59  ;;  %v4091_v52 = vpop.f32.mrb[59].mxu1  ;;  %5841 = vmatmul.mubr.bf16.gmra.mrb[84].mxu0 %v12179_v7  ;;  %6067 = vmatmul.mubr.bf16.gmra.mrb[116].mxu1 %v12179_v7  ;;  %v4265_v10 = vmax.f32 %v4086_v46, 0.0 }
 0x428   : > { %v4092_v23 = vadd.f32 %v4091_v52, %v11993_v40  ;;  %5892 = vmatpush1.bf16.msra.mxu0 %v9843_v12  ;;  %6118 = vmatpush1.bf16.msra.mxu1 %v9846_v13  ;;  %v4266_v43 = vmax.f32 %v4088_v19, 0.0  ;;  %v9867_v12 = vld [vmem:[%s13263_s8 + $0x690] ss:$28 sps:$4 sm:$0xff]   ;;  %v9870_v13 = vld [vmem:[%s13263_s8 + $0x698] ss:$28 sps:$4 sm:$0xff]  }
 0x429   : > { %v4269_v41 = vmax.f32 %v4090_v58, 0.0  ;;  %5893 = vmatprep.subr.bf16.mxu0 %v9851_v17  ;;  %6119 = vmatprep.subr.bf16.mxu1 %v9854_v20  ;;  %v9878_v17 = vld [vmem:[%s13263_s8 + $0x6d4] ss:$28 sps:$4 sm:$0xff]  }
 0x42a   : > { %v4270_v45 = vmax.f32 %v4092_v23, 0.0  ;;  %v9873_v23 = vld [vmem:[%s13263_s8 + $0x6c8] ss:$28 sps:$4 sm:$0xff]  }
 0x42b   : > { %v12215_v47 = vpack.c.bf16 %v4269_v41, %v4265_v10  ;;  %v9881_v41 = vld [vmem:[%s13263_s8 + $0x14] ss:$28 sps:$4 sm:$0xff]  }
 0x42c   : > { %v12217_v21 = vpack.c.bf16 %v4270_v45, %v4266_v43  ;;  %v4095_v50 = vpop.f32.mrb[60].mxu1  ;;  %5894 = vmatpush1.bf16.msra.mxu0 %v9849_v30  ;;  %6120 = vmatpush1.bf16.msra.mxu1 %v9852_v34  ;;  %v9876_v30 = vld [vmem:[%s13263_s8 + $0x6d0] ss:$28 sps:$4 sm:$0xff]  }
 0x42d   : > { %v4096_v37 = vadd.f32 %v4095_v50, %v11989_v59  ;;  %v4097_v38 = vpop.f32.mrb[61].mxu1  ;;  %5895 = vmatprep.subr.bf16.mxu0 %v9857_v16  ;;  %6121 = vmatprep.subr.bf16.mxu1 %v9860_v42  ;;  %v9882_v16 = vld [vmem:[%s13263_s8 + $0x1d8] ss:$28 sps:$4 sm:$0xff]  }
 0x42e   : > { %v4098_v39 = vadd.f32 %v4097_v38, %v11993_v40  ;;  %v4099_v61 = vpop.f32.mrb[62].mxu1  ;;  %5850 = vmatprep.mubr.bf16.mxu0 %v12217_v21  ;;  %6076 = vmatprep.mubr.bf16.mxu1 %v12217_v21 }
 0x42f   : > { %v4100_v62 = vadd.f32 %v4099_v61, %v11989_v59  ;;  %v4101_v63 = vpop.f32.mrb[63].mxu1  ;;  %5851 = vmatmul.mubr.bf16.gmra.mrb[88].mxu0 %v12215_v47  ;;  %6077 = vmatmul.mubr.bf16.gmra.mrb[120].mxu1 %v12215_v47  ;;  %v4273_v55 = vmax.f32 %v4096_v37, 0.0  ;;  %v12247_v59 = vrot.slane %v11985_v4, %v11271_v33  ;;  %v9875_v4 = vld [vmem:[%s13263_s8 + $0x6cc] ss:$28 sps:$4 sm:$0xff]   ;;  %v9883_v37 = vld [vmem:[%s13263_s8 + $0x18] ss:$28 sps:$4 sm:$0xff]  }
 0x430   : > { %v4102_v6 = vadd.f32 %v4101_v63, %v11993_v40  ;;  %5896 = vmatpush1.bf16.msra.mxu0 %v9855_v48  ;;  %6122 = vmatpush1.bf16.msra.mxu1 %v9858_v56  ;;  %v9869_v40 = vld [vmem:[%s13263_s8 + $0x694] ss:$28 sps:$4 sm:$0xff]   ;;  %v4274_v8 = vmax.f32 %v4098_v39, 0.0 }
 0x431   : > { %v4277_v25 = vmax.f32 %v4100_v62, 0.0  ;;  %5897 = vmatprep.subr.bf16.mxu0 %v9863_v53  ;;  %6123 = vmatprep.subr.bf16.mxu1 %v9866_v54  ;;  %v9879_v56 = vld [vmem:[%s13263_s8 + $0x10] ss:$28 sps:$4 sm:$0xff]  }
 0x432   : > { %v4278_v1 = vmax.f32 %v4102_v6, 0.0  ;;  %v9886_v54 = vld [vmem:[%s13263_s8 + $0x4c] ss:$28 sps:$4 sm:$0xff]  }
 0x433   : > { %v12259_v2 = vpack.c.bf16 %v4277_v25, %v4273_v55  ;;  %v9890_v39 = vld [vmem:[%s13263_s8 + $0x210] ss:$28 sps:$4 sm:$0xff]  }
 0x434   : > { %v12261_v3 = vpack.c.bf16 %v4278_v1, %v4274_v8  ;;  %v4138_v11 = vpop.f32.mrb[64].mxu1  ;;  %5898 = vmatpush1.bf16.msra.mxu0 %v9861_v9  ;;  %6124 = vmatpush1.bf16.msra.mxu1 %v9864_v51  ;;  %v9884_v51 = vld [vmem:[%s13263_s8 + $0x48] ss:$28 sps:$4 sm:$0xff]   ;;  %v9891_v55 = vld [vmem:[%s13263_s8 + $0x50] ss:$28 sps:$4 sm:$0xff]  }
 0x435   : > { %v4139_v46 = vadd.f32 %v4138_v11, %v12247_v59  ;;  %v4140_v15 = vpop.f32.mrb[65].mxu1  ;;  %5899 = vmatprep.subr.bf16.mxu0 %v9869_v40  ;;  %6125 = vmatprep.subr.bf16.mxu1 %v9872_v27  ;;  %v9889_v27 = vld [vmem:[%s13263_s8 + $0x84] ss:$28 sps:$4 sm:$0xff]  }
 0x436   : > { %v4141_v20 = vadd.f32 %v4140_v15, %v12257_v57  ;;  %v4142_v19 = vpop.f32.mrb[66].mxu1  ;;  %5860 = vmatprep.mubr.bf16.mxu0 %v12261_v3  ;;  %6086 = vmatprep.mubr.bf16.mxu1 %v12261_v3  ;;  %v9898_v8 = vld [vmem:[%s13263_s8 + $0x248] ss:$28 sps:$4 sm:$0xff]   ;;  %v9887_v15 = vld [vmem:[%s13263_s8 + $0x80] ss:$28 sps:$4 sm:$0xff]  }
 0x437   : > { %v4143_v22 = vadd.f32 %v4142_v19, %v12247_v59  ;;  %v4144_v58 = vpop.f32.mrb[67].mxu1  ;;  %5861 = vmatmul.mubr.bf16.gmra.mrb[92].mxu0 %v12259_v2  ;;  %6087 = vmatmul.mubr.bf16.gmra.mrb[124].mxu1 %v12259_v2  ;;  %v4219_v34 = vmax.f32 %v4139_v46, 0.0  ;;  %v9894_v19 = vld [vmem:[%s13263_s8 + $0xbc] ss:$28 sps:$4 sm:$0xff]  }
 0x438   : > { %v4145_v52 = vadd.f32 %v4144_v58, %v12257_v57  ;;  %5900 = vmatpush1.bf16.msra.mxu0 %v9867_v12  ;;  %6126 = vmatpush1.bf16.msra.mxu1 %v9870_v13  ;;  %v4220_v42 = vmax.f32 %v4141_v20, 0.0 }
 0x439   : > { %v4223_v10 = vmax.f32 %v4143_v22, 0.0  ;;  %5901 = vmatprep.subr.bf16.mxu0 %v9875_v4  ;;  %6127 = vmatprep.subr.bf16.mxu1 %v9878_v17  ;;  %v9899_v4 = vld [vmem:[%s13263_s8 + $0x88] ss:$28 sps:$4 sm:$0xff]   ;;  %v9906_v22 = vld [vmem:[%s13263_s8 + $0x280] ss:$28 sps:$4 sm:$0xff]  }
 0x43a   : > { %v4224_v43 = vmax.f32 %v4145_v52, 0.0 }
 0x43b   : > { %v12295_v45 = vpack.c.bf16 %v4223_v10, %v4219_v34  ;;  %v9892_v10 = vld [vmem:[%s13263_s8 + $0xb8] ss:$28 sps:$4 sm:$0xff]  }
 0x43c   : > { %v12297_v50 = vpack.c.bf16 %v4224_v43, %v4220_v42  ;;  %v4148_v48 = vpop.f32.mrb[68].mxu1  ;;  %5902 = vmatpush1.bf16.msra.mxu0 %v9873_v23  ;;  %6128 = vmatpush1.bf16.msra.mxu1 %v9876_v30  ;;  %v9897_v43 = vld [vmem:[%s13263_s8 + $0xf4] ss:$28 sps:$4 sm:$0xff]  }
 0x43d   : > { %v4149_v38 = vadd.f32 %v4148_v48, %v12247_v59  ;;  %v4150_v53 = vpop.f32.mrb[69].mxu1  ;;  %6210 = vmatprep.subr.bf16.mxu0 %v9881_v41  ;;  %8481 = vmatprep.subr.bf16.mxu1 %v9882_v16  ;;  %v9907_v41 = vld [vmem:[%s13263_s8 + $0xc0] ss:$28 sps:$4 sm:$0xff]   ;;  %v9914_v48 = vld [vmem:[%s13263_s8 + $0x2b8] ss:$28 sps:$4 sm:$0xff]  }
 0x43e   : > { %v4151_v61 = vadd.f32 %v4150_v53, %v12257_v57  ;;  %v4152_v62 = vpop.f32.mrb[70].mxu1  ;;  %5903 = vmatprep.mubr.bf16.mxu0 %v12297_v50  ;;  %6129 = vmatprep.mubr.bf16.mxu1 %v12297_v50 }
 0x43f   : > { %v4153_v63 = vadd.f32 %v4152_v62, %v12247_v59  ;;  %v4154_v6 = vpop.f32.mrb[71].mxu1  ;;  %5904 = vmatmul.mubr.bf16.vlgmr.msra.gmra.mrb[64].mxu0 %v12295_v45  ;;  %6130 = vmatmul.mubr.bf16.vlgmr.msra.gmra.mrb[96].mxu1 %v12295_v45  ;;  %v4227_v25 = vmax.f32 %v4149_v38, 0.0 }
 0x440   : > { %v4155_v9 = vadd.f32 %v4154_v6, %v12257_v57  ;;  %6211 = vmatpush1.bf16.msra.mxu0 %v9879_v56  ;;  %8482 = vmatpush3.bf16.msra.mxu1 %v9883_v37  ;;  %v4228_v1 = vmax.f32 %v4151_v61, 0.0  ;;  %v9915_v61 = vld [vmem:[%s13263_s8 + $0xf8] ss:$28 sps:$4 sm:$0xff]   ;;  %v9902_v6 = vld [vmem:[%s13263_s8 + $0x12c] ss:$28 sps:$4 sm:$0xff]  }
 0x441   : > { %v4231_v40 = vmax.f32 %v4153_v63, 0.0  ;;  %6212 = vmatprep.subr.bf16.mxu0 %v9886_v54  ;;  %8483 = vmatprep.subr.bf16.mxu1 %v9890_v39  ;;  %v9895_v39 = vld [vmem:[%s13263_s8 + $0xf0] ss:$28 sps:$4 sm:$0xff]  }
 0x442   : > { %v4232_v11 = vmax.f32 %v4155_v9, 0.0  ;;  %v9922_v9 = vld [vmem:[%s13263_s8 + $0x2f0] ss:$28 sps:$4 sm:$0xff]  }
 0x443   : > { %v12331_v12 = vpack.c.bf16 %v4231_v40, %v4227_v25 }
 0x444   : > { %v12333_v13 = vpack.c.bf16 %v4232_v11, %v4228_v1  ;;  %v4158_v46 = vpop.f32.mrb[72].mxu1  ;;  %6213 = vmatpush1.bf16.msra.mxu0 %v9884_v51  ;;  %8484 = vmatpush3.bf16.msra.mxu1 %v9891_v55  ;;  %v9923_v1 = vld [vmem:[%s13263_s8 + $0x130] ss:$28 sps:$4 sm:$0xff]  }
 0x445   : > { %v4159_v17 = vadd.f32 %v4158_v46, %v12247_v59  ;;  %v4160_v20 = vpop.f32.mrb[73].mxu1  ;;  %6214 = vmatprep.subr.bf16.mxu0 %v9889_v27  ;;  %8485 = vmatprep.subr.bf16.mxu1 %v9898_v8  ;;  %v9900_v8 = vld [vmem:[%s13263_s8 + $0x128] ss:$28 sps:$4 sm:$0xff]  }
 0x446   : > { %v4161_v58 = vadd.f32 %v4160_v20, %v12257_v57  ;;  %v4162_v52 = vpop.f32.mrb[74].mxu1  ;;  %5913 = vmatprep.mubr.bf16.mxu0 %v12333_v13  ;;  %6139 = vmatprep.mubr.bf16.mxu1 %v12333_v13 }
 0x447   : > { %v4163_v23 = vadd.f32 %v4162_v52, %v12247_v59  ;;  %v4164_v30 = vpop.f32.mrb[75].mxu1  ;;  %5914 = vmatmul.mubr.bf16.gmra.mrb[68].mxu0 %v12331_v12  ;;  %6140 = vmatmul.mubr.bf16.gmra.mrb[100].mxu1 %v12331_v12  ;;  %v4235_v16 = vmax.f32 %v4159_v17, 0.0  ;;  %v9903_v52 = vld [vmem:[%s13263_s8 + $0x160] ss:$28 sps:$4 sm:$0xff]  }
 0x448   : > { %v4165_v34 = vadd.f32 %v4164_v30, %v12257_v57  ;;  %6215 = vmatpush1.bf16.msra.mxu0 %v9887_v15  ;;  %8486 = vmatpush3.bf16.msra.mxu1 %v9899_v4  ;;  %v4236_v56 = vmax.f32 %v4161_v58, 0.0  ;;  %v9905_v15 = vld [vmem:[%s13263_s8 + $0x164] ss:$28 sps:$4 sm:$0xff]  }
 0x449   : > { %v4239_v42 = vmax.f32 %v4163_v23, 0.0  ;;  %6216 = vmatprep.subr.bf16.mxu0 %v9894_v19  ;;  %8487 = vmatprep.subr.bf16.mxu1 %v9906_v22  ;;  %v9930_v4 = vld [vmem:[%s13263_s8 + $0x328] ss:$28 sps:$4 sm:$0xff]  }
 0x44a   : > { %v4240_v37 = vmax.f32 %v4165_v34, 0.0  ;;  %v9931_v23 = vld [vmem:[%s13263_s8 + $0x168] ss:$28 sps:$4 sm:$0xff]  }
 0x44b   : > { %v12367_v38 = vpack.c.bf16 %v4239_v42, %v4235_v16 }
 0x44c   : > { %v12369_v53 = vpack.c.bf16 %v4240_v37, %v4236_v56  ;;  %v4168_v54 = vpop.f32.mrb[76].mxu1  ;;  %6217 = vmatpush1.bf16.msra.mxu0 %v9892_v10  ;;  %8488 = vmatpush3.bf16.msra.mxu1 %v9907_v41  ;;  %v9910_v10 = vld [vmem:[%s13263_s8 + $0x19c] ss:$28 sps:$4 sm:$0xff]  }
 0x44d   : > { %v4169_v62 = vadd.f32 %v4168_v54, %v12247_v59  ;;  %v4170_v63 = vpop.f32.mrb[77].mxu1  ;;  %6218 = vmatprep.subr.bf16.mxu0 %v9897_v43  ;;  %8489 = vmatprep.subr.bf16.mxu1 %v9914_v48  ;;  %v9938_v41 = vld [vmem:[%s13263_s8 + $0x360] ss:$28 sps:$4 sm:$0xff]   ;;  %v9908_v37 = vld [vmem:[%s13263_s8 + $0x198] ss:$28 sps:$4 sm:$0xff]  }
 0x44e   : > { %v4171_v51 = vadd.f32 %v4170_v63, %v12257_v57  ;;  %v4172_v55 = vpop.f32.mrb[78].mxu1  ;;  %5923 = vmatprep.mubr.bf16.mxu0 %v12369_v53  ;;  %6149 = vmatprep.mubr.bf16.mxu1 %v12369_v53  ;;  %v9939_v54 = vld [vmem:[%s13263_s8 + $0x1a0] ss:$28 sps:$4 sm:$0xff]   ;;  %v9946_v63 = vld [vmem:[%s13263_s8 + $0x558] ss:$28 sps:$4 sm:$0xff]  }
 0x44f   : > { %v4173_v25 = vadd.f32 %v4172_v55, %v12247_v59  ;;  %v4174_v40 = vpop.f32.mrb[79].mxu1  ;;  %5924 = vmatmul.mubr.bf16.gmra.mrb[72].mxu0 %v12367_v38  ;;  %6150 = vmatmul.mubr.bf16.gmra.mrb[104].mxu1 %v12367_v38  ;;  %v4243_v11 = vmax.f32 %v4169_v62, 0.0  ;;  %v9913_v62 = vld [vmem:[%s13263_s8 + $0x1d4] ss:$28 sps:$4 sm:$0xff]  }
 0x450   : > { %v4175_v27 = vadd.f32 %v4174_v40, %v12257_v57  ;;  %6219 = vmatpush1.bf16.msra.mxu0 %v9895_v39  ;;  %8490 = vmatpush3.bf16.msra.mxu1 %v9915_v61  ;;  %v4244_v17 = vmax.f32 %v4171_v51, 0.0  ;;  %v9911_v40 = vld [vmem:[%s13263_s8 + $0x1d0] ss:$28 sps:$4 sm:$0xff]  }
 0x451   : > { %v4247_v46 = vmax.f32 %v4173_v25, 0.0  ;;  %6220 = vmatprep.subr.bf16.mxu0 %v9902_v6  ;;  %8491 = vmatprep.subr.bf16.mxu1 %v9922_v9 }
 0x452   : > { %v4248_v20 = vmax.f32 %v4175_v27, 0.0 }
 0x453   : > { %v12403_v19 = vpack.c.bf16 %v4247_v46, %v4243_v11 }
 0x454   : > { %v12405_v22 = vpack.c.bf16 %v4248_v20, %v4244_v17  ;;  %v4178_v58 = vpop.f32.mrb[80].mxu1  ;;  %6221 = vmatpush1.bf16.msra.mxu0 %v9900_v8  ;;  %8492 = vmatpush3.bf16.msra.mxu1 %v9923_v1  ;;  %v9918_v1 = vld [vmem:[%s13263_s8 + $0x20c] ss:$28 sps:$4 sm:$0xff]  }
 0x455   : > { %v4179_v30 = vadd.f32 %v4178_v58, %v12247_v59  ;;  %v4180_v34 = vpop.f32.mrb[81].mxu1  ;;  %6222 = vmatprep.subr.bf16.mxu0 %v9905_v15  ;;  %8493 = vmatprep.subr.bf16.mxu1 %v9930_v4  ;;  %v9916_v20 = vld [vmem:[%s13263_s8 + $0x208] ss:$28 sps:$4 sm:$0xff]  }
 0x456   : > { %v4181_v16 = vadd.f32 %v4180_v34, %v12257_v57  ;;  %v4182_v42 = vpop.f32.mrb[82].mxu1  ;;  %5933 = vmatprep.mubr.bf16.mxu0 %v12405_v22  ;;  %6159 = vmatprep.mubr.bf16.mxu1 %v12405_v22 }
 0x457   : > { %v4183_v43 = vadd.f32 %v4182_v42, %v12247_v59  ;;  %v4184_v48 = vpop.f32.mrb[83].mxu1  ;;  %5934 = vmatmul.mubr.bf16.gmra.mrb[76].mxu0 %v12403_v19  ;;  %6160 = vmatmul.mubr.bf16.gmra.mrb[108].mxu1 %v12403_v19  ;;  %v4251_v39 = vmax.f32 %v4179_v30, 0.0  ;;  %v9919_v42 = vld [vmem:[%s13263_s8 + $0x240] ss:$28 sps:$4 sm:$0xff]  }
 0x458   : > { %v4185_v56 = vadd.f32 %v4184_v48, %v12257_v57  ;;  %6223 = vmatpush1.bf16.msra.mxu0 %v9903_v52  ;;  %8494 = vmatpush3.bf16.msra.mxu1 %v9931_v23  ;;  %v4252_v6 = vmax.f32 %v4181_v16, 0.0  ;;  %v9921_v23 = vld [vmem:[%s13263_s8 + $0x244] ss:$28 sps:$4 sm:$0xff]  }
 0x459   : > { %v4255_v61 = vmax.f32 %v4183_v43, 0.0  ;;  %6224 = vmatprep.subr.bf16.mxu0 %v9910_v10  ;;  %8495 = vmatprep.subr.bf16.mxu1 %v9938_v41 }
 0x45a   : > { %v4256_v9 = vmax.f32 %v4185_v56, 0.0  ;;  %v9926_v56 = vld [vmem:[%s13263_s8 + $0x27c] ss:$28 sps:$4 sm:$0xff]  }
 0x45b   : > { %v12439_v51 = vpack.c.bf16 %v4255_v61, %v4251_v39 }
 0x45c   : > { %v12441_v55 = vpack.c.bf16 %v4256_v9, %v4252_v6  ;;  %v4188_v25 = vpop.f32.mrb[84].mxu1  ;;  %6225 = vmatpush1.bf16.msra.mxu0 %v9908_v37  ;;  %8496 = vmatpush3.bf16.msra.mxu1 %v9939_v54 }
 0x45d   : > { %v4189_v27 = vadd.f32 %v4188_v25, %v12247_v59  ;;  %v4190_v8 = vpop.f32.mrb[85].mxu1  ;;  %6226 = vmatprep.subr.bf16.mxu0 %v9913_v62  ;;  %8545 = vmatprep.subr.bf16.mxu1 %v9946_v63  ;;  %v9924_v63 = vld [vmem:[%s13263_s8 + $0x278] ss:$28 sps:$4 sm:$0xff]  }
 0x45e   : > { %v4191_v11 = vadd.f32 %v4190_v8, %v12257_v57  ;;  %v4192_v46 = vpop.f32.mrb[86].mxu1  ;;  %5943 = vmatprep.mubr.bf16.mxu0 %v12441_v55  ;;  %6169 = vmatprep.mubr.bf16.mxu1 %v12441_v55  ;;  %v9929_v25 = vld [vmem:[%s13263_s8 + $0x2b4] ss:$28 sps:$4 sm:$0xff]  }
 0x45f   : > { %v4193_v15 = vadd.f32 %v4192_v46, %v12247_v59  ;;  %v4194_v4 = vpop.f32.mrb[87].mxu1  ;;  %5944 = vmatmul.mubr.bf16.gmra.mrb[80].mxu0 %v12439_v51  ;;  %6170 = vmatmul.mubr.bf16.gmra.mrb[112].mxu1 %v12439_v51  ;;  %v4259_v58 = vmax.f32 %v4189_v27, 0.0  ;;  %v9927_v46 = vld [vmem:[%s13263_s8 + $0x2b0] ss:$28 sps:$4 sm:$0xff]  }
 0x460   : > { %v4195_v17 = vadd.f32 %v4194_v4, %v12257_v57  ;;  %6227 = vmatpush1.bf16.msra.mxu0 %v9911_v40  ;;  %v4260_v30 = vmax.f32 %v4191_v11, 0.0 }
 0x461   : > { %v4263_v52 = vmax.f32 %v4193_v15, 0.0  ;;  %6228 = vmatprep.subr.bf16.mxu0 %v9918_v1 }
 0x462   : > { %v4264_v34 = vmax.f32 %v4195_v17, 0.0  ;;  %v9934_v17 = vld [vmem:[%s13263_s8 + $0x2ec] ss:$28 sps:$4 sm:$0xff]  }
 0x463   : > { %v12463_v10 = vpack.c.bf16 %v4263_v52, %v4259_v58 }
 0x464   : > { %v12465_v41 = vpack.c.bf16 %v4264_v34, %v4260_v30  ;;  %v4198_v16 = vpop.f32.mrb[88].mxu1  ;;  %6229 = vmatpush1.bf16.msra.mxu0 %v9916_v20  ;;  %v9932_v34 = vld [vmem:[%s13263_s8 + $0x2e8] ss:$28 sps:$4 sm:$0xff]  }
 0x465   : > { %v4199_v43 = vadd.f32 %v4198_v16, %v12247_v59  ;;  %v4200_v48 = vpop.f32.mrb[89].mxu1  ;;  %6230 = vmatprep.subr.bf16.mxu0 %v9921_v23 }
 0x466   : > { %v4201_v37 = vadd.f32 %v4200_v48, %v12257_v57  ;;  %v4202_v54 = vpop.f32.mrb[90].mxu1  ;;  %5953 = vmatprep.mubr.bf16.mxu0 %v12465_v41  ;;  %6179 = vmatprep.mubr.bf16.mxu1 %v12465_v41 }
 0x467   : > { %v4203_v39 = vadd.f32 %v4202_v54, %v12247_v59  ;;  %v4204_v61 = vpop.f32.mrb[91].mxu1  ;;  %5954 = vmatmul.mubr.bf16.gmra.mrb[84].mxu0 %v12463_v10  ;;  %6180 = vmatmul.mubr.bf16.gmra.mrb[116].mxu1 %v12463_v10  ;;  %v4267_v6 = vmax.f32 %v4199_v43, 0.0  ;;  %v9937_v43 = vld [vmem:[%s13263_s8 + $0x324] ss:$28 sps:$4 sm:$0xff]   ;;  %v9942_v54 = vld [vmem:[%s13263_s8 + $0x35c] ss:$28 sps:$4 sm:$0xff]  }
 0x468   : > { %v4205_v62 = vadd.f32 %v4204_v61, %v12257_v57  ;;  %6231 = vmatpush1.bf16.msra.mxu0 %v9919_v42  ;;  %v4268_v40 = vmax.f32 %v4201_v37, 0.0  ;;  %v9945_v61 = vld [vmem:[%s13263_s8 + $0x394] ss:$28 sps:$4 sm:$0xff]  }
 0x469   : > { %v4271_v9 = vmax.f32 %v4203_v39, 0.0  ;;  %6232 = vmatprep.subr.bf16.mxu0 %v9926_v56  ;;  %v9940_v39 = vld [vmem:[%s13263_s8 + $0x358] ss:$28 sps:$4 sm:$0xff]  }
 0x46a   : > { %v4272_v27 = vmax.f32 %v4205_v62, 0.0  ;;  %v9943_v62 = vld [vmem:[%s13263_s8 + $0x390] ss:$28 sps:$4 sm:$0xff]  }
 0x46b   : > { %v12487_v8 = vpack.c.bf16 %v4271_v9, %v4267_v6  ;;  %v9950_v6 = vld [vmem:[%s13263_s8 + $0x3cc] ss:$28 sps:$4 sm:$0xff]  }
 0x46c   : > { %v12489_v1 = vpack.c.bf16 %v4272_v27, %v4268_v40  ;;  %v4208_v11 = vpop.f32.mrb[92].mxu1  ;;  %6233 = vmatpush1.bf16.msra.mxu0 %v9924_v63  ;;  %v9947_v63 = vld [vmem:[%s13263_s8 + $0x398] ss:$28 sps:$4 sm:$0xff]   ;;  %v9948_v9 = vld [vmem:[%s13263_s8 + $0x3c8] ss:$28 sps:$4 sm:$0xff]  }
 0x46d   : > { %v4209_v15 = vadd.f32 %v4208_v11, %v12247_v59  ;;  %v4210_v4 = vpop.f32.mrb[93].mxu1  ;;  %6234 = vmatprep.subr.bf16.mxu0 %v9929_v25  ;;  %v9953_v25 = vld [vmem:[%s13263_s8 + $0x404] ss:$28 sps:$4 sm:$0xff]   ;;  %v9955_v40 = vld [vmem:[%s13263_s8 + $0x3d0] ss:$28 sps:$4 sm:$0xff]  }
 0x46e   : > { %v4211_v20 = vadd.f32 %v4210_v4, %v12257_v57  ;;  %v4212_v58 = vpop.f32.mrb[94].mxu1  ;;  %5963 = vmatprep.mubr.bf16.mxu0 %v12489_v1  ;;  %6189 = vmatprep.mubr.bf16.mxu1 %v12489_v1  ;;  %v9958_v27 = vld [vmem:[%s13263_s8 + $0x43c] ss:$28 sps:$4 sm:$0xff]   ;;  %v9963_v11 = vld [vmem:[%s13263_s8 + $0x408] ss:$28 sps:$4 sm:$0xff]  }
 0x46f   : > { %v4213_v52 = vadd.f32 %v4212_v58, %v12247_v59  ;;  %v4214_v23 = vpop.f32.mrb[95].mxu1  ;;  %5964 = vmatmul.mubr.bf16.gmra.mrb[88].mxu0 %v12487_v8  ;;  %6190 = vmatmul.mubr.bf16.gmra.mrb[120].mxu1 %v12487_v8  ;;  %v4275_v16 = vmax.f32 %v4209_v15, 0.0  ;;  %v9956_v15 = vld [vmem:[%s13263_s8 + $0x438] ss:$28 sps:$4 sm:$0xff]  }
 0x470   : > { %v4215_v30 = vadd.f32 %v4214_v23, %v12257_v57  ;;  %6235 = vmatpush1.bf16.msra.mxu0 %v9927_v46  ;;  %v4276_v59 = vmax.f32 %v4211_v20, 0.0  ;;  %v9935_v57 = vld [vmem:[%s13263_s8 + $0x320] ss:$28 sps:$4 sm:$0xff]   ;;  %v9961_v4 = vld [vmem:[%s13263_s8 + $0x474] ss:$28 sps:$4 sm:$0xff]  }
 0x471   : > { %v4279_v42 = vmax.f32 %v4213_v52, 0.0  ;;  %6236 = vmatprep.subr.bf16.mxu0 %v9934_v17  ;;  %v9970_v46 = vld [vmem:[%s13263_s8 + $0x600] ss:$28 sps:$4 sm:$0xff]   ;;  %v9959_v17 = vld [vmem:[%s13263_s8 + $0x470] ss:$28 sps:$4 sm:$0xff]  }
 0x472   : > { %v4280_v48 = vmax.f32 %v4215_v30, 0.0  ;;  %v9978_v20 = vld [vmem:[%s13263_s8 + $0x638] ss:$28 sps:$4 sm:$0xff]   ;;  %v9964_v52 = vld [vmem:[%s13263_s8 + $0x4a8] ss:$28 sps:$4 sm:$0xff]  }
 0x473   : > { %v12511_v56 = vpack.c.bf16 %v4279_v42, %v4275_v16  ;;  %v9979_v58 = vld [vmem:[%s13263_s8 + $0x478] ss:$28 sps:$4 sm:$0xff]   ;;  %v9986_v23 = vld [vmem:[%s13263_s8 + $0x670] ss:$28 sps:$4 sm:$0xff]   ;;  %v9967_v30 = vld [vmem:[%s13263_s8 + $0x4e0] ss:$28 sps:$4 sm:$0xff]  }
 0x474   : > { %v12513_v37 = vpack.c.bf16 %v4280_v48, %v4276_v59  ;;  %6237 = vmatpush1.bf16.msra.mxu0 %v9932_v34  ;;  %v9974_v34 = vld [vmem:[%s13263_s8 + $0x51c] ss:$28 sps:$4 sm:$0xff]   ;;  %v9994_v16 = vld [vmem:[%s13263_s8 + $0x6a8] ss:$28 sps:$4 sm:$0xff]   ;;  %v9975_v59 = vld [vmem:[%s13263_s8 + $0x550] ss:$28 sps:$4 sm:$0xff]  }
 0x475   : > { %6238 = vmatprep.subr.bf16.mxu0 %v9937_v43  ;;  %v9972_v42 = vld [vmem:[%s13263_s8 + $0x518] ss:$28 sps:$4 sm:$0xff]   ;;  %v10002_v48 = vld [vmem:[%s13263_s8 + $0x6e0] ss:$28 sps:$4 sm:$0xff]  }
 0x476   : > { %5973 = vmatprep.mubr.bf16.mxu0 %v12513_v37  ;;  %6199 = vmatprep.mubr.bf16.mxu1 %v12513_v37  ;;  %v9977_v43 = vld [vmem:[%s13263_s8 + $0x554] ss:$28 sps:$4 sm:$0xff]  }
 0x477   : > { %5974 = vmatmul.mubr.bf16.gmra.mrb[92].mxu0 %v12511_v56  ;;  %6200 = vmatmul.mubr.bf16.gmra.mrb[124].mxu1 %v12511_v56 }
 0x478   : > { %6239 = vmatpush1.bf16.msra.mxu0 %v9935_v57  ;;  %6242 = vmatprep.mubr.bf16.mxu0 %v12001_v44  ;;  %v10003_v57 = vld [vmem:[%s13263_s8 + $0x520] ss:$28 sps:$4 sm:$0xff]  }
 0x479   : > { %6468 = vmatprep.mubr.bf16.mxu1 %v12001_v44  ;;  %6240 = vmatprep.subr.bf16.mxu0 %v9942_v54  ;;  %v9954_v44 = vld [vmem:[%s13263_s8 + $0x590] ss:$28 sps:$4 sm:$0xff]   ;;  %v9980_v54 = vld [vmem:[%s13263_s8 + $0x588] ss:$28 sps:$4 sm:$0xff]  }
 0x47c   : > { %6241 = vmatpush1.bf16.msra.mxu0 %v9940_v39  ;;  %v9985_v39 = vld [vmem:[%s13263_s8 + $0x5c4] ss:$28 sps:$4 sm:$0xff]  }
 0x47d   : > { %6323 = vmatprep.subr.bf16.mxu0 %v9945_v61  ;;  %v9990_v61 = vld [vmem:[%s13263_s8 + $0x5fc] ss:$28 sps:$4 sm:$0xff]  }
 0x47f   : > { %6243 = vmatmul.mubr.bf16.vlgmr.msra.gmra.mrb[96].mxu0 %v11999_v29  ;;  %6469 = vmatmul.mubr.bf16.vlgmr.msra.gmra.mrb[128].mxu1 %v11999_v29  ;;  %v9962_v29 = vld [vmem:[%s13263_s8 + $0x5c8] ss:$28 sps:$4 sm:$0xff]  }
 0x480   : > { %6252 = vmatprep.mubr.bf16.mxu0 %v12037_v28  ;;  %6324 = vmatpush1.bf16.msra.mxu0 %v9943_v62  ;;  %v9993_v62 = vld [vmem:[%s13263_s8 + $0x634] ss:$28 sps:$4 sm:$0xff]  }
 0x481   : > { %6476 = vmatprep.mubr.bf16.mxu1 %v12037_v28  ;;  %8546 = vmatpush3.bf16.msra.mxu1 %v9947_v63  ;;  %v9951_v28 = vld [vmem:[%s13263_s8 + $0x400] ss:$28 sps:$4 sm:$0xff]   ;;  %v9991_v63 = vld [vmem:[%s13263_s8 + $0x630] ss:$28 sps:$4 sm:$0xff]  }
 0x482   : > { %6325 = vmatprep.subr.bf16.mxu0 %v9950_v6  ;;  %8547 = vmatprep.subr.bf16.mxu1 %v9954_v44  ;;  %v10001_v6 = vld [vmem:[%s13263_s8 + $0x6a4] ss:$28 sps:$4 sm:$0xff]  }
 0x483   : > { %v9999_v44 = vld [vmem:[%s13263_s8 + $0x6a0] ss:$28 sps:$4 sm:$0xff]  }
 0x484   : > { %6326 = vmatpush1.bf16.msra.mxu0 %v9948_v9 }
 0x485   : > { %6327 = vmatprep.subr.bf16.mxu0 %v9953_v25  ;;  %8548 = vmatpush3.bf16.msra.mxu1 %v9955_v40 }
 0x486   : > { %8549 = vmatprep.subr.bf16.mxu1 %v9962_v29 }
 0x487   : > { %6253 = vmatmul.mubr.bf16.gmra.mrb[100].mxu0 %v12035_v24  ;;  %6477 = vmatmul.mubr.bf16.gmra.mrb[132].mxu1 %v12035_v24  ;;  %v9971_v24 = vld [vmem:[%s13263_s8 + $0x440] ss:$28 sps:$4 sm:$0xff]  }
 0x488   : > { %6262 = vmatprep.mubr.bf16.mxu0 %v12073_v18  ;;  %6328 = vmatpush1.bf16.msra.mxu0 %v9951_v28 }
 0x489   : > { %6484 = vmatprep.mubr.bf16.mxu1 %v12073_v18  ;;  %6329 = vmatprep.subr.bf16.mxu0 %v9958_v27  ;;  %v9966_v18 = vld [vmem:[%s13263_s8 + $0x4ac] ss:$28 sps:$4 sm:$0xff]  }
 0x48a   : > { %8550 = vmatpush3.bf16.msra.mxu1 %v9963_v11 }
 0x48b   : > { %8551 = vmatprep.subr.bf16.mxu1 %v9970_v46 }
 0x48c   : > { %6330 = vmatpush1.bf16.msra.mxu0 %v9956_v15 }
 0x48d   : > { %6331 = vmatprep.subr.bf16.mxu0 %v9961_v4 }
 0x48e   : > { %8552 = vmatpush3.bf16.msra.mxu1 %v9971_v24 }
 0x48f   : > { %6263 = vmatmul.mubr.bf16.gmra.mrb[104].mxu0 %v12071_v60  ;;  %6485 = vmatmul.mubr.bf16.gmra.mrb[136].mxu1 %v12071_v60  ;;  %v9969_v60 = vld [vmem:[%s13263_s8 + $0x4e4] ss:$28 sps:$4 sm:$0xff]  }
 0x490   : > { %6272 = vmatprep.mubr.bf16.mxu0 %v12109_v14  ;;  %6332 = vmatpush1.bf16.msra.mxu0 %v9959_v17 }
 0x491   : > { %6492 = vmatprep.mubr.bf16.mxu1 %v12109_v14  ;;  %6333 = vmatprep.subr.bf16.mxu0 %v9966_v18  ;;  %v9987_v14 = vld [vmem:[%s13263_s8 + $0x4b0] ss:$28 sps:$4 sm:$0xff]  }
 0x492   : > { %8553 = vmatprep.subr.bf16.mxu1 %v9978_v20 }
 0x493   : > { %8554 = vmatpush3.bf16.msra.mxu1 %v9979_v58 }
 0x494   : > { %6334 = vmatpush1.bf16.msra.mxu0 %v9964_v52  ;;  %8555 = vmatprep.subr.bf16.mxu1 %v9986_v23 }
 0x495   : > { %6335 = vmatprep.subr.bf16.mxu0 %v9969_v60 }
 0x497   : > { %6273 = vmatmul.mubr.bf16.gmra.mrb[108].mxu0 %v12107_v26  ;;  %6493 = vmatmul.mubr.bf16.gmra.mrb[140].mxu1 %v12107_v26  ;;  %v9995_v26 = vld [vmem:[%s13263_s8 + $0x4e8] ss:$28 sps:$4 sm:$0xff]  }
 0x498   : > { %6282 = vmatprep.mubr.bf16.mxu0 %v12145_v5  ;;  %6336 = vmatpush1.bf16.msra.mxu0 %v9967_v30 }
 0x499   : > { %6500 = vmatprep.mubr.bf16.mxu1 %v12145_v5  ;;  %6337 = vmatprep.subr.bf16.mxu0 %v9974_v34  ;;  %v9982_v5 = vld [vmem:[%s13263_s8 + $0x58c] ss:$28 sps:$4 sm:$0xff]  }
 0x49a   : > { %8556 = vmatpush3.bf16.msra.mxu1 %v9987_v14 }
 0x49b   : > { %8557 = vmatprep.subr.bf16.mxu1 %v9994_v16 }
 0x49c   : > { %6338 = vmatpush1.bf16.msra.mxu0 %v9972_v42 }
 0x49d   : > { %6339 = vmatprep.subr.bf16.mxu0 %v9977_v43 }
 0x49e   : > { %8558 = vmatpush3.bf16.msra.mxu1 %v9995_v26 }
 0x49f   : > { %6283 = vmatmul.mubr.bf16.gmra.mrb[112].mxu0 %v12143_v49  ;;  %6501 = vmatmul.mubr.bf16.gmra.mrb[144].mxu1 %v12143_v49  ;;  %v9983_v49 = vld [vmem:[%s13263_s8 + $0x5c0] ss:$28 sps:$4 sm:$0xff]  }
 0x4a0   : > { %6292 = vmatprep.mubr.bf16.mxu0 %v12181_v0  ;;  %6340 = vmatpush1.bf16.msra.mxu0 %v9975_v59 }
 0x4a1   : > { %6508 = vmatprep.mubr.bf16.mxu1 %v12181_v0  ;;  %6341 = vmatprep.subr.bf16.mxu0 %v9982_v5  ;;  %v9988_v0 = vld [vmem:[%s13263_s8 + $0x5f8] ss:$28 sps:$4 sm:$0xff]  }
 0x4a2   : > { %8559 = vmatprep.subr.bf16.mxu1 %v10002_v48 }
 0x4a3   : > { %8560 = vmatpush3.bf16.msra.mxu1 %v10003_v57 }
 0x4a4   : > { %6342 = vmatpush1.bf16.msra.mxu0 %v9980_v54 }
 0x4a5   : > { %6343 = vmatprep.subr.bf16.mxu0 %v9985_v39 }
 0x4a7   : > { %6293 = vmatmul.mubr.bf16.gmra.mrb[116].mxu0 %v12179_v7  ;;  %6509 = vmatmul.mubr.bf16.gmra.mrb[148].mxu1 %v12179_v7  ;;  %v9998_v7 = vld [vmem:[%s13263_s8 + $0x66c] ss:$28 sps:$4 sm:$0xff]  }
 0x4a8   : > { %6302 = vmatprep.mubr.bf16.mxu0 %v12217_v21  ;;  %6344 = vmatpush1.bf16.msra.mxu0 %v9983_v49 }
 0x4a9   : > { %6516 = vmatprep.mubr.bf16.mxu1 %v12217_v21  ;;  %6345 = vmatprep.subr.bf16.mxu0 %v9990_v61  ;;  %v9996_v21 = vld [vmem:[%s13263_s8 + $0x668] ss:$28 sps:$4 sm:$0xff]  }
 0x4ac   : > { %6346 = vmatpush1.bf16.msra.mxu0 %v9988_v0 }
 0x4ad   : > { %6347 = vmatprep.subr.bf16.mxu0 %v9993_v62 }
 0x4af   : > { %6303 = vmatmul.mubr.bf16.gmra.mrb[120].mxu0 %v12215_v47  ;;  %6517 = vmatmul.mubr.bf16.gmra.mrb[152].mxu1 %v12215_v47  ;;  %v10006_v47 = vld [vmem:[%s13263_s8 + $0x6dc] ss:$28 sps:$4 sm:$0xff]  }
 0x4b0   : > { %6312 = vmatprep.mubr.bf16.mxu0 %v12261_v3  ;;  %6348 = vmatpush1.bf16.msra.mxu0 %v9991_v63 }
 0x4b1   : > { %6524 = vmatprep.mubr.bf16.mxu1 %v12261_v3  ;;  %6349 = vmatprep.subr.bf16.mxu0 %v9998_v7  ;;  %v10004_v3 = vld [vmem:[%s13263_s8 + $0x6d8] ss:$28 sps:$4 sm:$0xff]  }
 0x4b4   : > { %6350 = vmatpush1.bf16.msra.mxu0 %v9996_v21 }
 0x4b5   : > { %6351 = vmatprep.subr.bf16.mxu0 %v10001_v6 }
 0x4b7   : > { %6313 = vmatmul.mubr.bf16.gmra.mrb[124].mxu0 %v12259_v2  ;;  %6525 = vmatmul.mubr.bf16.gmra.mrb[156].mxu1 %v12259_v2  ;;  %v4569_v2 = vld [vmem:[%s13264_s9] sm:$0x7f] }
 0x4b8   : > { %6352 = vmatpush1.bf16.msra.mxu0 %v9999_v44  ;;  %6355 = vmatprep.mubr.bf16.mxu0 %v12297_v50 }
 0x4b9   : > { %6565 = vmatprep.mubr.bf16.mxu1 %v12297_v50  ;;  %6353 = vmatprep.subr.bf16.mxu0 %v10006_v47  ;;  %v12740_v50 = vrot.slane %v4569_v2, %v11271_v33 }
 0x4bc   : > { %6354 = vmatpush1.bf16.msra.mxu0 %v10004_v3 }
 0x4bf   : > { %6356 = vmatmul.mubr.bf16.vlgmr.msra.gmra.mrb[96].mxu0 %v12295_v45  ;;  %6566 = vmatmul.mubr.bf16.vlgmr.msra.gmra.mrb[160].mxu1 %v12295_v45  ;;  %v12737_v45 = vrot.slane %v4569_v2, %v11268_v32 }
 0x4c0   : > { %6365 = vmatprep.mubr.bf16.mxu0 %v12333_v13  ;;  %6573 = vmatprep.mubr.bf16.mxu1 %v12333_v13  ;;  %v12746_v13 = vrot.slane %v4569_v2, %v11280_v36 }
 0x4c7   : > { %6366 = vmatmul.mubr.bf16.gmra.mrb[100].mxu0 %v12331_v12  ;;  %6574 = vmatmul.mubr.bf16.gmra.mrb[164].mxu1 %v12331_v12  ;;  %v12743_v12 = vrot.slane %v4569_v2, %v11277_v35 }
 0x4c8   : > { %6375 = vmatprep.mubr.bf16.mxu0 %v12369_v53  ;;  %6581 = vmatprep.mubr.bf16.mxu1 %v12369_v53 }
 0x4cf   : > { %6376 = vmatmul.mubr.bf16.gmra.mrb[104].mxu0 %v12367_v38  ;;  %6582 = vmatmul.mubr.bf16.gmra.mrb[168].mxu1 %v12367_v38 }
 0x4d0   : > { %6385 = vmatprep.mubr.bf16.mxu0 %v12405_v22  ;;  %6589 = vmatprep.mubr.bf16.mxu1 %v12405_v22 }
 0x4d7   : > { %6386 = vmatmul.mubr.bf16.gmra.mrb[108].mxu0 %v12403_v19  ;;  %6590 = vmatmul.mubr.bf16.gmra.mrb[172].mxu1 %v12403_v19 }
 0x4d8   : > { %6395 = vmatprep.mubr.bf16.mxu0 %v12441_v55  ;;  %6597 = vmatprep.mubr.bf16.mxu1 %v12441_v55 }
 0x4df   : > { %6396 = vmatmul.mubr.bf16.gmra.mrb[112].mxu0 %v12439_v51  ;;  %6598 = vmatmul.mubr.bf16.gmra.mrb[176].mxu1 %v12439_v51 }
 0x4e0   : > { %6405 = vmatprep.mubr.bf16.mxu0 %v12465_v41  ;;  %6605 = vmatprep.mubr.bf16.mxu1 %v12465_v41 }
 0x4e7   : > { %6406 = vmatmul.mubr.bf16.gmra.mrb[116].mxu0 %v12463_v10  ;;  %6606 = vmatmul.mubr.bf16.gmra.mrb[180].mxu1 %v12463_v10 }
 0x4e8   : > { %6415 = vmatprep.mubr.bf16.mxu0 %v12489_v1  ;;  %6613 = vmatprep.mubr.bf16.mxu1 %v12489_v1 }
 0x4ef   : > { %6416 = vmatmul.mubr.bf16.gmra.mrb[120].mxu0 %v12487_v8  ;;  %6614 = vmatmul.mubr.bf16.gmra.mrb[184].mxu1 %v12487_v8 }
 0x4f0   : > { %6425 = vmatprep.mubr.bf16.mxu0 %v12513_v37  ;;  %6621 = vmatprep.mubr.bf16.mxu1 %v12513_v37 }
 0x4f7   : > { %6426 = vmatmul.mubr.bf16.gmra.mrb[124].mxu0 %v12511_v56  ;;  %6622 = vmatmul.mubr.bf16.gmra.mrb[188].mxu1 %v12511_v56 }
 0x512   : > { %v5905_v38 = vpop.f32.mrb[64].mxu0  ;;  %v6131_v53 = vpop.f32.mrb[96].mxu1 }
 0x513   : > { %v8705_v19 = vadd.f32 %v5905_v38, %v12737_v45  ;;  %v8737_v22 = vadd.f32 %v6131_v53, %v12740_v50  ;;  %v5907_v51 = vpop.f32.mrb[65].mxu0  ;;  %v6133_v55 = vpop.f32.mrb[97].mxu1 }
 0x514   : > { %v8706_v32 = vadd.f32 %v5907_v51, %v12743_v12  ;;  %v8738_v10 = vadd.f32 %v6133_v55, %v12746_v13  ;;  %v5909_v33 = vpop.f32.mrb[66].mxu0  ;;  %v6135_v41 = vpop.f32.mrb[98].mxu1 }
 0x515   : > { %v6630_v8 = vmul.f32 0.5, %v8705_v19  ;;  %v6632_v35 = vmul.f32 0.5, %v8737_v22  ;;  %v8707_v1 = vadd.f32 %v5909_v33, %v12737_v45  ;;  %v8739_v36 = vadd.f32 %v6135_v41, %v12740_v50  ;;  %v5911_v56 = vpop.f32.mrb[67].mxu0  ;;  %v6137_v37 = vpop.f32.mrb[99].mxu1 }
 0x516   : > { %v6631_v9 = vmul.f32 0.5, %v8706_v32  ;;  %v6633_v25 = vmul.f32 0.5, %v8738_v10  ;;  %v8708_v40 = vadd.f32 %v5911_v56, %v12743_v12  ;;  %v8740_v29 = vadd.f32 %v6137_v37, %v12746_v13 }
 0x517   : > { %10039 = vtanh.f32 %v6630_v8  ;;  %v6637_v28 = vmul.f32 0.5, %v8707_v1  ;;  %v6639_v27 = vmul.f32 0.5, %v8739_v36 }
 0x518   : > { %10041 = vtanh.f32 %v6632_v35  ;;  %v6638_v11 = vmul.f32 0.5, %v8708_v40  ;;  %v6640_v46 = vmul.f32 0.5, %v8740_v29 }
 0x519   : > { %10043 = vtanh.f32 %v6631_v9 }
 0x51a   : > { %10045 = vtanh.f32 %v6633_v25  ;;  %v5915_v15 = vpop.f32.mrb[68].mxu0  ;;  %v6141_v4 = vpop.f32.mrb[100].mxu1 }
 0x51b   : > { %10047 = vtanh.f32 %v6637_v28  ;;  %v8709_v24 = vadd.f32 %v5915_v15, %v12737_v45  ;;  %v8741_v17 = vadd.f32 %v6141_v4, %v12740_v50  ;;  %v5917_v18 = vpop.f32.mrb[69].mxu0  ;;  %v6143_v20 = vpop.f32.mrb[101].mxu1 }
 0x51c   : > { %10049 = vtanh.f32 %v6639_v27  ;;  %v8710_v58 = vadd.f32 %v5917_v18, %v12743_v12  ;;  %v8742_v52 = vadd.f32 %v6143_v20, %v12746_v13  ;;  %v5919_v23 = vpop.f32.mrb[70].mxu0  ;;  %v6145_v60 = vpop.f32.mrb[102].mxu1 }
 0x51d   : > { %10051 = vtanh.f32 %v6638_v11  ;;  %v6644_v30 = vmul.f32 0.5, %v8709_v24  ;;  %v6646_v34 = vmul.f32 0.5, %v8741_v17  ;;  %v8711_v14 = vadd.f32 %v5919_v23, %v12737_v45  ;;  %v5921_v16 = vpop.f32.mrb[71].mxu0  ;;  %v6147_v42 = vpop.f32.mrb[103].mxu1 }
 0x51e   : > { %10053 = vtanh.f32 %v6640_v46  ;;  %v6645_v43 = vmul.f32 0.5, %v8710_v58  ;;  %v6647_v26 = vmul.f32 0.5, %v8742_v52  ;;  %v8743_v59 = vadd.f32 %v6145_v60, %v12740_v50 }
 0x51f   : > { %10055 = vtanh.f32 %v6644_v30  ;;  %v6651_v5 = vmul.f32 0.5, %v8711_v14  ;;  %v8712_v48 = vadd.f32 %v5921_v16, %v12743_v12  ;;  %v8744_v57 = vadd.f32 %v6147_v42, %v12746_v13 }
 0x520   : > { %10057 = vtanh.f32 %v6646_v34  ;;  %v6653_v54 = vmul.f32 0.5, %v8743_v59 }
 0x521   : > { %v10040_v39 = vpop.eup %10039  ;;  %10059 = vtanh.f32 %v6645_v43  ;;  %v6652_v49 = vmul.f32 0.5, %v8712_v48  ;;  %v6654_v62 = vmul.f32 0.5, %v8744_v57 }
 0x522   : > { %v10042_v61 = vpop.eup %10041  ;;  %v6854_v0 = vadd.f32 1.0, %v10040_v39  ;;  %10061 = vtanh.f32 %v6647_v26  ;;  %v5925_v63 = vpop.f32.mrb[72].mxu0 }
 0x523   : > { %v6151_v7 = vpop.f32.mrb[104].mxu1  ;;  %v10044_v21 = vpop.eup %10043  ;;  %v6856_v6 = vadd.f32 1.0, %v10042_v61  ;;  %10063 = vtanh.f32 %v6651_v5  ;;  %v8713_v44 = vadd.f32 %v5925_v63, %v12737_v45 }
 0x524   : > { %v8745_v47 = vadd.f32 %v6151_v7, %v12740_v50  ;;  %v5927_v3 = vpop.f32.mrb[73].mxu0  ;;  %v6153_v2 = vpop.f32.mrb[105].mxu1  ;;  %v6966_v53 = vmul.f32 0.5, %v6854_v0  ;;  %v6855_v19 = vadd.f32 1.0, %v10044_v21  ;;  %10065 = vtanh.f32 %v6653_v54 }
 0x525   : > { %v10046_v38 = vpop.eup %10045  ;;  %v8714_v22 = vadd.f32 %v5927_v3, %v12743_v12  ;;  %v5929_v51 = vpop.f32.mrb[74].mxu0  ;;  %v6968_v10 = vmul.f32 0.5, %v6856_v6  ;;  %10067 = vtanh.f32 %v6652_v49  ;;  %v6658_v41 = vmul.f32 0.5, %v8713_v44 }
 0x526   : > { %v6155_v55 = vpop.f32.mrb[106].mxu1  ;;  %v10048_v32 = vpop.eup %10047  ;;  %v6857_v33 = vadd.f32 1.0, %v10046_v38  ;;  %v6967_v36 = vmul.f32 0.5, %v6855_v19  ;;  %10069 = vtanh.f32 %v6654_v62  ;;  %v6660_v37 = vmul.f32 0.5, %v8745_v47 }
 0x527   : > { %v5931_v8 = vpop.f32.mrb[75].mxu0  ;;  %v12767_v35 = vpop.f32.mrb[107].mxu1  ;;  %v6861_v56 = vadd.f32 1.0, %v10048_v32  ;;  %10071 = vtanh.f32 %v6658_v41  ;;  %v6659_v29 = vmul.f32 0.5, %v8714_v22  ;;  %v8746_v52 = vadd.f32 %v6153_v2, %v12746_v13 }
 0x528   : > { %v10050_v1 = vpop.eup %10049  ;;  %v6969_v25 = vmul.f32 0.5, %v6857_v33  ;;  %v8376_v27 = vpack.c.bf16 %v6967_v36, %v6966_v53  ;;  %10073 = vtanh.f32 %v6660_v37  ;;  %v8715_v23 = vadd.f32 %v5929_v51, %v12737_v45 }
 0x529   : > { %v10052_v9 = vpop.eup %10051  ;;  %v6863_v40 = vadd.f32 1.0, %v10050_v1  ;;  %v6973_v11 = vmul.f32 0.5, %v6861_v56  ;;  %10075 = vtanh.f32 %v6659_v29  ;;  %v8747_v42 = vadd.f32 %v6155_v55, %v12740_v50 }
 0x52a   : > { %v10054_v28 = vpop.eup %10053  ;;  %v6862_v46 = vadd.f32 1.0, %v10052_v9  ;;  %v8377_v4 = vpack.c.bf16 %v6969_v25, %v6968_v10  ;;  %7430 = vst [vmem:[%s12774_s1] sm:$0xff] %v8376_v27  ;;  %v5935_v60 = vpop.f32.mrb[76].mxu0  ;;  %v8716_v43 = vadd.f32 %v5931_v8, %v12743_v12  ;;  %v6661_v39 = vmul.f32 0.5, %v8746_v52 }
 0x52b   : > { %v10056_v15 = vpop.eup %10055  ;;  %v6975_v24 = vmul.f32 0.5, %v6863_v40  ;;  %v6864_v17 = vadd.f32 1.0, %v10054_v28  ;;  %v6161_v30 = vpop.f32.mrb[108].mxu1  ;;  %v6665_v21 = vmul.f32 0.5, %v8715_v23  ;;  %v6667_v38 = vmul.f32 0.5, %v8747_v42 }
 0x52c   : > { %v10058_v18 = vpop.eup %10057  ;;  %v6974_v20 = vmul.f32 0.5, %v6862_v46  ;;  %v6868_v58 = vadd.f32 1.0, %v10056_v15  ;;  %7431 = vst [vmem:[%s12774_s1 + $0x8] sm:$0xff] %v8377_v4  ;;  %v5937_v26 = vpop.f32.mrb[77].mxu0  ;;  %10077 = vtanh.f32 %v6661_v39  ;;  %v6666_v51 = vmul.f32 0.5, %v8716_v43 }
 0x52d   : > { %v10060_v34 = vpop.eup %10059  ;;  %v6976_v14 = vmul.f32 0.5, %v6864_v17  ;;  %v6870_v16 = vadd.f32 1.0, %v10058_v18  ;;  %v12782_v59 = vpop.f32.mrb[109].mxu1  ;;  %10079 = vtanh.f32 %v6665_v21  ;;  %v8748_v25 = vadd.f32 %v12767_v35, %v12746_v13 }
 0x52e   : > { %v10062_v5 = vpop.eup %10061  ;;  %v8380_v48 = vpack.c.bf16 %v6974_v20, %v6973_v11  ;;  %v6980_v57 = vmul.f32 0.5, %v6868_v58  ;;  %v6869_v54 = vadd.f32 1.0, %v10060_v34  ;;  %v12784_v49 = vpop.f32.mrb[78].mxu0  ;;  %10081 = vtanh.f32 %v6667_v38 }
 0x52f   : > { %v12786_v61 = vpop.f32.mrb[110].mxu1  ;;  %v10064_v0 = vpop.eup %10063  ;;  %v8381_v62 = vpack.c.bf16 %v6976_v14, %v6975_v24  ;;  %v6982_v63 = vmul.f32 0.5, %v6870_v16  ;;  %v6871_v7 = vadd.f32 1.0, %v10062_v5  ;;  %10083 = vtanh.f32 %v6666_v51 }
 0x530   : > { %v5941_v6 = vpop.f32.mrb[79].mxu0  ;;  %v12788_v44 = vpop.f32.mrb[111].mxu1  ;;  %7435 = vst [vmem:[%s12774_s1 + $0x1c] sm:$0xff] %v8380_v48  ;;  %v6981_v3 = vmul.f32 0.5, %v6869_v54  ;;  %v6875_v2 = vadd.f32 1.0, %v10064_v0  ;;  %v8717_v40 = vadd.f32 %v5935_v60, %v12737_v45  ;;  %v8749_v15 = vadd.f32 %v6161_v30, %v12740_v50 }
 0x531   : > { %v10066_v47 = vpop.eup %10065  ;;  %7436 = vst [vmem:[%s12774_s1 + $0x24] sm:$0xff] %v8381_v62  ;;  %v6983_v19 = vmul.f32 0.5, %v6871_v7  ;;  %v8718_v4 = vadd.f32 %v5937_v26, %v12743_v12  ;;  %v6668_v58 = vmul.f32 0.5, %v8748_v25  ;;  %v8750_v5 = vadd.f32 %v12782_v59, %v12746_v13 }
 0x532   : > { %v10068_v53 = vpop.eup %10067  ;;  %v6877_v22 = vadd.f32 1.0, %v10066_v47  ;;  %v8384_v32 = vpack.c.bf16 %v6981_v3, %v6980_v57  ;;  %v6987_v10 = vmul.f32 0.5, %v6875_v2  ;;  %v5945_v29 = vpop.f32.mrb[80].mxu0  ;;  %v6672_v14 = vmul.f32 0.5, %v8717_v40 }
 0x533   : > { %v10070_v55 = vpop.eup %10069  ;;  %v6876_v33 = vadd.f32 1.0, %v10068_v53  ;;  %v8385_v8 = vpack.c.bf16 %v6983_v19, %v6982_v63  ;;  %v6171_v28 = vpop.f32.mrb[112].mxu1  ;;  %v6674_v16 = vmul.f32 0.5, %v8749_v15  ;;  %10085 = vtanh.f32 %v6668_v58 }
 0x534   : > { %v10072_v41 = vpop.eup %10071  ;;  %v6989_v1 = vmul.f32 0.5, %v6877_v22  ;;  %v6878_v36 = vadd.f32 1.0, %v10070_v55  ;;  %7439 = vst [vmem:[%s12774_s1 + $0x38] sm:$0xff] %v8384_v32  ;;  %v12799_v24 = vpop.f32.mrb[81].mxu0  ;;  %v6673_v26 = vmul.f32 0.5, %v8718_v4  ;;  %10087 = vtanh.f32 %v6672_v14 }
 0x535   : > { %v10074_v56 = vpop.eup %10073  ;;  %v6988_v37 = vmul.f32 0.5, %v6876_v33  ;;  %v6882_v9 = vadd.f32 1.0, %v10072_v41  ;;  %7440 = vst [vmem:[%s12774_s1 + $0x40] sm:$0xff] %v8385_v8  ;;  %v12801_v17 = vpop.f32.mrb[113].mxu1  ;;  %v8719_v48 = vadd.f32 %v12784_v49, %v12737_v45  ;;  %v8751_v57 = vadd.f32 %v12786_v61, %v12740_v50 }
 0x536   : > { %v10076_v27 = vpop.eup %10075  ;;  %v6990_v11 = vmul.f32 0.5, %v6878_v36  ;;  %v6884_v46 = vadd.f32 1.0, %v10074_v56  ;;  %v5949_v52 = vpop.f32.mrb[82].mxu0  ;;  %v8720_v54 = vadd.f32 %v5941_v6, %v12743_v12  ;;  %10089 = vtanh.f32 %v6674_v16 }
 0x537   : > { %v8388_v18 = vpack.c.bf16 %v6988_v37, %v6987_v10  ;;  %v6994_v20 = vmul.f32 0.5, %v6882_v9  ;;  %v6883_v35 = vadd.f32 1.0, %v10076_v27  ;;  %v6175_v23 = vpop.f32.mrb[114].mxu1  ;;  %v5951_v42 = vpop.f32.mrb[83].mxu0  ;;  %v6675_v62 = vmul.f32 0.5, %v8750_v5 }
 0x538   : > { %v8389_v60 = vpack.c.bf16 %v6990_v11, %v6989_v1  ;;  %v6996_v34 = vmul.f32 0.5, %v6884_v46  ;;  %v12803_v30 = vpop.f32.mrb[115].mxu1  ;;  %v10078_v39 = vpop.eup %10077  ;;  %v8752_v63 = vadd.f32 %v12788_v44, %v12746_v13  ;;  %10091 = vtanh.f32 %v6673_v26 }
 0x539   : > { %7443 = vst [vmem:[%s12774_s1 + $0x54] sm:$0xff] %v8388_v18  ;;  %v6995_v43 = vmul.f32 0.5, %v6883_v35  ;;  %v10080_v7 = vpop.eup %10079  ;;  %v6885_v59 = vadd.f32 1.0, %v10078_v39  ;;  %v6679_v21 = vmul.f32 0.5, %v8719_v48  ;;  %v6681_v47 = vmul.f32 0.5, %v8751_v57 }
 0x53a   : > { %7444 = vst [vmem:[%s12774_s1 + $0x5c] sm:$0xff] %v8389_v60  ;;  %v10082_v3 = vpop.eup %10081  ;;  %v6889_v49 = vadd.f32 1.0, %v10080_v7  ;;  %10093 = vtanh.f32 %v6675_v62  ;;  %v6680_v2 = vmul.f32 0.5, %v8720_v54  ;;  %v6682_v61 = vmul.f32 0.5, %v8752_v63  ;;  %v5955_v38 = vpop.f32.mrb[84].mxu0 }
 0x53b   : > { %v8392_v0 = vpack.c.bf16 %v6995_v43, %v6994_v20  ;;  %v12817_v6 = vpop.f32.mrb[116].mxu1  ;;  %v10084_v53 = vpop.eup %10083  ;;  %v6997_v19 = vmul.f32 0.5, %v6885_v59  ;;  %v6891_v22 = vadd.f32 1.0, %v10082_v3  ;;  %10095 = vtanh.f32 %v6679_v21 }
 0x53c   : > { %v8721_v44 = vadd.f32 %v5945_v29, %v12737_v45  ;;  %v12820_v51 = vpop.f32.mrb[85].mxu0  ;;  %v12822_v55 = vpop.f32.mrb[117].mxu1  ;;  %v7001_v32 = vmul.f32 0.5, %v6889_v49  ;;  %v6890_v10 = vadd.f32 1.0, %v10084_v53  ;;  %10097 = vtanh.f32 %v6681_v47 }
 0x53d   : > { %7447 = vst [vmem:[%s12774_s1 + $0x70] sm:$0xff] %v8392_v0  ;;  %v8753_v33 = vadd.f32 %v6171_v28, %v12740_v50  ;;  %v12825_v41 = vpop.f32.mrb[86].mxu0  ;;  %v12827_v8 = vpop.f32.mrb[118].mxu1  ;;  %v8393_v1 = vpack.c.bf16 %v6997_v19, %v6996_v34  ;;  %v7003_v36 = vmul.f32 0.5, %v6891_v22  ;;  %10099 = vtanh.f32 %v6680_v2 }
 0x53e   : > { %v6686_v56 = vmul.f32 0.5, %v8721_v44  ;;  %v12829_v37 = vpop.f32.mrb[87].mxu0  ;;  %v12831_v9 = vpop.f32.mrb[119].mxu1  ;;  %v7002_v25 = vmul.f32 0.5, %v6890_v10  ;;  %10101 = vtanh.f32 %v6682_v61  ;;  %v8722_v29 = vadd.f32 %v12799_v24, %v12743_v12 }
 0x53f   : > { %v6688_v40 = vmul.f32 0.5, %v8753_v33  ;;  %7448 = vst [vmem:[%s12774_s1 + $0x78] sm:$0xff] %v8393_v1  ;;  %v8754_v28 = vadd.f32 %v12801_v17, %v12746_v13  ;;  %v8723_v27 = vadd.f32 %v5949_v52, %v12737_v45  ;;  %v8755_v11 = vadd.f32 %v6175_v23, %v12740_v50  ;;  %v10086_v46 = vpop.eup %10085 }
 0x540   : > { %10103 = vtanh.f32 %v6686_v56  ;;  %v8396_v15 = vpack.c.bf16 %v7002_v25, %v7001_v32  ;;  %v6687_v4 = vmul.f32 0.5, %v8722_v29  ;;  %v8724_v18 = vadd.f32 %v5951_v42, %v12743_v12  ;;  %v10088_v20 = vpop.eup %10087 }
 0x541   : > { %10105 = vtanh.f32 %v6688_v40  ;;  %v6892_v35 = vadd.f32 1.0, %v10086_v46  ;;  %v6689_v58 = vmul.f32 0.5, %v8754_v28  ;;  %v6693_v24 = vmul.f32 0.5, %v8723_v27  ;;  %v10090_v34 = vpop.eup %10089 }
 0x542   : > { %v6695_v60 = vmul.f32 0.5, %v8755_v11  ;;  %7451 = vst [vmem:[%s12774_s1 + $0x8c] sm:$0xff] %v8396_v15  ;;  %v6896_v14 = vadd.f32 1.0, %v10088_v20  ;;  %10107 = vtanh.f32 %v6687_v4  ;;  %v6694_v17 = vmul.f32 0.5, %v8724_v18  ;;  %v12844_v23 = vpop.f32.mrb[88].mxu0  ;;  %v12846_v16 = vpop.f32.mrb[120].mxu1 }
 0x543   : > { %v8756_v52 = vadd.f32 %v12803_v30, %v12746_v13  ;;  %v10092_v43 = vpop.eup %10091  ;;  %v7004_v26 = vmul.f32 0.5, %v6892_v35  ;;  %v6898_v42 = vadd.f32 1.0, %v10090_v34  ;;  %10109 = vtanh.f32 %v6689_v58  ;;  %v12849_v48 = vpop.f32.mrb[89].mxu0 }
 0x544   : > { %v8725_v5 = vadd.f32 %v5955_v38, %v12737_v45  ;;  %v12851_v57 = vpop.f32.mrb[121].mxu1  ;;  %v10094_v54 = vpop.eup %10093  ;;  %v7008_v39 = vmul.f32 0.5, %v6896_v14  ;;  %v6897_v0 = vadd.f32 1.0, %v10092_v43  ;;  %10111 = vtanh.f32 %v6693_v24 }
 0x545   : > { %v6696_v62 = vmul.f32 0.5, %v8756_v52  ;;  %v12853_v30 = vpop.f32.mrb[90].mxu0  ;;  %v12855_v63 = vpop.f32.mrb[122].mxu1  ;;  %v8397_v59 = vpack.c.bf16 %v7004_v26, %v7003_v36  ;;  %v7010_v21 = vmul.f32 0.5, %v6898_v42  ;;  %v6899_v47 = vadd.f32 1.0, %v10094_v54 }
 0x546   : > { %v10096_v7 = vpop.eup %10095  ;;  %10113 = vtanh.f32 %v6695_v60  ;;  %v12857_v3 = vpop.f32.mrb[91].mxu0  ;;  %v7009_v61 = vmul.f32 0.5, %v6897_v0  ;;  %v6700_v53 = vmul.f32 0.5, %v8725_v5  ;;  %v8757_v32 = vadd.f32 %v12817_v6, %v12740_v50 }
 0x547   : > { %v12859_v49 = vpop.f32.mrb[123].mxu1  ;;  %v10098_v2 = vpop.eup %10097  ;;  %v6903_v38 = vadd.f32 1.0, %v10096_v7  ;;  %10115 = vtanh.f32 %v6694_v17  ;;  %7452 = vst [vmem:[%s12774_s1 + $0x94] sm:$0xff] %v8397_v59  ;;  %v7011_v22 = vmul.f32 0.5, %v6899_v47  ;;  %v8726_v15 = vadd.f32 %v12820_v51, %v12743_v12 }
 0x548   : > { %v10100_v19 = vpop.eup %10099  ;;  %v6905_v44 = vadd.f32 1.0, %v10098_v2  ;;  %10117 = vtanh.f32 %v6696_v62  ;;  %v8400_v33 = vpack.c.bf16 %v7009_v61, %v7008_v39  ;;  %v6702_v28 = vmul.f32 0.5, %v8757_v32 }
 0x549   : > { %v10102_v10 = vpop.eup %10101  ;;  %v7015_v1 = vmul.f32 0.5, %v6903_v38  ;;  %v6904_v36 = vadd.f32 1.0, %v10100_v19  ;;  %10119 = vtanh.f32 %v6700_v53  ;;  %v8401_v25 = vpack.c.bf16 %v7011_v22, %v7010_v21 }
 0x54a   : > { %v10104_v56 = vpop.eup %10103  ;;  %v7017_v40 = vmul.f32 0.5, %v6905_v44  ;;  %v6906_v29 = vadd.f32 1.0, %v10102_v10  ;;  %7455 = vst [vmem:[%s12774_s1 + $0xa8] sm:$0xff] %v8400_v33  ;;  %v8758_v6 = vadd.f32 %v12822_v55, %v12746_v13  ;;  %v12869_v4 = vpop.f32.mrb[92].mxu0  ;;  %10121 = vtanh.f32 %v6702_v28 }
 0x54b   : > { %v10106_v27 = vpop.eup %10105  ;;  %v7016_v11 = vmul.f32 0.5, %v6904_v36  ;;  %v6910_v46 = vadd.f32 1.0, %v10104_v56  ;;  %v12871_v18 = vpop.f32.mrb[124].mxu1  ;;  %7456 = vst [vmem:[%s12774_s1 + $0xb0] sm:$0xff] %v8401_v25  ;;  %v8727_v58 = vadd.f32 %v12825_v41, %v12737_v45  ;;  %v6701_v55 = vmul.f32 0.5, %v8726_v15 }
 0x54c   : > { %v7018_v20 = vmul.f32 0.5, %v6906_v29  ;;  %v6912_v35 = vadd.f32 1.0, %v10106_v27  ;;  %v12876_v24 = vpop.f32.mrb[93].mxu0  ;;  %v12878_v60 = vpop.f32.mrb[125].mxu1  ;;  %v6703_v17 = vmul.f32 0.5, %v8758_v6  ;;  %v8759_v59 = vadd.f32 %v12827_v8, %v12740_v50 }
 0x54d   : > { %v10108_v51 = vpop.eup %10107  ;;  %v8404_v34 = vpack.c.bf16 %v7016_v11, %v7015_v1  ;;  %v7022_v14 = vmul.f32 0.5, %v6910_v46  ;;  %v12880_v52 = vpop.f32.mrb[94].mxu0  ;;  %v6707_v41 = vmul.f32 0.5, %v8727_v58  ;;  %10123 = vtanh.f32 %v6701_v55 }
 0x54e   : > { %v12882_v43 = vpop.f32.mrb[126].mxu1  ;;  %v10110_v26 = vpop.eup %10109  ;;  %v8405_v42 = vpack.c.bf16 %v7018_v20, %v7017_v40  ;;  %v7024_v5 = vmul.f32 0.5, %v6912_v35  ;;  %v6911_v54 = vadd.f32 1.0, %v10108_v51  ;;  %v8728_v21 = vadd.f32 %v12829_v37, %v12743_v12 }
 0x54f   : > { %v12884_v39 = vpop.f32.mrb[95].mxu0  ;;  %v12886_v0 = vpop.f32.mrb[127].mxu1  ;;  %7459 = vst [vmem:[%s12774_s1 + $0xc4] sm:$0xff] %v8404_v34  ;;  %v6913_v7 = vadd.f32 1.0, %v10110_v26  ;;  %10125 = vtanh.f32 %v6703_v17  ;;  %v8760_v38 = vadd.f32 %v12831_v9, %v12746_v13  ;;  %v6709_v44 = vmul.f32 0.5, %v8759_v59 }
 0x550   : > { %v10112_v62 = vpop.eup %10111  ;;  %7460 = vst [vmem:[%s12774_s1 + $0xcc] sm:$0xff] %v8405_v42  ;;  %v7023_v2 = vmul.f32 0.5, %v6911_v54  ;;  %10127 = vtanh.f32 %v6707_v41  ;;  %v6708_v37 = vmul.f32 0.5, %v8728_v21  ;;  %v8729_v46 = vadd.f32 %v12844_v23, %v12737_v45 }
 0x551   : > { %v10114_v47 = vpop.eup %10113  ;;  %v6917_v61 = vadd.f32 1.0, %v10112_v62  ;;  %v7025_v19 = vmul.f32 0.5, %v6913_v7  ;;  %10129 = vtanh.f32 %v6709_v44  ;;  %v6710_v28 = vmul.f32 0.5, %v8760_v38 }
 0x552   : > { %v10116_v53 = vpop.eup %10115  ;;  %v6919_v22 = vadd.f32 1.0, %v10114_v47  ;;  %v8408_v10 = vpack.c.bf16 %v7023_v2, %v7022_v14  ;;  %v12896_v40 = vpop.f32.mrb[128].mxu1  ;;  %10131 = vtanh.f32 %v6708_v37  ;;  %v8761_v15 = vadd.f32 %v12846_v16, %v12740_v50 }
 0x553   : > { %v10118_v32 = vpop.eup %10117  ;;  %v7029_v8 = vmul.f32 0.5, %v6917_v61  ;;  %v6918_v33 = vadd.f32 1.0, %v10116_v53  ;;  %v8409_v36 = vpack.c.bf16 %v7025_v19, %v7024_v5  ;;  %v12899_v27 = vpop.f32.mrb[129].mxu1  ;;  %v8730_v6 = vadd.f32 %v12849_v48, %v12743_v12 }
 0x554   : > { %v10120_v1 = vpop.eup %10119  ;;  %v7031_v56 = vmul.f32 0.5, %v6919_v22  ;;  %v6920_v25 = vadd.f32 1.0, %v10118_v32  ;;  %7463 = vst [vmem:[%s12774_s1 + $0xe0] sm:$0xff] %v8408_v10  ;;  %v12908_v20 = vpop.f32.mrb[130].mxu1  ;;  %10133 = vtanh.f32 %v6710_v28  ;;  %v8762_v34 = vadd.f32 %v12851_v57, %v12746_v13 }
 0x555   : > { %v7030_v9 = vmul.f32 0.5, %v6918_v33  ;;  %v6924_v29 = vadd.f32 1.0, %v10120_v1  ;;  %7464 = vst [vmem:[%s12774_s1 + $0xe8] sm:$0xff] %v8409_v36  ;;  %v10122_v35 = vpop.eup %10121  ;;  %v12912_v14 = vpop.f32.mrb[131].mxu1  ;;  %v6714_v17 = vmul.f32 0.5, %v8729_v46  ;;  %v6716_v26 = vmul.f32 0.5, %v8761_v15 }
 0x556   : > { %v7032_v11 = vmul.f32 0.5, %v6920_v25  ;;  %v6926_v23 = vadd.f32 1.0, %v10122_v35  ;;  %v6715_v16 = vmul.f32 0.5, %v8730_v6  ;;  %v6717_v42 = vmul.f32 0.5, %v8762_v34 }
 0x557   : > { %v8412_v58 = vpack.c.bf16 %v7030_v9, %v7029_v8  ;;  %v7036_v51 = vmul.f32 0.5, %v6924_v29  ;;  %v8731_v48 = vadd.f32 %v12853_v30, %v12737_v45  ;;  %v8763_v5 = vadd.f32 %v12855_v63, %v12740_v50  ;;  %v10124_v54 = vpop.eup %10123 }
 0x558   : > { %v8413_v55 = vpack.c.bf16 %v7032_v11, %v7031_v56  ;;  %v7038_v41 = vmul.f32 0.5, %v6926_v23  ;;  %10135 = vtanh.f32 %v6714_v17  ;;  %v8732_v57 = vadd.f32 %v12857_v3, %v12743_v12 }
 0x559   : > { %7467 = vst [vmem:[%s12774_s1 + $0xfc] sm:$0xff] %v8412_v58  ;;  %v8764_v62 = vadd.f32 %v12859_v49, %v12746_v13  ;;  %v10126_v7 = vpop.eup %10125  ;;  %v6925_v59 = vadd.f32 1.0, %v10124_v54  ;;  %10137 = vtanh.f32 %v6716_v26  ;;  %v6721_v21 = vmul.f32 0.5, %v8731_v48 }
 0x55a   : > { %7468 = vst [vmem:[%s12774_s1 + $0x104] sm:$0xff] %v8413_v55  ;;  %v6723_v47 = vmul.f32 0.5, %v8763_v5  ;;  %v10128_v2 = vpop.eup %10127  ;;  %v6927_v30 = vadd.f32 1.0, %v10126_v7  ;;  %10139 = vtanh.f32 %v6715_v16  ;;  %v6722_v61 = vmul.f32 0.5, %v8732_v57  ;;  %v12924_v38 = vpop.f32.mrb[132].mxu1 }
 0x55b   : > { %v6724_v63 = vmul.f32 0.5, %v8764_v62  ;;  %v7037_v53 = vmul.f32 0.5, %v6925_v59  ;;  %v6931_v19 = vadd.f32 1.0, %v10128_v2  ;;  %10141 = vtanh.f32 %v6717_v42  ;;  %v12928_v22 = vpop.f32.mrb[133].mxu1  ;;  %v10130_v49 = vpop.eup %10129 }
 0x55c   : > { %v8733_v3 = vadd.f32 %v12869_v4, %v12737_v45  ;;  %v7039_v44 = vmul.f32 0.5, %v6927_v30  ;;  %10143 = vtanh.f32 %v6721_v21  ;;  %v8765_v32 = vadd.f32 %v12871_v18, %v12740_v50  ;;  %v12934_v8 = vpop.f32.mrb[134].mxu1  ;;  %v10132_v33 = vpop.eup %10131 }
 0x55d   : > { %v8734_v10 = vadd.f32 %v12876_v24, %v12743_v12  ;;  %v8416_v37 = vpack.c.bf16 %v7037_v53, %v7036_v51  ;;  %v7043_v1 = vmul.f32 0.5, %v6931_v19  ;;  %v6933_v36 = vadd.f32 1.0, %v10130_v49  ;;  %v12936_v4 = vpop.f32.mrb[135].mxu1 }
 0x55e   : > { %10145 = vtanh.f32 %v6723_v47  ;;  %v8417_v56 = vpack.c.bf16 %v7039_v44, %v7038_v41  ;;  %v6932_v25 = vadd.f32 1.0, %v10132_v33  ;;  %v6728_v9 = vmul.f32 0.5, %v8733_v3  ;;  %v10134_v29 = vpop.eup %10133 }
 0x55f   : > { %10147 = vtanh.f32 %v6722_v61  ;;  %7471 = vst [vmem:[%s12774_s1 + $0x118] sm:$0xff] %v8416_v37  ;;  %v7045_v18 = vmul.f32 0.5, %v6933_v36  ;;  %v6730_v28 = vmul.f32 0.5, %v8765_v32  ;;  %v6729_v24 = vmul.f32 0.5, %v8734_v10 }
 0x560   : > { %10149 = vtanh.f32 %v6724_v63  ;;  %7472 = vst [vmem:[%s12774_s1 + $0x120] sm:$0xff] %v8417_v56  ;;  %v7044_v11 = vmul.f32 0.5, %v6932_v25  ;;  %v6934_v46 = vadd.f32 1.0, %v10134_v29  ;;  %v8766_v15 = vadd.f32 %v12878_v60, %v12746_v13 }
 0x561   : > { %10151 = vtanh.f32 %v6728_v9  ;;  %v8735_v6 = vadd.f32 %v12880_v52, %v12737_v45  ;;  %v8767_v35 = vadd.f32 %v12882_v43, %v12740_v50  ;;  %v8736_v58 = vadd.f32 %v12884_v39, %v12743_v12 }
 0x562   : > { %10153 = vtanh.f32 %v6730_v28  ;;  %v10136_v51 = vpop.eup %10135  ;;  %v8420_v34 = vpack.c.bf16 %v7044_v11, %v7043_v1  ;;  %v7046_v55 = vmul.f32 0.5, %v6934_v46  ;;  %v6731_v23 = vmul.f32 0.5, %v8766_v15  ;;  %v8509_v17 = vpop.f32.mrb[136].mxu1 }
 0x563   : > { %10155 = vtanh.f32 %v6729_v24  ;;  %v10138_v26 = vpop.eup %10137  ;;  %v6938_v16 = vadd.f32 1.0, %v10136_v51  ;;  %v6735_v60 = vmul.f32 0.5, %v8735_v6  ;;  %v6737_v42 = vmul.f32 0.5, %v8767_v35  ;;  %v8510_v45 = vpop.f32.mrb[137].mxu1 }
 0x564   : > { %v6736_v48 = vmul.f32 0.5, %v8736_v58  ;;  %v10140_v52 = vpop.eup %10139  ;;  %7475 = vst [vmem:[%s12774_s1 + $0x134] sm:$0xff] %v8420_v34  ;;  %v8421_v5 = vpack.c.bf16 %v7046_v55, %v7045_v18  ;;  %v6940_v50 = vadd.f32 1.0, %v10138_v26  ;;  %10157 = vtanh.f32 %v6731_v23  ;;  %v8512_v43 = vpop.f32.mrb[138].mxu1 }
 0x565   : > { %v8768_v12 = vadd.f32 %v12886_v0, %v12746_v13  ;;  %v10142_v39 = vpop.eup %10141  ;;  %v7050_v54 = vmul.f32 0.5, %v6938_v16  ;;  %v6939_v41 = vadd.f32 1.0, %v10140_v52  ;;  %10159 = vtanh.f32 %v6735_v60  ;;  %v8513_v62 = vpop.f32.mrb[139].mxu1 }
 0x566   : > { %v12953_v57 = vadd.f32 %v12899_v27, %v12896_v40  ;;  %v10144_v7 = vpop.eup %10143  ;;  %7476 = vst [vmem:[%s12774_s1 + $0x13c] sm:$0xff] %v8421_v5  ;;  %v7052_v59 = vmul.f32 0.5, %v6940_v50  ;;  %v6941_v21 = vadd.f32 1.0, %v10142_v39  ;;  %10161 = vtanh.f32 %v6737_v42 }
 0x567   : > { %v6738_v47 = vmul.f32 0.5, %v8768_v12  ;;  %v7051_v30 = vmul.f32 0.5, %v6939_v41  ;;  %v6945_v61 = vadd.f32 1.0, %v10144_v7  ;;  %10163 = vtanh.f32 %v6736_v48 }
 0x568   : > { %v10146_v2 = vpop.eup %10145  ;;  %v7053_v0 = vmul.f32 0.5, %v6941_v21  ;;  %v12958_v40 = vadd.f32 %v12912_v14, %v12908_v20  ;;  %v12962_v49 = vadd.f32 %v12928_v22, %v12924_v38  ;;  %v12967_v20 = vadd.f32 %v12936_v4, %v12934_v8 }
 0x569   : > { %v10148_v13 = vpop.eup %10147  ;;  %v6947_v63 = vadd.f32 1.0, %v10146_v2  ;;  %10165 = vtanh.f32 %v6738_v47  ;;  %v8424_v53 = vpack.c.bf16 %v7051_v30, %v7050_v54  ;;  %v7057_v19 = vmul.f32 0.5, %v6945_v61 }
 0x56a   : > { %v10150_v27 = vpop.eup %10149  ;;  %v6946_v3 = vadd.f32 1.0, %v10148_v13  ;;  %v8425_v32 = vpack.c.bf16 %v7053_v0, %v7052_v59  ;;  %v8515_v37 = vpop.f32.mrb[140].mxu1  ;;  %v12970_v22 = vadd.f32 %v8510_v45, %v8509_v17  ;;  %v12972_v29 = vadd.f32 %v8513_v62, %v8512_v43 }
 0x56b   : > { %v10152_v44 = vpop.eup %10151  ;;  %v7059_v10 = vmul.f32 0.5, %v6947_v63  ;;  %v6948_v33 = vadd.f32 1.0, %v10150_v27  ;;  %7479 = vst [vmem:[%s12774_s1 + $0x150] sm:$0xff] %v8424_v53  ;;  %v8516_v14 = vpop.f32.mrb[141].mxu1 }
 0x56c   : > { %v10154_v1 = vpop.eup %10153  ;;  %v7058_v36 = vmul.f32 0.5, %v6946_v3  ;;  %v6952_v56 = vadd.f32 1.0, %v10152_v44  ;;  %7480 = vst [vmem:[%s12774_s1 + $0x158] sm:$0xff] %v8425_v32  ;;  %v8518_v18 = vpop.f32.mrb[142].mxu1  ;;  %v12975_v51 = vadd.f32 %v8516_v14, %v8515_v37 }
 0x56d   : > { %v10156_v25 = vpop.eup %10155  ;;  %v7060_v9 = vmul.f32 0.5, %v6948_v33  ;;  %v6954_v38 = vadd.f32 1.0, %v10154_v1  ;;  %v8519_v8 = vpop.f32.mrb[143].mxu1 }
 0x56e   : > { %v8428_v28 = vpack.c.bf16 %v7058_v36, %v7057_v19  ;;  %v7064_v24 = vmul.f32 0.5, %v6952_v56  ;;  %v6953_v11 = vadd.f32 1.0, %v10156_v25  ;;  %v10158_v4 = vpop.eup %10157  ;;  %v12977_v34 = vadd.f32 %v8519_v8, %v8518_v18 }
 0x56f   : > { %v8429_v46 = vpack.c.bf16 %v7060_v9, %v7059_v10  ;;  %v7066_v15 = vmul.f32 0.5, %v6954_v38  ;;  %v10160_v6 = vpop.eup %10159  ;;  %v6955_v58 = vadd.f32 1.0, %v10158_v4 }
 0x570   : > { %7483 = vst [vmem:[%s12774_s1 + $0x16c] sm:$0xff] %v8428_v28  ;;  %v7065_v35 = vmul.f32 0.5, %v6953_v11  ;;  %v10162_v55 = vpop.eup %10161  ;;  %v6959_v23 = vadd.f32 1.0, %v10160_v6 }
 0x571   : > { %7484 = vst [vmem:[%s12774_s1 + $0x174] sm:$0xff] %v8429_v46  ;;  %v10164_v17 = vpop.eup %10163  ;;  %v7067_v16 = vmul.f32 0.5, %v6955_v58  ;;  %v6961_v60 = vadd.f32 1.0, %v10162_v55 }
 0x572   : > { %v8432_v26 = vpack.c.bf16 %v7065_v35, %v7064_v24  ;;  %v12991_v48 = vmul.f32 0.5, %v6959_v23  ;;  %v6960_v45 = vadd.f32 1.0, %v10164_v17  ;;  %v8521_v52 = vpop.f32.mrb[144].mxu1 }
 0x573   : > { %v10166_v42 = vpop.eup %10165 }
 0x574   : > { %10277 = shalt.err (!%p10274_p3)
}
 0x575   : > { %s10278_s0 = scalar_lea.hbm %s12987_s17, 2048  ;;  %s10282_s20 = scalar_lea.hbm %s13266_s11, 6144 }
 0x576   : > { %p10279_p4 = scmp.ne.s32.totalorder %s12987_s17, %s10278_s0  ;;  %p10283_p9 = scmp.lt.u32.totalorder %s12987_s17, %s13266_s11 }
 0x577   : > { %p10284_p10 = scmp.lt.u32.totalorder %s10282_s20, %s10278_s0  ;;  %p10286_p12 = scmp.lt.u32.totalorder %s10278_s0, %s12987_s17 }
 0x578   : > { %p10280_p7 = pnand %p10279_p4, %p10468_p5 }
 0x579   : > { %p10285_p11 = por %p10284_p10, %p10283_p9 }
 0x57a   : > { %p10281_p8 = pneg %p10280_p7 }
 0x57b   : > { %p10287_p13 = por %p10286_p12, %p10285_p11 }
 0x57d   : > { %p10288_p0 = pnand %p10287_p13, %p10281_p8 }
 0x57f   : > { %10291 = shalt.err (!%p10288_p0)
}
 0x580   : > { %s10362_s18 = smov 128   ;;  %s10363_s28 = smov 8   ;;  %7487 = vst [vmem:[%s12774_s1 + $0x188] sm:$0xff] %v8432_v26  ;;  %v8433_v5 = vpack.c.bf16 %v7067_v16, %v7066_v15  ;;  %v7073_v50 = vmul.f32 0.5, %v6961_v60  ;;  %v6962_v12 = vadd.f32 1.0, %v10166_v42  ;;  %v8522_v43 = vpop.f32.mrb[145].mxu1 }
 0x581   : > { %9122 = dma.vmem_to_hbm [thread:$0]  (%p10468_p5), %s12989_s30, 2048, %s12987_s17, %s7534_s26, %s10362_s18, %s10362_s18, %s10363_s28   ;;  %v7072_v39 = vmul.f32 0.5, %v6960_v45  ;;  %v13029_v54 = vadd.f32 %v8522_v43, %v8521_v52  ;;  %v8524_v41 = vpop.f32.mrb[146].mxu1 }
 0x582   : > { %s13283_s15 = sshll.u32 %s10451_s25, 11  ;;  %s7572_s20 = sshll.u32 %s11562_s27, 4  ;;  %7488 = vst [vmem:[%s12774_s1 + $0x190] sm:$0xff] %v8433_v5  ;;  %v7074_v62 = vmul.f32 0.5, %v6962_v12  ;;  %v8525_v7 = vpop.f32.mrb[147].mxu1  ;;  %s13031_s20 = int_to_ptr.vmem [resolvable:$true] %s7572_s20 }
 0x583   : > { %s13026_s29 = scalar_lea.hbm %s13267_s12, %s13283_s15  ;;  %s7539_s30 = scalar_lea.sflag [#allocation5], %s11542_s16 }
 0x584   : > { %s10292_s25 = scalar_lea.vmem %s13031_s20, 2048  ;;  %s10364_s17 = smov [#allocation4]  }
 0x585   : > { %p10293_p1 = scmp.ne.s32.totalorder %s13031_s20, %s10292_s25  ;;  %s10296_s27 = sshll.u32 %s10364_s17, 4  ;;  %s10297_s27 = int_to_ptr.vmem [resolvable:$false] %s10296_s27 }
 0x586   : > { %s10298_s26 = scalar_lea.vmem %s10297_s27, 4096  ;;  %p10299_p4 = scmp.lt.s32.totalorder %s13031_s20, %s10297_s27 }
 0x587   : > { %p10294_p2 = pnand %p10293_p1, %p10468_p5  ;;  %p10300_p7 = scmp.lt.s32.totalorder %s10298_s26, %s10292_s25 }
 0x589   : > { %p10295_p3 = pneg %p10294_p2  ;;  %p10301_p8 = por %p10300_p7, %p10299_p4 }
 0x58b   : > { %p10302_p9 = pnand %p10301_p8, %p10295_p3 }
 0x58d   : > { %10305 = shalt.err (!%p10302_p9)
}
 0x58e   : > { %s10306_s23 = scalar_lea.hbm %s13026_s29, 2048  ;;  %s10310_s19 = scalar_lea.hbm %s13267_s12, 6144 }
 0x58f   : > { %p10307_p10 = scmp.ne.s32.totalorder %s13026_s29, %s10306_s23  ;;  %p10311_p13 = scmp.lt.u32.totalorder %s13026_s29, %s13267_s12 }
 0x590   : > { %p10312_p0 = scmp.lt.u32.totalorder %s10310_s19, %s10306_s23  ;;  %p10314_p2 = scmp.lt.u32.totalorder %s10306_s23, %s13026_s29 }
 0x591   : > { %p10308_p11 = pnand %p10307_p10, %p10468_p5 }
 0x592   : > { %p10313_p1 = por %p10312_p0, %p10311_p13 }
 0x593   : > { %p10309_p12 = pneg %p10308_p11 }
 0x594   : > { %p10315_p3 = por %p10314_p2, %p10313_p1 }
 0x596   : > { %p10316_p4 = pnand %p10315_p3, %p10309_p12 }
 0x598   : > { %10319 = shalt.err (!%p10316_p4)
}
 0x599   : > { %9123 = dma.vmem_to_hbm [thread:$0]  (%p10468_p5), %s13031_s20, 2048, %s13026_s29, %s7539_s30, %s10362_s18, %s10362_s18, %s10363_s28   ;;  %v8436_v59 = vpack.c.bf16 %v7072_v39, %v12991_v48  ;;  %v13062_v21 = vadd.f32 %v8525_v7, %v8524_v41  ;;  %v8437_v47 = vpack.c.bf16 %v7074_v62, %v7073_v50  ;;  %v8527_v2 = vpop.f32.mrb[148].mxu1  ;;  %v4597_v10 = vsub.s32 6, %v11265_v31  ;;  %v6357_v8 = vpop.f32.mrb[96].mxu0 }
 0x59a   : > { %v8528_v30 = vpop.f32.mrb[149].mxu1  ;;  %v4589_v1 = vsub.s32 4, %v11265_v31  ;;  %v4593_v14 = vsub.s32 5, %v11265_v31  ;;  %v10263_v9 = vld [vmem:[%s13264_s9] sm:$0x7f]  ;;  %v6359_v31 = vpop.f32.mrb[97].mxu0 }
 0x59b   : > { %7491 = vst [vmem:[%s12774_s1 + $0x1a4] sm:$0xff] %v8436_v59  ;;  %7492 = vst [vmem:[%s12774_s1 + $0x1ac] sm:$0xff] %v8437_v47  ;;  %v13066_v61 = vadd.f32 %v8528_v30, %v8527_v2  ;;  %v8530_v13 = vpop.f32.mrb[150].mxu1  ;;  %v13082_v38 = vrot.slane %v10263_v9, %v4597_v10  ;;  %v6361_v55 = vpop.f32.mrb[98].mxu0  ;;  %vm7433_vm1 = vcmask 125952  }
 0x59c   : > { %v8531_v0 = vpop.f32.mrb[151].mxu1  ;;  %v13084_v28 = vrot.slane %v10263_v9, %v4589_v1  ;;  %v13089_v11 = vrot.slane %v10263_v9, %v4593_v14  ;;  %v6363_v60 = vpop.f32.mrb[99].mxu0 }
 0x59d   : > { %v13068_v63 = vadd.f32 %v8531_v0, %v8530_v13  ;;  %v8533_v27 = vpop.f32.mrb[152].mxu1  ;;  %v6471_v6 = vadd.f32 %v12953_v57, %v13082_v38  ;;  %v6474_v17 = vadd.f32 %v12958_v40, %v13082_v38  ;;  %v6479_v40 = vadd.f32 %v12962_v49, %v13082_v38  ;;  %v6367_v41 = vpop.f32.mrb[100].mxu0 }
 0x59e   : > { %v8534_v53 = vpop.f32.mrb[153].mxu1  ;;  %v8769_v46 = vadd.f32 %v6357_v8, %v13084_v28  ;;  %v8770_v35 = vadd.f32 %v6359_v31, %v13089_v11  ;;  %v8771_v16 = vadd.f32 %v6361_v55, %v13084_v28  ;;  %v8772_v52 = vadd.f32 %v6363_v60, %v13089_v11  ;;  %v6369_v2 = vpop.f32.mrb[101].mxu0 }
 0x59f   : > { %v13070_v19 = vadd.f32 %v8534_v53, %v8533_v27  ;;  %v8536_v3 = vpop.f32.mrb[154].mxu1  ;;  %v6482_v7 = vadd.f32 %v12967_v20, %v13082_v38  ;;  %v13105_v59 = vadd.f32 %v12970_v22, %v13082_v38  ;;  %v8773_v47 = vadd.f32 %v6367_v41, %v13084_v28  ;;  %v6371_v27 = vpop.f32.mrb[102].mxu0 }
 0x5a0   : > { %v8537_v44 = vpop.f32.mrb[155].mxu1  ;;  %v6634_v26 = vmul.f32 0.5, %v8769_v46  ;;  %v6635_v48 = vmul.f32 0.5, %v8770_v35  ;;  %v6641_v57 = vmul.f32 0.5, %v8771_v16  ;;  %v6642_v12 = vmul.f32 0.5, %v8772_v52  ;;  %v6373_v10 = vpop.f32.mrb[103].mxu0 }
 0x5a1   : > { %v13072_v32 = vadd.f32 %v8537_v44, %v8536_v3  ;;  %v8539_v33 = vpop.f32.mrb[156].mxu1  ;;  %v13110_v13 = vadd.f32 %v12972_v29, %v13082_v38  ;;  %v8774_v49 = vadd.f32 %v6369_v2, %v13089_v11  ;;  %v13115_v20 = vadd.f32 %v12975_v51, %v13082_v38 }
 0x5a2   : > { %v8540_v37 = vpop.f32.mrb[157].mxu1  ;;  %10167 = vtanh.f32 %v6634_v26  ;;  %v13119_v22 = vadd.f32 %v12977_v34, %v13082_v38  ;;  %v6648_v3 = vmul.f32 0.5, %v8773_v47  ;;  %v8775_v44 = vadd.f32 %v6371_v27, %v13084_v28  ;;  %v6377_v35 = vpop.f32.mrb[104].mxu0 }
 0x5a3   : > { %v13076_v36 = vadd.f32 %v8540_v37, %v8539_v33  ;;  %v8542_v56 = vpop.f32.mrb[158].mxu1  ;;  %10169 = vtanh.f32 %v6635_v48  ;;  %v6649_v33 = vmul.f32 0.5, %v8774_v49  ;;  %v8776_v1 = vadd.f32 %v6373_v10, %v13089_v11 }
 0x5a4   : > { %v8543_v25 = vpop.f32.mrb[159].mxu1  ;;  %10171 = vtanh.f32 %v6641_v57  ;;  %v13125_v14 = vadd.f32 %v13029_v54, %v13082_v38  ;;  %v13129_v51 = vadd.f32 %v13062_v21, %v13082_v38  ;;  %v6655_v34 = vmul.f32 0.5, %v8775_v44 }
 0x5a5   : > { %v8544_v18 = vadd.f32 %v8543_v25, %v8542_v56  ;;  %v8561_v4 = vpop.f32.mrb[160].mxu1  ;;  %v6656_v9 = vmul.f32 0.5, %v8776_v1  ;;  %v13137_v54 = vadd.f32 %v13068_v63, %v13082_v38  ;;  %v13141_v21 = vadd.f32 %v13070_v19, %v13082_v38 }
 0x5a6   : > { %v8562_v15 = vpop.f32.mrb[161].mxu1  ;;  %v13145_v31 = vadd.f32 %v13072_v32, %v13082_v38  ;;  %v13149_v63 = vadd.f32 %v13076_v36, %v13082_v38  ;;  %v8777_v19 = vadd.f32 %v6377_v35, %v13084_v28 }
 0x5a7   : > { %v13087_v24 = vadd.f32 %v8544_v18, %v13082_v38  ;;  %v8563_v58 = vadd.f32 %v8562_v15, %v8561_v4  ;;  %v8564_v23 = vpop.f32.mrb[162].mxu1  ;;  %v13133_v4 = vadd.f32 %v13066_v61, %v13082_v38 }
 0x5a8   : > { %v8565_v42 = vpop.f32.mrb[163].mxu1  ;;  %v6662_v57 = vmul.f32 0.5, %v8777_v19 }
 0x5a9   : > { %v6568_v45 = vadd.f32 %v8563_v58, %v6471_v6  ;;  %v8566_v5 = vadd.f32 %v8565_v42, %v8564_v23  ;;  %v8567_v62 = vpop.f32.mrb[164].mxu1  ;;  %v6379_v23 = vpop.f32.mrb[105].mxu0 }
 0x5aa   : > { %v8568_v30 = vpop.f32.mrb[165].mxu1  ;;  %v8778_v60 = vadd.f32 %v6379_v23, %v13089_v11  ;;  %v6381_v42 = vpop.f32.mrb[106].mxu0 }
 0x5ab   : > { %v6636_v50 = vmul.f32 0.5, %v6568_v45  ;;  %v6571_v43 = vadd.f32 %v8566_v5, %v6474_v17  ;;  %v8569_v0 = vadd.f32 %v8568_v30, %v8567_v62  ;;  %v8570_v53 = vpop.f32.mrb[166].mxu1  ;;  %v6383_v38 = vpop.f32.mrb[107].mxu0  ;;  %v8779_v41 = vadd.f32 %v6381_v42, %v13084_v28 }
 0x5ac   : > { %v8571_v29 = vpop.f32.mrb[167].mxu1  ;;  %v10168_v8 = vpop.eup %10167 }
 0x5ad   : > { %10173 = vtanh.f32 %v6636_v50  ;;  %v6643_v39 = vmul.f32 0.5, %v6571_v43  ;;  %v6576_v37 = vadd.f32 %v8569_v0, %v6479_v40  ;;  %v8572_v56 = vadd.f32 %v8571_v29, %v8570_v53  ;;  %v10170_v46 = vpop.eup %10169  ;;  %v8573_v61 = vpop.f32.mrb[168].mxu1 }
 0x5ae   : > { %10175 = vtanh.f32 %v6642_v12  ;;  %v6858_v15 = vadd.f32 1.0, %v10168_v8  ;;  %v10172_v58 = vpop.eup %10171  ;;  %v6859_v55 = vadd.f32 1.0, %v10170_v46  ;;  %v8574_v17 = vpop.f32.mrb[169].mxu1  ;;  %v6669_v49 = vmul.f32 0.5, %v8779_v41 }
 0x5af   : > { %10177 = vtanh.f32 %v6643_v39  ;;  %v6650_v25 = vmul.f32 0.5, %v6576_v37  ;;  %v6579_v18 = vadd.f32 %v8572_v56, %v6482_v7  ;;  %v6865_v32 = vadd.f32 1.0, %v10172_v58  ;;  %v8576_v48 = vpop.f32.mrb[170].mxu1  ;;  %v6387_v1 = vpop.f32.mrb[108].mxu0 }
 0x5b0   : > { %10179 = vtanh.f32 %v6648_v3  ;;  %v6970_v16 = vmul.f32 0.5, %v6858_v15  ;;  %v6971_v52 = vmul.f32 0.5, %v6859_v55  ;;  %v8575_v36 = vadd.f32 %v8574_v17, %v8573_v61  ;;  %v8577_v50 = vpop.f32.mrb[171].mxu1  ;;  %v6389_v8 = vpop.f32.mrb[109].mxu0 }
 0x5b1   : > { %10181 = vtanh.f32 %v6649_v33  ;;  %v6657_v6 = vmul.f32 0.5, %v6579_v18  ;;  %v6977_v43 = vmul.f32 0.5, %v6865_v32  ;;  %v6663_v39 = vmul.f32 0.5, %v8778_v60  ;;  %v8579_v56 = vpop.f32.mrb[172].mxu1  ;;  %v6391_v58 = vpop.f32.mrb[110].mxu0 }
 0x5b2   : > { %10183 = vtanh.f32 %v6655_v34  ;;  %v8378_v62 = vpack.c.bf16 %v6971_v52, %v6970_v16  ;;  %v6584_v30 = vadd.f32 %v8575_v36, %v13105_v59  ;;  %v8780_v3 = vadd.f32 %v6383_v38, %v13089_v11  ;;  %v8580_v46 = vpop.f32.mrb[173].mxu1  ;;  %v6393_v16 = vpop.f32.mrb[111].mxu0 }
 0x5b3   : > { %10185 = vtanh.f32 %v6650_v25  ;;  %v8578_v44 = vadd.f32 %v8577_v50, %v8576_v48  ;;  %v8781_v61 = vadd.f32 %v6387_v1, %v13084_v28  ;;  %v8582_v55 = vpop.f32.mrb[174].mxu1  ;;  %v8581_v50 = vadd.f32 %v8580_v46, %v8579_v56 }
 0x5b4   : > { %10187 = vtanh.f32 %v6656_v9  ;;  %7432 = vst [vmem:[%s12774_s1 + $0x10] sm:$0xff] %v8378_v62  ;;  %v6664_v37 = vmul.f32 0.5, %v6584_v30  ;;  %v6670_v9 = vmul.f32 0.5, %v8780_v3  ;;  %v8784_v41 = vadd.f32 %v6393_v16, %v13089_v11  ;;  %v6397_v30 = vpop.f32.mrb[112].mxu0 }
 0x5b5   : > { %10189 = vtanh.f32 %v6657_v6  ;;  %v6587_v18 = vadd.f32 %v8578_v44, %v13110_v13  ;;  %v8583_v13 = vpop.f32.mrb[175].mxu1  ;;  %v6676_v48 = vmul.f32 0.5, %v8781_v61  ;;  %v6399_v44 = vpop.f32.mrb[113].mxu0  ;;  %v8785_v56 = vadd.f32 %v6397_v30, %v13084_v28 }
 0x5b6   : > { %10191 = vtanh.f32 %v6662_v57  ;;  %v6684_v3 = vmul.f32 0.5, %v8784_v41  ;;  %v8584_v1 = vadd.f32 %v8583_v13, %v8582_v55 }
 0x5b7   : > { %v10174_v26 = vpop.eup %10173  ;;  %10193 = vtanh.f32 %v6663_v39  ;;  %v8783_v39 = vadd.f32 %v6391_v58, %v13084_v28 }
 0x5b8   : > { %v10176_v45 = vpop.eup %10175  ;;  %v6860_v5 = vadd.f32 1.0, %v10174_v26  ;;  %10195 = vtanh.f32 %v6669_v49  ;;  %v6671_v26 = vmul.f32 0.5, %v6587_v18  ;;  %v8585_v49 = vpop.f32.mrb[176].mxu1 }
 0x5b9   : > { %v10178_v12 = vpop.eup %10177  ;;  %v6866_v40 = vadd.f32 1.0, %v10176_v45  ;;  %10197 = vtanh.f32 %v6664_v37  ;;  %v8782_v45 = vadd.f32 %v6389_v8, %v13089_v11 }
 0x5ba   : > { %v6972_v7 = vmul.f32 0.5, %v6860_v5  ;;  %v6867_v47 = vadd.f32 1.0, %v10178_v12  ;;  %v10180_v0 = vpop.eup %10179  ;;  %10199 = vtanh.f32 %v6670_v9  ;;  %v8786_v9 = vadd.f32 %v6399_v44, %v13089_v11 }
 0x5bb   : > { %v6978_v2 = vmul.f32 0.5, %v6866_v40  ;;  %v10182_v10 = vpop.eup %10181  ;;  %v6872_v33 = vadd.f32 1.0, %v10180_v0  ;;  %10201 = vtanh.f32 %v6671_v26  ;;  %v6677_v38 = vmul.f32 0.5, %v8782_v45 }
 0x5bc   : > { %v8379_v27 = vpack.c.bf16 %v6972_v7, %v6972_v7  ;;  %v6979_v53 = vmul.f32 0.5, %v6867_v47  ;;  %v10184_v34 = vpop.eup %10183  ;;  %v6873_v25 = vadd.f32 1.0, %v10182_v10  ;;  %10203 = vtanh.f32 %v6676_v48  ;;  %v8586_v10 = vpop.f32.mrb[177].mxu1 }
 0x5bd   : > { %v8382_v29 = vpack.c.bf16 %v6978_v2, %v6977_v43  ;;  %v10186_v15 = vpop.eup %10185  ;;  %v6984_v6 = vmul.f32 0.5, %v6872_v33  ;;  %v6879_v35 = vadd.f32 1.0, %v10184_v34  ;;  %10205 = vtanh.f32 %v6677_v38  ;;  %v6401_v34 = vpop.f32.mrb[114].mxu0 }
 0x5be   : > { %7434 = vst.msk [vmem:[%s12774_s1 + $0x18] sm:$0xf] %vm7433_vm1, %v8379_v27  ;;  %v8383_v59 = vpack.c.bf16 %v6979_v53, %v6979_v53  ;;  %v10188_v19 = vpop.eup %10187  ;;  %v6985_v23 = vmul.f32 0.5, %v6873_v25  ;;  %v6874_v17 = vadd.f32 1.0, %v10186_v15  ;;  %v6592_v2 = vadd.f32 %v8581_v50, %v13115_v20  ;;  %v8588_v20 = vpop.f32.mrb[178].mxu1 }
 0x5bf   : > { %7437 = vst [vmem:[%s12774_s1 + $0x2c] sm:$0xff] %v8382_v29  ;;  %v10190_v32 = vpop.eup %10189  ;;  %v6991_v60 = vmul.f32 0.5, %v6879_v35  ;;  %v6880_v42 = vadd.f32 1.0, %v10188_v19  ;;  %v6683_v53 = vmul.f32 0.5, %v8783_v39  ;;  %v6403_v18 = vpop.f32.mrb[115].mxu0  ;;  %v6595_v15 = vadd.f32 %v8584_v1, %v13119_v22 }
 0x5c0   : > { %7438 = vst.msk [vmem:[%s12774_s1 + $0x34] sm:$0xf] %vm7433_vm1, %v8383_v59  ;;  %v8386_v52 = vpack.c.bf16 %v6985_v23, %v6984_v6  ;;  %v6986_v5 = vmul.f32 0.5, %v6874_v17  ;;  %v6881_v57 = vadd.f32 1.0, %v10190_v32  ;;  %v10192_v12 = vpop.eup %10191  ;;  %v6678_v37 = vmul.f32 0.5, %v6592_v2  ;;  %v8589_v8 = vpop.f32.mrb[179].mxu1 }
 0x5c1   : > { %v6992_v36 = vmul.f32 0.5, %v6880_v42  ;;  %v10194_v62 = vpop.eup %10193  ;;  %v6886_v47 = vadd.f32 1.0, %v10192_v12  ;;  %10207 = vtanh.f32 %v6683_v53  ;;  %v6690_v6 = vmul.f32 0.5, %v8785_v56 }
 0x5c2   : > { %7441 = vst [vmem:[%s12774_s1 + $0x48] sm:$0xff] %v8386_v52  ;;  %v8387_v43 = vpack.c.bf16 %v6986_v5, %v6986_v5  ;;  %v6993_v40 = vmul.f32 0.5, %v6881_v57  ;;  %v6887_v27 = vadd.f32 1.0, %v10194_v62  ;;  %v10196_v29 = vpop.eup %10195  ;;  %10209 = vtanh.f32 %v6678_v37  ;;  %v6407_v5 = vpop.f32.mrb[116].mxu0 }
 0x5c3   : > { %v8390_v7 = vpack.c.bf16 %v6992_v36, %v6991_v60  ;;  %v6998_v33 = vmul.f32 0.5, %v6886_v47  ;;  %v6893_v25 = vadd.f32 1.0, %v10196_v29  ;;  %v10198_v46 = vpop.eup %10197  ;;  %v8587_v35 = vadd.f32 %v8586_v10, %v8585_v49  ;;  %v8591_v57 = vpop.f32.mrb[180].mxu1 }
 0x5c4   : > { %7442 = vst.msk [vmem:[%s12774_s1 + $0x50] sm:$0xf] %vm7433_vm1, %v8387_v43  ;;  %v8391_v0 = vpack.c.bf16 %v6993_v40, %v6993_v40  ;;  %v6999_v59 = vmul.f32 0.5, %v6887_v27  ;;  %v10200_v61 = vpop.eup %10199  ;;  %v6888_v55 = vadd.f32 1.0, %v10198_v46  ;;  %10211 = vtanh.f32 %v6684_v3  ;;  %v6409_v12 = vpop.f32.mrb[117].mxu0 }
 0x5c5   : > { %7445 = vst [vmem:[%s12774_s1 + $0x64] sm:$0xff] %v8390_v7  ;;  %v7005_v19 = vmul.f32 0.5, %v6893_v25  ;;  %v6894_v23 = vadd.f32 1.0, %v10200_v61  ;;  %v6685_v17 = vmul.f32 0.5, %v6595_v15  ;;  %10213 = vtanh.f32 %v6690_v6  ;;  %v10202_v16 = vpop.eup %10201  ;;  %v8592_v43 = vpop.f32.mrb[181].mxu1 }
 0x5c6   : > { %7446 = vst.msk [vmem:[%s12774_s1 + $0x6c] sm:$0xf] %vm7433_vm1, %v8391_v0  ;;  %v8394_v58 = vpack.c.bf16 %v6999_v59, %v6998_v33  ;;  %v6691_v26 = vmul.f32 0.5, %v8786_v9  ;;  %v7000_v13 = vmul.f32 0.5, %v6888_v55  ;;  %v6600_v32 = vadd.f32 %v8587_v35, %v13125_v14  ;;  %v10204_v42 = vpop.eup %10203  ;;  %v6411_v7 = vpop.f32.mrb[118].mxu0 }
 0x5c7   : > { %v8787_v60 = vadd.f32 %v6401_v34, %v13084_v28  ;;  %v8788_v22 = vadd.f32 %v6403_v18, %v13089_v11  ;;  %v7006_v48 = vmul.f32 0.5, %v6894_v23  ;;  %v6895_v45 = vadd.f32 1.0, %v10202_v16  ;;  %v10206_v14 = vpop.eup %10205  ;;  %v8594_v47 = vpop.f32.mrb[182].mxu1 }
 0x5c8   : > { %7449 = vst [vmem:[%s12774_s1 + $0x80] sm:$0xff] %v8394_v58  ;;  %10215 = vtanh.f32 %v6685_v17  ;;  %v8590_v52 = vadd.f32 %v8589_v8, %v8588_v20  ;;  %v8395_v36 = vpack.c.bf16 %v7000_v13, %v7000_v13  ;;  %v6900_v38 = vadd.f32 1.0, %v10204_v42  ;;  %v6413_v0 = vpop.f32.mrb[119].mxu0  ;;  %v8595_v27 = vpop.f32.mrb[183].mxu1 }
 0x5c9   : > { %10217 = vtanh.f32 %v6691_v26  ;;  %v6692_v50 = vmul.f32 0.5, %v6600_v32  ;;  %v8398_v40 = vpack.c.bf16 %v7006_v48, %v7005_v19  ;;  %v7007_v39 = vmul.f32 0.5, %v6895_v45  ;;  %v6417_v35 = vpop.f32.mrb[120].mxu0  ;;  %v8597_v61 = vpop.f32.mrb[184].mxu1 }
 0x5ca   : > { %v6697_v41 = vmul.f32 0.5, %v8787_v60  ;;  %v6698_v62 = vmul.f32 0.5, %v8788_v22  ;;  %7450 = vst.msk [vmem:[%s12774_s1 + $0x88] sm:$0xf] %vm7433_vm1, %v8395_v36  ;;  %v7012_v2 = vmul.f32 0.5, %v6900_v38  ;;  %v6901_v30 = vadd.f32 1.0, %v10206_v14 }
 0x5cb   : > { %10219 = vtanh.f32 %v6692_v50  ;;  %v6603_v49 = vadd.f32 %v8590_v52, %v13129_v51  ;;  %7453 = vst [vmem:[%s12774_s1 + $0x9c] sm:$0xff] %v8398_v40  ;;  %v8399_v53 = vpack.c.bf16 %v7007_v39, %v7007_v39  ;;  %v8789_v3 = vadd.f32 %v6407_v5, %v13084_v28  ;;  %v10208_v10 = vpop.eup %10207  ;;  %v6419_v23 = vpop.f32.mrb[121].mxu0 }
 0x5cc   : > { %10221 = vtanh.f32 %v6697_v41  ;;  %v8790_v44 = vadd.f32 %v6409_v12, %v13089_v11  ;;  %v7013_v29 = vmul.f32 0.5, %v6901_v30  ;;  %v8593_v37 = vadd.f32 %v8592_v43, %v8591_v57  ;;  %v10210_v1 = vpop.eup %10209  ;;  %v8598_v17 = vpop.f32.mrb[185].mxu1 }
 0x5cd   : > { %10223 = vtanh.f32 %v6698_v62  ;;  %v6699_v33 = vmul.f32 0.5, %v6603_v49  ;;  %7454 = vst.msk [vmem:[%s12774_s1 + $0xa4] sm:$0xf] %vm7433_vm1, %v8399_v53  ;;  %v6907_v56 = vadd.f32 1.0, %v10208_v10  ;;  %v6704_v51 = vmul.f32 0.5, %v8789_v3  ;;  %v6421_v32 = vpop.f32.mrb[122].mxu0 }
 0x5ce   : > { %v6705_v34 = vmul.f32 0.5, %v8790_v44  ;;  %v8791_v20 = vadd.f32 %v6411_v7, %v13084_v28  ;;  %v10212_v59 = vpop.eup %10211  ;;  %v8402_v25 = vpack.c.bf16 %v7013_v29, %v7012_v2  ;;  %v6902_v9 = vadd.f32 1.0, %v10210_v1  ;;  %v13193_v60 = vpop.f32.mrb[186].mxu1 }
 0x5cf   : > { %10225 = vtanh.f32 %v6699_v33  ;;  %v6608_v18 = vadd.f32 %v8593_v37, %v13133_v4  ;;  %v10214_v8 = vpop.eup %10213  ;;  %v7019_v46 = vmul.f32 0.5, %v6907_v56  ;;  %v6908_v15 = vadd.f32 1.0, %v10212_v59  ;;  %v6423_v52 = vpop.f32.mrb[123].mxu0 }
 0x5d0   : > { %10227 = vtanh.f32 %v6704_v51  ;;  %v6711_v6 = vmul.f32 0.5, %v8791_v20  ;;  %7457 = vst [vmem:[%s12774_s1 + $0xb8] sm:$0xff] %v8402_v25  ;;  %v7014_v58 = vmul.f32 0.5, %v6902_v9  ;;  %v6914_v55 = vadd.f32 1.0, %v10214_v8  ;;  %v8601_v5 = vpop.f32.mrb[187].mxu1  ;;  %v6427_v44 = vpop.f32.mrb[124].mxu0 }
 0x5d1   : > { %10229 = vtanh.f32 %v6705_v34  ;;  %v6706_v19 = vmul.f32 0.5, %v6608_v18  ;;  %v7020_v16 = vmul.f32 0.5, %v6908_v15  ;;  %v8792_v13 = vadd.f32 %v6413_v0, %v13089_v11  ;;  %v8603_v10 = vpop.f32.mrb[188].mxu1  ;;  %v6429_v56 = vpop.f32.mrb[125].mxu0 }
 0x5d2   : > { %v10216_v26 = vpop.eup %10215  ;;  %10231 = vtanh.f32 %v6711_v6  ;;  %v8596_v4 = vadd.f32 %v8595_v27, %v8594_v47  ;;  %v8403_v42 = vpack.c.bf16 %v7014_v58, %v7014_v58  ;;  %v7026_v45 = vmul.f32 0.5, %v6914_v55  ;;  %v8604_v51 = vpop.f32.mrb[189].mxu1 }
 0x5d3   : > { %v10218_v22 = vpop.eup %10217  ;;  %v6909_v48 = vadd.f32 1.0, %v10216_v26  ;;  %10233 = vtanh.f32 %v6706_v19  ;;  %v8406_v57 = vpack.c.bf16 %v7020_v16, %v7019_v46  ;;  %v6712_v38 = vmul.f32 0.5, %v8792_v13  ;;  %v6431_v9 = vpop.f32.mrb[126].mxu0 }
 0x5d4   : > { %v6915_v36 = vadd.f32 1.0, %v10218_v22  ;;  %v6611_v50 = vadd.f32 %v8596_v4, %v13137_v54  ;;  %7458 = vst.msk [vmem:[%s12774_s1 + $0xc0] sm:$0xf] %vm7433_vm1, %v8403_v42  ;;  %v8793_v14 = vadd.f32 %v6417_v35, %v13084_v28  ;;  %v8794_v40 = vadd.f32 %v6419_v23, %v13089_v11  ;;  %v8606_v18 = vpop.f32.mrb[190].mxu1  ;;  %v6433_v35 = vpop.f32.mrb[127].mxu0 }
 0x5d5   : > { %v10220_v12 = vpop.eup %10219  ;;  %v7021_v43 = vmul.f32 0.5, %v6909_v48  ;;  %v8599_v39 = vadd.f32 %v8598_v17, %v8597_v61  ;;  %7461 = vst [vmem:[%s12774_s1 + $0xd4] sm:$0xff] %v8406_v57  ;;  %10235 = vtanh.f32 %v6712_v38  ;;  %v8795_v1 = vadd.f32 %v6421_v32, %v13084_v28  ;;  %v8607_v61 = vpop.f32.mrb[191].mxu1 }
 0x5d6   : > { %v10222_v41 = vpop.eup %10221  ;;  %v7027_v62 = vmul.f32 0.5, %v6915_v36  ;;  %v6916_v7 = vadd.f32 1.0, %v10220_v12  ;;  %v6713_v47 = vmul.f32 0.5, %v6611_v50  ;;  %v6718_v54 = vmul.f32 0.5, %v8793_v14 }
 0x5d7   : > { %v10224_v2 = vpop.eup %10223  ;;  %v8407_v30 = vpack.c.bf16 %v7021_v43, %v7021_v43  ;;  %v6921_v49 = vadd.f32 1.0, %v10222_v41  ;;  %v6719_v0 = vmul.f32 0.5, %v8794_v40  ;;  %v6616_v37 = vadd.f32 %v8599_v39, %v13141_v21 }
 0x5d8   : > { %v8410_v27 = vpack.c.bf16 %v7027_v62, %v7026_v45  ;;  %v7028_v53 = vmul.f32 0.5, %v6916_v7  ;;  %v6922_v3 = vadd.f32 1.0, %v10224_v2  ;;  %10237 = vtanh.f32 %v6713_v47 }
 0x5d9   : > { %v10226_v29 = vpop.eup %10225  ;;  %7462 = vst.msk [vmem:[%s12774_s1 + $0xdc] sm:$0xf] %vm7433_vm1, %v8407_v30  ;;  %v7033_v33 = vmul.f32 0.5, %v6921_v49  ;;  %10239 = vtanh.f32 %v6718_v54  ;;  %v6720_v15 = vmul.f32 0.5, %v6616_v37  ;;  %v6725_v6 = vmul.f32 0.5, %v8795_v1 }
 0x5da   : > { %v10228_v34 = vpop.eup %10227  ;;  %7465 = vst [vmem:[%s12774_s1 + $0xf0] sm:$0xff] %v8410_v27  ;;  %v8411_v20 = vpack.c.bf16 %v7028_v53, %v7028_v53  ;;  %v7034_v59 = vmul.f32 0.5, %v6922_v3  ;;  %v6923_v25 = vadd.f32 1.0, %v10226_v29  ;;  %10241 = vtanh.f32 %v6719_v0 }
 0x5db   : > { %v10230_v8 = vpop.eup %10229  ;;  %v6928_v46 = vadd.f32 1.0, %v10228_v34  ;;  %v8796_v21 = vadd.f32 %v6423_v52, %v13089_v11  ;;  %v8602_v17 = vadd.f32 %v8601_v5, %v13193_v60  ;;  %10243 = vtanh.f32 %v6720_v15 }
 0x5dc   : > { %v10232_v58 = vpop.eup %10231  ;;  %7466 = vst.msk [vmem:[%s12774_s1 + $0xf8] sm:$0xf] %vm7433_vm1, %v8411_v20  ;;  %v8414_v55 = vpack.c.bf16 %v7034_v59, %v7033_v33  ;;  %v7035_v19 = vmul.f32 0.5, %v6923_v25  ;;  %v6929_v23 = vadd.f32 1.0, %v10230_v8  ;;  %10245 = vtanh.f32 %v6725_v6 }
 0x5dd   : > { %v10234_v26 = vpop.eup %10233  ;;  %v7040_v16 = vmul.f32 0.5, %v6928_v46  ;;  %v6935_v13 = vadd.f32 1.0, %v10232_v58  ;;  %v6726_v4 = vmul.f32 0.5, %v8796_v21  ;;  %v6619_v45 = vadd.f32 %v8602_v17, %v13145_v31 }
 0x5de   : > { %7469 = vst [vmem:[%s12774_s1 + $0x10c] sm:$0xff] %v8414_v55  ;;  %v8415_v32 = vpack.c.bf16 %v7035_v19, %v7035_v19  ;;  %v7041_v22 = vmul.f32 0.5, %v6929_v23  ;;  %v6930_v42 = vadd.f32 1.0, %v10234_v26  ;;  %v8797_v52 = vadd.f32 %v6427_v44, %v13084_v28 }
 0x5df   : > { %v7047_v48 = vmul.f32 0.5, %v6935_v13  ;;  %10247 = vtanh.f32 %v6726_v4  ;;  %v10236_v57 = vpop.eup %10235  ;;  %v8798_v36 = vadd.f32 %v6429_v56, %v13089_v11  ;;  %v8605_v38 = vadd.f32 %v8604_v51, %v8603_v10 }
 0x5e0   : > { %7470 = vst.msk [vmem:[%s12774_s1 + $0x114] sm:$0xf] %vm7433_vm1, %v8415_v32  ;;  %v8418_v60 = vpack.c.bf16 %v7041_v22, %v7040_v16  ;;  %v7042_v5 = vmul.f32 0.5, %v6930_v42  ;;  %v6936_v50 = vadd.f32 1.0, %v10236_v57  ;;  %v6727_v12 = vmul.f32 0.5, %v6619_v45 }
 0x5e1   : > { %v6732_v43 = vmul.f32 0.5, %v8797_v52  ;;  %v8799_v14 = vadd.f32 %v6431_v9, %v13084_v28  ;;  %v6733_v31 = vmul.f32 0.5, %v8798_v36  ;;  %v6624_v41 = vadd.f32 %v8605_v38, %v13149_v63 }
 0x5e2   : > { %v10238_v40 = vpop.eup %10237  ;;  %7473 = vst [vmem:[%s12774_s1 + $0x128] sm:$0xff] %v8418_v60  ;;  %v8419_v39 = vpack.c.bf16 %v7042_v5, %v7042_v5  ;;  %v8800_v62 = vadd.f32 %v6433_v35, %v13089_v11  ;;  %v7048_v47 = vmul.f32 0.5, %v6936_v50  ;;  %10249 = vtanh.f32 %v6727_v12 }
 0x5e3   : > { %v10240_v7 = vpop.eup %10239  ;;  %v6937_v2 = vadd.f32 1.0, %v10238_v40  ;;  %v6739_v30 = vmul.f32 0.5, %v8799_v14  ;;  %10251 = vtanh.f32 %v6732_v43  ;;  %v6734_v28 = vmul.f32 0.5, %v6624_v41 }
 0x5e4   : > { %v10242_v49 = vpop.eup %10241  ;;  %7474 = vst.msk [vmem:[%s12774_s1 + $0x130] sm:$0xf] %vm7433_vm1, %v8419_v39  ;;  %v6942_v54 = vadd.f32 1.0, %v10240_v7  ;;  %v6740_v0 = vmul.f32 0.5, %v8800_v62  ;;  %v8422_v27 = vpack.c.bf16 %v7048_v47, %v7047_v48  ;;  %10253 = vtanh.f32 %v6733_v31 }
 0x5e5   : > { %v7049_v53 = vmul.f32 0.5, %v6937_v2  ;;  %v6943_v3 = vadd.f32 1.0, %v10242_v49  ;;  %10255 = vtanh.f32 %v6734_v28  ;;  %v8608_v11 = vadd.f32 %v8607_v61, %v8606_v18  ;;  %v10244_v44 = vpop.eup %10243 }
 0x5e6   : > { %v7054_v63 = vmul.f32 0.5, %v6942_v54  ;;  %7477 = vst [vmem:[%s12774_s1 + $0x144] sm:$0xff] %v8422_v27  ;;  %10257 = vtanh.f32 %v6739_v30  ;;  %v10246_v33 = vpop.eup %10245  ;;  %v6944_v37 = vadd.f32 1.0, %v10244_v44 }
 0x5e7   : > { %v8423_v10 = vpack.c.bf16 %v7049_v53, %v7049_v53  ;;  %v7055_v29 = vmul.f32 0.5, %v6943_v3  ;;  %10259 = vtanh.f32 %v6740_v0  ;;  %v6627_v1 = vadd.f32 %v8608_v11, %v13087_v24 }
 0x5e8   : > { %v6949_v34 = vadd.f32 1.0, %v10246_v33  ;;  %v7056_v20 = vmul.f32 0.5, %v6944_v37 }
 0x5e9   : > { %v10248_v56 = vpop.eup %10247  ;;  %7478 = vst.msk [vmem:[%s12774_s1 + $0x14c] sm:$0xf] %vm7433_vm1, %v8423_v10  ;;  %v8426_v51 = vpack.c.bf16 %v7055_v29, %v7054_v63  ;;  %v6741_v25 = vmul.f32 0.5, %v6627_v1 }
 0x5ea   : > { %v6950_v59 = vadd.f32 1.0, %v10248_v56  ;;  %v7061_v9 = vmul.f32 0.5, %v6949_v34  ;;  %v8427_v18 = vpack.c.bf16 %v7056_v20, %v7056_v20 }
 0x5eb   : > { %7481 = vst [vmem:[%s12774_s1 + $0x160] sm:$0xff] %v8426_v51  ;;  %10261 = vtanh.f32 %v6741_v25 }
 0x5ec   : > { %v7062_v8 = vmul.f32 0.5, %v6950_v59  ;;  %v10250_v46 = vpop.eup %10249  ;;  %7482 = vst.msk [vmem:[%s12774_s1 + $0x168] sm:$0xf] %vm7433_vm1, %v8427_v18 }
 0x5ed   : > { %v10252_v15 = vpop.eup %10251  ;;  %v6951_v24 = vadd.f32 1.0, %v10250_v46 }
 0x5ee   : > { %v8430_v6 = vpack.c.bf16 %v7062_v8, %v7061_v9  ;;  %v10254_v21 = vpop.eup %10253  ;;  %v6956_v35 = vadd.f32 1.0, %v10252_v15 }
 0x5ef   : > { %v10256_v61 = vpop.eup %10255  ;;  %v7063_v58 = vmul.f32 0.5, %v6951_v24  ;;  %v6957_v55 = vadd.f32 1.0, %v10254_v21 }
 0x5f0   : > { %7485 = vst [vmem:[%s12774_s1 + $0x17c] sm:$0xff] %v8430_v6  ;;  %v10258_v19 = vpop.eup %10257  ;;  %v7068_v23 = vmul.f32 0.5, %v6956_v35  ;;  %v6958_v17 = vadd.f32 1.0, %v10256_v61 }
 0x5f1   : > { %v10260_v26 = vpop.eup %10259  ;;  %v8431_v16 = vpack.c.bf16 %v7063_v58, %v7063_v58  ;;  %v7069_v13 = vmul.f32 0.5, %v6957_v55  ;;  %v6963_v4 = vadd.f32 1.0, %v10258_v19 }
 0x5f2   : > { %v7070_v32 = vmul.f32 0.5, %v6958_v17  ;;  %v6964_v22 = vadd.f32 1.0, %v10260_v26 }
 0x5f3   : > { %7486 = vst.msk [vmem:[%s12774_s1 + $0x184] sm:$0xf] %vm7433_vm1, %v8431_v16  ;;  %v8434_v42 = vpack.c.bf16 %v7069_v13, %v7068_v23  ;;  %v7075_v48 = vmul.f32 0.5, %v6963_v4 }
 0x5f4   : > { %v8435_v45 = vpack.c.bf16 %v7070_v32, %v7070_v32  ;;  %v7076_v52 = vmul.f32 0.5, %v6964_v22 }
 0x5f5   : > { %v10262_v57 = vpop.eup %10261  ;;  %7489 = vst [vmem:[%s12774_s1 + $0x198] sm:$0xff] %v8434_v42 }
 0x5f6   : > { %7490 = vst.msk [vmem:[%s12774_s1 + $0x1a0] sm:$0xf] %vm7433_vm1, %v8435_v45  ;;  %v8438_v60 = vpack.c.bf16 %v7076_v52, %v7075_v48  ;;  %v6965_v5 = vadd.f32 1.0, %v10262_v57 }
 0x5f8   : > { %7493 = vst [vmem:[%s12774_s1 + $0x1b4] sm:$0xff] %v8438_v60  ;;  %v7077_v36 = vmul.f32 0.5, %v6965_v5 }
 0x5fa   : > { %v8439_v38 = vpack.c.bf16 %v7077_v36, %v7077_v36 }
 0x5fc   : > { %7494 = vst.msk [vmem:[%s12774_s1 + $0x1bc] sm:$0xf] %vm7433_vm1, %v8439_v38 }
 0x5fd PF: > { %p9133_p5 = scmp.ge.s32.totalorder %s10358_s24, 2  ;;  %s7596_s18 = sand.u32 1, %s10346_s21  }
 0x5fe   : > { %s7597_s28 = scalar_lea.sflag [#allocation3], %s7596_s18 }
 0x5ff   : > { %p9127_p7 = pnand %p9133_p5, %p10472_p6 }
 0x601   : > { %10337 = dma.done.wait (!%p9127_p7), %s7597_s28, 2048  }
 0x602   : > { %10339 = vsyncadd (!%p9127_p7), %s7597_s28, 4294965248  ;;  %s7606_s29 = scalar_lea.sflag [#allocation5], %s7596_s18 }
 0x603   : > { %10341 = dma.done.wait (!%p9127_p7), %s7606_s29, 2048  }
 0x604   : > { %10343 = vsyncadd (!%p9127_p7), %s7606_s29, 4294965248  ;;  %s13284_s24 = sld [smem:[#allocation9_spill]]  ;;  %s13285_s20 = sld [smem:[#allocation8_spill]] }
 0x605   : > { %s13286_s23 = sld [smem:[#allocation10_spill]]  ;;  %s13287_s21 = smov %s10350_s22 }
 0x60a   : > { %p26_p8 = scmp.ge.s32.totalorder %s13284_s24, 5   ;;  %s13288_s22 = smov %s13285_s20 }
 0x60c   :  { %28 = sbr.rel (!%p26_p8) target bundleno = 8 (0x8), region = 127 }
 0x613   :  { %7611 = vsyncpa [#allocation3], 1 }
 0x614   :  { %7613 = vsyncpa [#allocation3 + $0x1], 1 }
 0x615   :  { %7614 = vsyncpa [#allocation5], 1 }
 0x616   :  { %7616 = vsyncpa [#allocation5 + $0x1], 1 }

</bundles_post_ra>
